<compile_context>
chip_gen: v7x
topology: tpu7x:2x2x1
jax: 0.10.0
libtpu: 0.0.40
codegen_flags: <defaults>
</compile_context>

<pallas_src>
import functools

import jax
import jax.numpy as jnp
from jax.experimental import pallas as pl
from jax.experimental.pallas import tpu as pltpu

# ---- config (all features equal: residuals x + conv(x) require it) ----------
IN_F = 32
HID_F = 32
OUT_F = 32
NODE_N = 16
EDGE_E = 8
BATCH = 2
MLP_HID = 256
N_CLASS = 2

# Conv-chain matmuls: default precision (single-pass MXU), review-approved.
_DOT = functools.partial(jnp.dot, preferred_element_type=jnp.float32)
# Classifier matmuls: keep fp32 parity on the K=512 contraction + head.
_DOT_HI = functools.partial(jnp.dot, preferred_element_type=jnp.float32,
                            precision=jax.lax.Precision.HIGHEST)


def _gelu(x):
    # TODO(synk): tanh-approximate GELU (EUP-friendly); torch nn.GELU default
    # is the exact erf form, so logits differ at ~1e-3 relative.
    c = jnp.float32(0.7978845608028654)  # sqrt(2/pi)
    return 0.5 * x * (1.0 + jnp.tanh(c * (x + 0.044715 * x * x * x)))


# -----------------------------------------------------------------------------
# Fused kernel: both TAHGConv layers + residuals + classifier MLP + log_softmax.
# Gridless; every operand is a full-array VMEM block except wc1 (manual DMA).
# -----------------------------------------------------------------------------
def tahgnn_fused_kernel(x_ref, a0_ref, htns_ref, hge_ref,
                        w0_ref, b0_ref, w1_ref, b1_ref,
                        wc1_hbm, bc1_ref, wc2_ref, bc2_ref,
                        logp_ref, efts_ref,
                        wc1_sc, h1_sc, h1flat_sc, dma_sem):
    # Kick off the classifier-weight DMA immediately (2 row chunks) so it
    # overlaps the conv compute; the classifier dot waits per K-chunk so the
    # first half's matmul can start before the second half has landed.
    half = (NODE_N * OUT_F) // 2
    wc1_cps = [
        pltpu.make_async_copy(wc1_hbm.at[pl.ds(c * half, half), :],
                              wc1_sc.at[pl.ds(c * half, half), :],
                              dma_sem.at[c])
        for c in range(2)
    ]
    for cp in wc1_cps:
        cp.start()

    x = x_ref[...]                                    # (B*N, F), batch-major

    # ---- TAHGConv layer 0 (ns, ge, H@H^T pre-folded into A0_bd) ----
    xw0 = _DOT(x, w0_ref[...]) + b0_ref[...]          # (B*N, F)
    h0 = jnp.maximum(_DOT(a0_ref[...], xw0), 0.0) + x # (B*N, F)  + residual

    # ---- TAHGConv layer 1 (e_fts is a returned output, keep explicit e1) ----
    xw1 = _DOT(h0, w1_ref[...]) + b1_ref[...]         # (B*N, F)
    e1 = _DOT(htns_ref[...], xw1)                     # (B*E, F)
    h1 = h0 + jnp.maximum(_DOT(hge_ref[...], e1), 0.0)

    efts_ref[...] = e1
    h1_sc[...] = h1                                   # stays in VMEM

    # ---- flatten (B*N, F) -> (B, N*F): one-time relayout into a contiguous
    # lane-major scratch.  flat[b, n*F+f] = h1[b*N+n, f]; each strided read
    # picks batch rows {n, N+n}.  Pure vld/vst work, off the MXU chain.
    for n in range(NODE_N):                           # static unroll, N=16
        h1flat_sc[:, n * OUT_F:(n + 1) * OUT_F] = (
            h1_sc[pl.ds(n, BATCH, stride=NODE_N), :])

    # ---- classifier: Linear(N*F,256) -> GELU -> Linear(256,2) -> log_softmax
    flat = h1flat_sc[...]                             # (B, N*F) = (2, 512)
    wc1_cps[0].wait()
    acc = _DOT_HI(flat[:, :half], wc1_sc[pl.ds(0, half), :])
    wc1_cps[1].wait()
    acc = acc + _DOT_HI(flat[:, half:], wc1_sc[pl.ds(half, half), :])

    z = _gelu(acc + bc1_ref[...])                     # (B, 256)
    logits = _DOT_HI(z, wc2_ref[...]) + bc2_ref[...]  # (B, 2)

    m = jnp.max(logits, axis=-1, keepdims=True)
    lse = m + jnp.log(jnp.sum(jnp.exp(logits - m), axis=-1, keepdims=True))
    logp_ref[...] = logits - lse


# -----------------------------------------------------------------------------
# Wrapper
# -----------------------------------------------------------------------------
def _vmem_spec():
    return pl.BlockSpec(memory_space=pltpu.MemorySpace.VMEM)


def _block_diag(mats):
    """(B, r, c) -> block-diagonal (B*r, B*c)."""
    b, r, c = mats.shape
    eye = jnp.eye(b, dtype=mats.dtype)
    return jnp.einsum("ipq,ij->ipjq", mats, eye).reshape(b * r, b * c)


@jax.jit
def tahgnn_forward(x, H, node_strength, global_efficiency, dist_matrix, params):
    # dist_matrix is accepted but unused in the reference forward pass.
    del dist_matrix
    B, N, F = x.shape
    E = H.shape[1]

    # ---- wrapper-side folding (tiny plain-JAX precompute) ----
    ns = node_strength.reshape(B, N).astype(jnp.float32)            # (B, N)
    ge = global_efficiency.reshape(B).astype(jnp.float32)           # (B,)

    HHt = H @ H.T                                                    # (N, N)
    a0 = ge[:, None, None] * HHt[None, :, :] * ns[:, None, :]        # (B, N, N)
    htns = H.T[None, :, :] * ns[:, None, :]                          # (B, E, N)
    hge = ge[:, None, None] * H[None, :, :]                          # (B, N, E)

    a0_bd = _block_diag(a0)                                          # (B*N, B*N)
    htns_bd = _block_diag(htns)                                      # (B*E, B*N)
    hge_bd = _block_diag(hge)                                        # (B*N, B*E)

    xs = x.reshape(B * N, F)                                         # batch-major
    b0 = params["b0"].reshape(1, -1)
    b1 = params["b1"].reshape(1, -1)
    bc1 = params["bc1"].reshape(1, -1)
    bc2 = params["bc2"].reshape(1, -1)

    in_specs = [_vmem_spec() for _ in range(12)]
    in_specs[8] = pl.BlockSpec(memory_space=pl.ANY)   # wc1: raw HBM, manual DMA

    logp, efts_s = pl.pallas_call(
        tahgnn_fused_kernel,
        out_shape=(jax.ShapeDtypeStruct((B, N_CLASS), jnp.float32),
                   jax.ShapeDtypeStruct((B * E, F), jnp.float32)),
        in_specs=in_specs,
        out_specs=(_vmem_spec(), _vmem_spec()),
        scratch_shapes=[
            pltpu.VMEM((N * F, MLP_HID), jnp.float32),   # wc1 VMEM copy (512 KiB)
            pltpu.VMEM((B * N, F), jnp.float32),         # h1 (never hits HBM)
            pltpu.VMEM((B, N * F), jnp.float32),         # flattened h1 (4 KiB)
            pltpu.SemaphoreType.DMA((2,)),               # one sem per wc1 chunk
        ],
    )(xs, a0_bd, htns_bd, hge_bd,
      params["w0"], b0, params["w1"], b1,
      params["wc1"], bc1, params["wc2"], bc2)

    e_fts = efts_s.reshape(B, E, F)   # trivial leading-dim split (XLA metadata)
    return logp, e_fts


# TODO(synk): dropout layers are identity here (eval-mode semantics).

if __name__ == "__main__":
    key = jax.random.PRNGKey(0)
    ks = jax.random.split(key, 10)

    # Deterministic example inputs
    x = jax.random.normal(ks[0], (BATCH, NODE_N, IN_F), jnp.float32)
    H = (jax.random.uniform(ks[1], (NODE_N, EDGE_E)) > 0.5).astype(jnp.float32)
    node_strength = jax.random.uniform(ks[2], (BATCH, NODE_N), jnp.float32)
    global_efficiency = 0.5 + jax.random.uniform(ks[3], (BATCH, 1), jnp.float32)
    dist_matrix = jax.random.uniform(ks[4], (NODE_N, NODE_N), jnp.float32)

    # Deterministic parameter init (shapes from the module __init__)
    def lin(k, fan_in, fan_out):
        return jax.random.normal(k, (fan_in, fan_out), jnp.float32) / jnp.sqrt(
            jnp.float32(fan_in))

    params = dict(
        w0=lin(ks[5], IN_F, HID_F),
        b0=jnp.zeros((HID_F,), jnp.float32),
        w1=lin(ks[6], HID_F, OUT_F),
        b1=jnp.zeros((OUT_F,), jnp.float32),
        wc1=lin(ks[7], NODE_N * OUT_F, MLP_HID),
        bc1=jnp.zeros((MLP_HID,), jnp.float32),
        wc2=lin(ks[8], MLP_HID, N_CLASS),
        bc2=jnp.zeros((N_CLASS,), jnp.float32),
    )

    logp, e_fts = tahgnn_forward(x, H, node_strength, global_efficiency,
                                 dist_matrix, params)
    jax.block_until_ready((logp, e_fts))

    assert logp.shape == (BATCH, N_CLASS)
    assert e_fts.shape == (BATCH, EDGE_E, OUT_F)
    # log_softmax rows must sum to ~1 in prob space
    assert bool(jnp.allclose(jnp.sum(jnp.exp(logp), axis=-1), 1.0, atol=1e-5))
    print("KERNEL_OK")
</pallas_src>

<mosaic_0001>
module attributes {stable_mosaic.version = 11 : i64} {
  func.func @tahgnn_fused_kernel(%arg0: memref<32x32xf32, #tpu.memory_space<vmem>>, %arg1: memref<32x32xf32, #tpu.memory_space<vmem>>, %arg2: memref<16x32xf32, #tpu.memory_space<vmem>>, %arg3: memref<32x16xf32, #tpu.memory_space<vmem>>, %arg4: memref<32x32xf32, #tpu.memory_space<vmem>>, %arg5: memref<1x32xf32, #tpu.memory_space<vmem>>, %arg6: memref<32x32xf32, #tpu.memory_space<vmem>>, %arg7: memref<1x32xf32, #tpu.memory_space<vmem>>, %arg8: memref<512x256xf32, #tpu.memory_space<any>>, %arg9: memref<1x256xf32, #tpu.memory_space<vmem>>, %arg10: memref<256x2xf32, #tpu.memory_space<vmem>>, %arg11: memref<1x2xf32, #tpu.memory_space<vmem>>, %arg12: memref<2x2xf32, #tpu.memory_space<vmem>>, %arg13: memref<16x32xf32, #tpu.memory_space<vmem>>, %arg14: memref<512x256xf32, #tpu.memory_space<vmem>>, %arg15: memref<32x32xf32, #tpu.memory_space<vmem>>, %arg16: memref<2x512xf32, #tpu.memory_space<vmem>>, %arg17: memref<2x!tpu.dma_semaphore, #tpu.memory_space<semaphore_mem>>) attributes {dimension_semantics = [], scalar_prefetch = 0 : i64, scratch_operands = 4 : i64, tpu.core_type = #tpu.core_type<tc>} {
    %c0_i32 = arith.constant 0 : i32
    %c0_i32_0 = arith.constant 0 : i32
    %c0_i32_1 = arith.constant 0 : i32
    %0 = tpu.memref_slice %arg8[%c0_i32_0, %c0_i32_1] : memref<512x256xf32, #tpu.memory_space<any>> -> memref<256x256xf32, #tpu.memory_space<any>>
    %c0_i32_2 = arith.constant 0 : i32
    %c0_i32_3 = arith.constant 0 : i32
    %1 = tpu.memref_slice %arg14[%c0_i32_2, %c0_i32_3] : memref<512x256xf32, #tpu.memory_space<vmem>> -> memref<256x256xf32, #tpu.memory_space<vmem>>
    %2 = tpu.memref_slice %arg17[%c0_i32] : memref<2x!tpu.dma_semaphore, #tpu.memory_space<semaphore_mem>> -> memref<1x!tpu.dma_semaphore, #tpu.memory_space<semaphore_mem>>
    %3 = tpu.memref_squeeze %2 : memref<1x!tpu.dma_semaphore, #tpu.memory_space<semaphore_mem>> -> memref<!tpu.dma_semaphore, #tpu.memory_space<semaphore_mem>>
    tpu.enqueue_dma source(%0 : memref<256x256xf32, #tpu.memory_space<any>>) target(%1 : memref<256x256xf32, #tpu.memory_space<vmem>>) target_semaphore(%3 : memref<!tpu.dma_semaphore, #tpu.memory_space<semaphore_mem>>)
    %c1_i32 = arith.constant 1 : i32
    %c256_i32 = arith.constant 256 : i32
    %c0_i32_4 = arith.constant 0 : i32
    %4 = tpu.memref_slice %arg8[%c256_i32, %c0_i32_4] : memref<512x256xf32, #tpu.memory_space<any>> -> memref<256x256xf32, #tpu.memory_space<any>>
    %c256_i32_5 = arith.constant 256 : i32
    %c0_i32_6 = arith.constant 0 : i32
    %5 = tpu.memref_slice %arg14[%c256_i32_5, %c0_i32_6] : memref<512x256xf32, #tpu.memory_space<vmem>> -> memref<256x256xf32, #tpu.memory_space<vmem>>
    %6 = tpu.memref_slice %arg17[%c1_i32] : memref<2x!tpu.dma_semaphore, #tpu.memory_space<semaphore_mem>> -> memref<1x!tpu.dma_semaphore, #tpu.memory_space<semaphore_mem>>
    %7 = tpu.memref_squeeze %6 : memref<1x!tpu.dma_semaphore, #tpu.memory_space<semaphore_mem>> -> memref<!tpu.dma_semaphore, #tpu.memory_space<semaphore_mem>>
    tpu.enqueue_dma source(%4 : memref<256x256xf32, #tpu.memory_space<any>>) target(%5 : memref<256x256xf32, #tpu.memory_space<vmem>>) target_semaphore(%7 : memref<!tpu.dma_semaphore, #tpu.memory_space<semaphore_mem>>)
    %c0 = arith.constant 0 : index
    %c0_7 = arith.constant 0 : index
    %8 = vector.load %arg0[%c0, %c0_7] : memref<32x32xf32, #tpu.memory_space<vmem>>, vector<32x32xf32>
    %c0_8 = arith.constant 0 : index
    %c0_9 = arith.constant 0 : index
    %9 = vector.load %arg4[%c0_8, %c0_9] : memref<32x32xf32, #tpu.memory_space<vmem>>, vector<32x32xf32>
    %cst = arith.constant dense<0.000000e+00> : vector<32x32xf32>
    %10 = tpu.matmul %8, %9, %cst {dimension_numbers = #tpu.dot_dimension_numbers<[1], [0], [0], [1], [0, 0, 1, 1], [], []>} : vector<32x32xf32>, vector<32x32xf32>, vector<32x32xf32> -> vector<32x32xf32>
    %c0_10 = arith.constant 0 : index
    %c0_11 = arith.constant 0 : index
    %11 = vector.load %arg5[%c0_10, %c0_11] : memref<1x32xf32, #tpu.memory_space<vmem>>, vector<1x32xf32>
    %12 = vector.broadcast %11 : vector<1x32xf32> to vector<32x32xf32>
    %13 = arith.addf %10, %12 : vector<32x32xf32>
    %c0_12 = arith.constant 0 : index
    %c0_13 = arith.constant 0 : index
    %14 = vector.load %arg1[%c0_12, %c0_13] : memref<32x32xf32, #tpu.memory_space<vmem>>, vector<32x32xf32>
    %cst_14 = arith.constant dense<0.000000e+00> : vector<32x32xf32>
    %15 = tpu.matmul %14, %13, %cst_14 {dimension_numbers = #tpu.dot_dimension_numbers<[1], [0], [0], [1], [0, 0, 1, 1], [], []>} : vector<32x32xf32>, vector<32x32xf32>, vector<32x32xf32> -> vector<32x32xf32>
    %cst_15 = arith.constant 0.000000e+00 : f32
    %16 = vector.broadcast %cst_15 : f32 to vector<32x32xf32>
    %17 = arith.maximumf %15, %16 : vector<32x32xf32>
    %18 = arith.addf %17, %8 : vector<32x32xf32>
    %c0_16 = arith.constant 0 : index
    %c0_17 = arith.constant 0 : index
    %19 = vector.load %arg6[%c0_16, %c0_17] : memref<32x32xf32, #tpu.memory_space<vmem>>, vector<32x32xf32>
    %cst_18 = arith.constant dense<0.000000e+00> : vector<32x32xf32>
    %20 = tpu.matmul %18, %19, %cst_18 {dimension_numbers = #tpu.dot_dimension_numbers<[1], [0], [0], [1], [0, 0, 1, 1], [], []>} : vector<32x32xf32>, vector<32x32xf32>, vector<32x32xf32> -> vector<32x32xf32>
    %c0_19 = arith.constant 0 : index
    %c0_20 = arith.constant 0 : index
    %21 = vector.load %arg7[%c0_19, %c0_20] : memref<1x32xf32, #tpu.memory_space<vmem>>, vector<1x32xf32>
    %22 = vector.broadcast %21 : vector<1x32xf32> to vector<32x32xf32>
    %23 = arith.addf %20, %22 : vector<32x32xf32>
    %c0_21 = arith.constant 0 : index
    %c0_22 = arith.constant 0 : index
    %24 = vector.load %arg2[%c0_21, %c0_22] : memref<16x32xf32, #tpu.memory_space<vmem>>, vector<16x32xf32>
    %cst_23 = arith.constant dense<0.000000e+00> : vector<16x32xf32>
    %25 = tpu.matmul %24, %23, %cst_23 {dimension_numbers = #tpu.dot_dimension_numbers<[1], [0], [0], [1], [0, 0, 1, 1], [], []>} : vector<16x32xf32>, vector<32x32xf32>, vector<16x32xf32> -> vector<16x32xf32>
    %c0_24 = arith.constant 0 : index
    %c0_25 = arith.constant 0 : index
    %26 = vector.load %arg3[%c0_24, %c0_25] : memref<32x16xf32, #tpu.memory_space<vmem>>, vector<32x16xf32>
    %cst_26 = arith.constant dense<0.000000e+00> : vector<32x32xf32>
    %27 = tpu.matmul %26, %25, %cst_26 {dimension_numbers = #tpu.dot_dimension_numbers<[1], [0], [0], [1], [0, 0, 1, 1], [], []>} : vector<32x16xf32>, vector<16x32xf32>, vector<32x32xf32> -> vector<32x32xf32>
    %cst_27 = arith.constant 0.000000e+00 : f32
    %28 = vector.broadcast %cst_27 : f32 to vector<32x32xf32>
    %29 = arith.maximumf %27, %28 : vector<32x32xf32>
    %30 = arith.addf %18, %29 : vector<32x32xf32>
    %c0_28 = arith.constant 0 : index
    %c0_29 = arith.constant 0 : index
    %31 = vector.load %arg13[%c0_28, %c0_29] : memref<16x32xf32, #tpu.memory_space<vmem>>, vector<16x32xf32>
    tpu.vector_store %arg13[%c0_28, %c0_29], %25 {strides = array<i32>} : memref<16x32xf32, #tpu.memory_space<vmem>>, vector<16x32xf32>,
    %c0_30 = arith.constant 0 : index
    %c0_31 = arith.constant 0 : index
    %32 = vector.load %arg15[%c0_30, %c0_31] : memref<32x32xf32, #tpu.memory_space<vmem>>, vector<32x32xf32>
    tpu.vector_store %arg15[%c0_30, %c0_31], %30 {strides = array<i32>} : memref<32x32xf32, #tpu.memory_space<vmem>>, vector<32x32xf32>,
    %c0_32 = arith.constant 0 : index
    %c0_33 = arith.constant 0 : index
    %33 = tpu.strided_load %arg15[%c0_32, %c0_33] {strides = array<i32: 16, 1>} : memref<32x32xf32, #tpu.memory_space<vmem>>, vector<2x32xf32>
    %c0_34 = arith.constant 0 : index
    %c0_35 = arith.constant 0 : index
    %34 = vector.load %arg16[%c0_34, %c0_35] : memref<2x512xf32, #tpu.memory_space<vmem>>, vector<2x32xf32>
    tpu.vector_store %arg16[%c0_34, %c0_35], %33 {strides = array<i32>} : memref<2x512xf32, #tpu.memory_space<vmem>>, vector<2x32xf32>,
    %c1 = arith.constant 1 : index
    %c0_36 = arith.constant 0 : index
    %35 = tpu.strided_load %arg15[%c1, %c0_36] {strides = array<i32: 16, 1>} : memref<32x32xf32, #tpu.memory_space<vmem>>, vector<2x32xf32>
    %c0_37 = arith.constant 0 : index
    %c32 = arith.constant 32 : index
    %36 = vector.load %arg16[%c0_37, %c32] : memref<2x512xf32, #tpu.memory_space<vmem>>, vector<2x32xf32>
    tpu.vector_store %arg16[%c0_37, %c32], %35 {strides = array<i32>} : memref<2x512xf32, #tpu.memory_space<vmem>>, vector<2x32xf32>,
    %c2 = arith.constant 2 : index
    %c0_38 = arith.constant 0 : index
    %37 = tpu.strided_load %arg15[%c2, %c0_38] {strides = array<i32: 16, 1>} : memref<32x32xf32, #tpu.memory_space<vmem>>, vector<2x32xf32>
    %c0_39 = arith.constant 0 : index
    %c64 = arith.constant 64 : index
    %38 = vector.load %arg16[%c0_39, %c64] : memref<2x512xf32, #tpu.memory_space<vmem>>, vector<2x32xf32>
    tpu.vector_store %arg16[%c0_39, %c64], %37 {strides = array<i32>} : memref<2x512xf32, #tpu.memory_space<vmem>>, vector<2x32xf32>,
    %c3 = arith.constant 3 : index
    %c0_40 = arith.constant 0 : index
    %39 = tpu.strided_load %arg15[%c3, %c0_40] {strides = array<i32: 16, 1>} : memref<32x32xf32, #tpu.memory_space<vmem>>, vector<2x32xf32>
    %c0_41 = arith.constant 0 : index
    %c96 = arith.constant 96 : index
    %40 = vector.load %arg16[%c0_41, %c96] : memref<2x512xf32, #tpu.memory_space<vmem>>, vector<2x32xf32>
    tpu.vector_store %arg16[%c0_41, %c96], %39 {strides = array<i32>} : memref<2x512xf32, #tpu.memory_space<vmem>>, vector<2x32xf32>,
    %c4 = arith.constant 4 : index
    %c0_42 = arith.constant 0 : index
    %41 = tpu.strided_load %arg15[%c4, %c0_42] {strides = array<i32: 16, 1>} : memref<32x32xf32, #tpu.memory_space<vmem>>, vector<2x32xf32>
    %c0_43 = arith.constant 0 : index
    %c128 = arith.constant 128 : index
    %42 = vector.load %arg16[%c0_43, %c128] : memref<2x512xf32, #tpu.memory_space<vmem>>, vector<2x32xf32>
    tpu.vector_store %arg16[%c0_43, %c128], %41 {strides = array<i32>} : memref<2x512xf32, #tpu.memory_space<vmem>>, vector<2x32xf32>,
    %c5 = arith.constant 5 : index
    %c0_44 = arith.constant 0 : index
    %43 = tpu.strided_load %arg15[%c5, %c0_44] {strides = array<i32: 16, 1>} : memref<32x32xf32, #tpu.memory_space<vmem>>, vector<2x32xf32>
    %c0_45 = arith.constant 0 : index
    %c160 = arith.constant 160 : index
    %44 = vector.load %arg16[%c0_45, %c160] : memref<2x512xf32, #tpu.memory_space<vmem>>, vector<2x32xf32>
    tpu.vector_store %arg16[%c0_45, %c160], %43 {strides = array<i32>} : memref<2x512xf32, #tpu.memory_space<vmem>>, vector<2x32xf32>,
    %c6 = arith.constant 6 : index
    %c0_46 = arith.constant 0 : index
    %45 = tpu.strided_load %arg15[%c6, %c0_46] {strides = array<i32: 16, 1>} : memref<32x32xf32, #tpu.memory_space<vmem>>, vector<2x32xf32>
    %c0_47 = arith.constant 0 : index
    %c192 = arith.constant 192 : index
    %46 = vector.load %arg16[%c0_47, %c192] : memref<2x512xf32, #tpu.memory_space<vmem>>, vector<2x32xf32>
    tpu.vector_store %arg16[%c0_47, %c192], %45 {strides = array<i32>} : memref<2x512xf32, #tpu.memory_space<vmem>>, vector<2x32xf32>,
    %c7 = arith.constant 7 : index
    %c0_48 = arith.constant 0 : index
    %47 = tpu.strided_load %arg15[%c7, %c0_48] {strides = array<i32: 16, 1>} : memref<32x32xf32, #tpu.memory_space<vmem>>, vector<2x32xf32>
    %c0_49 = arith.constant 0 : index
    %c224 = arith.constant 224 : index
    %48 = vector.load %arg16[%c0_49, %c224] : memref<2x512xf32, #tpu.memory_space<vmem>>, vector<2x32xf32>
    tpu.vector_store %arg16[%c0_49, %c224], %47 {strides = array<i32>} : memref<2x512xf32, #tpu.memory_space<vmem>>, vector<2x32xf32>,
    %c8 = arith.constant 8 : index
    %c0_50 = arith.constant 0 : index
    %49 = tpu.strided_load %arg15[%c8, %c0_50] {strides = array<i32: 16, 1>} : memref<32x32xf32, #tpu.memory_space<vmem>>, vector<2x32xf32>
    %c0_51 = arith.constant 0 : index
    %c256 = arith.constant 256 : index
    %50 = vector.load %arg16[%c0_51, %c256] : memref<2x512xf32, #tpu.memory_space<vmem>>, vector<2x32xf32>
    tpu.vector_store %arg16[%c0_51, %c256], %49 {strides = array<i32>} : memref<2x512xf32, #tpu.memory_space<vmem>>, vector<2x32xf32>,
    %c9 = arith.constant 9 : index
    %c0_52 = arith.constant 0 : index
    %51 = tpu.strided_load %arg15[%c9, %c0_52] {strides = array<i32: 16, 1>} : memref<32x32xf32, #tpu.memory_space<vmem>>, vector<2x32xf32>
    %c0_53 = arith.constant 0 : index
    %c288 = arith.constant 288 : index
    %52 = vector.load %arg16[%c0_53, %c288] : memref<2x512xf32, #tpu.memory_space<vmem>>, vector<2x32xf32>
    tpu.vector_store %arg16[%c0_53, %c288], %51 {strides = array<i32>} : memref<2x512xf32, #tpu.memory_space<vmem>>, vector<2x32xf32>,
    %c10 = arith.constant 10 : index
    %c0_54 = arith.constant 0 : index
    %53 = tpu.strided_load %arg15[%c10, %c0_54] {strides = array<i32: 16, 1>} : memref<32x32xf32, #tpu.memory_space<vmem>>, vector<2x32xf32>
    %c0_55 = arith.constant 0 : index
    %c320 = arith.constant 320 : index
    %54 = vector.load %arg16[%c0_55, %c320] : memref<2x512xf32, #tpu.memory_space<vmem>>, vector<2x32xf32>
    tpu.vector_store %arg16[%c0_55, %c320], %53 {strides = array<i32>} : memref<2x512xf32, #tpu.memory_space<vmem>>, vector<2x32xf32>,
    %c11 = arith.constant 11 : index
    %c0_56 = arith.constant 0 : index
    %55 = tpu.strided_load %arg15[%c11, %c0_56] {strides = array<i32: 16, 1>} : memref<32x32xf32, #tpu.memory_space<vmem>>, vector<2x32xf32>
    %c0_57 = arith.constant 0 : index
    %c352 = arith.constant 352 : index
    %56 = vector.load %arg16[%c0_57, %c352] : memref<2x512xf32, #tpu.memory_space<vmem>>, vector<2x32xf32>
    tpu.vector_store %arg16[%c0_57, %c352], %55 {strides = array<i32>} : memref<2x512xf32, #tpu.memory_space<vmem>>, vector<2x32xf32>,
    %c12 = arith.constant 12 : index
    %c0_58 = arith.constant 0 : index
    %57 = tpu.strided_load %arg15[%c12, %c0_58] {strides = array<i32: 16, 1>} : memref<32x32xf32, #tpu.memory_space<vmem>>, vector<2x32xf32>
    %c0_59 = arith.constant 0 : index
    %c384 = arith.constant 384 : index
    %58 = vector.load %arg16[%c0_59, %c384] : memref<2x512xf32, #tpu.memory_space<vmem>>, vector<2x32xf32>
    tpu.vector_store %arg16[%c0_59, %c384], %57 {strides = array<i32>} : memref<2x512xf32, #tpu.memory_space<vmem>>, vector<2x32xf32>,
    %c13 = arith.constant 13 : index
    %c0_60 = arith.constant 0 : index
    %59 = tpu.strided_load %arg15[%c13, %c0_60] {strides = array<i32: 16, 1>} : memref<32x32xf32, #tpu.memory_space<vmem>>, vector<2x32xf32>
    %c0_61 = arith.constant 0 : index
    %c416 = arith.constant 416 : index
    %60 = vector.load %arg16[%c0_61, %c416] : memref<2x512xf32, #tpu.memory_space<vmem>>, vector<2x32xf32>
    tpu.vector_store %arg16[%c0_61, %c416], %59 {strides = array<i32>} : memref<2x512xf32, #tpu.memory_space<vmem>>, vector<2x32xf32>,
    %c14 = arith.constant 14 : index
    %c0_62 = arith.constant 0 : index
    %61 = tpu.strided_load %arg15[%c14, %c0_62] {strides = array<i32: 16, 1>} : memref<32x32xf32, #tpu.memory_space<vmem>>, vector<2x32xf32>
    %c0_63 = arith.constant 0 : index
    %c448 = arith.constant 448 : index
    %62 = vector.load %arg16[%c0_63, %c448] : memref<2x512xf32, #tpu.memory_space<vmem>>, vector<2x32xf32>
    tpu.vector_store %arg16[%c0_63, %c448], %61 {strides = array<i32>} : memref<2x512xf32, #tpu.memory_space<vmem>>, vector<2x32xf32>,
    %c15 = arith.constant 15 : index
    %c0_64 = arith.constant 0 : index
    %63 = tpu.strided_load %arg15[%c15, %c0_64] {strides = array<i32: 16, 1>} : memref<32x32xf32, #tpu.memory_space<vmem>>, vector<2x32xf32>
    %c0_65 = arith.constant 0 : index
    %c480 = arith.constant 480 : index
    %64 = vector.load %arg16[%c0_65, %c480] : memref<2x512xf32, #tpu.memory_space<vmem>>, vector<2x32xf32>
    tpu.vector_store %arg16[%c0_65, %c480], %63 {strides = array<i32>} : memref<2x512xf32, #tpu.memory_space<vmem>>, vector<2x32xf32>,
    %c0_66 = arith.constant 0 : index
    %c0_67 = arith.constant 0 : index
    %65 = vector.load %arg16[%c0_66, %c0_67] : memref<2x512xf32, #tpu.memory_space<vmem>>, vector<2x512xf32>
    %c0_i32_68 = arith.constant 0 : i32
    %c0_i32_69 = arith.constant 0 : i32
    %c0_i32_70 = arith.constant 0 : i32
    %66 = tpu.memref_slice %arg8[%c0_i32_69, %c0_i32_70] : memref<512x256xf32, #tpu.memory_space<any>> -> memref<256x256xf32, #tpu.memory_space<any>>
    %c0_i32_71 = arith.constant 0 : i32
    %c0_i32_72 = arith.constant 0 : i32
    %67 = tpu.memref_slice %arg14[%c0_i32_71, %c0_i32_72] : memref<512x256xf32, #tpu.memory_space<vmem>> -> memref<256x256xf32, #tpu.memory_space<vmem>>
    %68 = tpu.memref_slice %arg17[%c0_i32_68] : memref<2x!tpu.dma_semaphore, #tpu.memory_space<semaphore_mem>> -> memref<1x!tpu.dma_semaphore, #tpu.memory_space<semaphore_mem>>
    %69 = tpu.memref_squeeze %68 : memref<1x!tpu.dma_semaphore, #tpu.memory_space<semaphore_mem>> -> memref<!tpu.dma_semaphore, #tpu.memory_space<semaphore_mem>>
    tpu.wait_dma2 semaphore(%69 : memref<!tpu.dma_semaphore, #tpu.memory_space<semaphore_mem>>) src(%66 : memref<256x256xf32, #tpu.memory_space<any>>) dst(%67 : memref<256x256xf32, #tpu.memory_space<vmem>>)
    %70 = vector.extract_strided_slice %65 {offsets = [0, 0], sizes = [2, 256], strides = [1, 1]} : vector<2x512xf32> to vector<2x256xf32>
    %c0_73 = arith.constant 0 : index
    %c0_74 = arith.constant 0 : index
    %71 = vector.load %arg14[%c0_73, %c0_74] : memref<512x256xf32, #tpu.memory_space<vmem>>, vector<256x256xf32>
    %cst_75 = arith.constant dense<0.000000e+00> : vector<2x256xf32>
    %72 = tpu.matmul %70, %71, %cst_75 {dimension_numbers = #tpu.dot_dimension_numbers<[1], [0], [0], [1], [0, 0, 1, 1], [], []>, precision = #tpu.contract_precision<fp32>} : vector<2x256xf32>, vector<256x256xf32>, vector<2x256xf32> -> vector<2x256xf32>
    %c1_i32_76 = arith.constant 1 : i32
    %c256_i32_77 = arith.constant 256 : i32
    %c0_i32_78 = arith.constant 0 : i32
    %73 = tpu.memref_slice %arg8[%c256_i32_77, %c0_i32_78] : memref<512x256xf32, #tpu.memory_space<any>> -> memref<256x256xf32, #tpu.memory_space<any>>
    %c256_i32_79 = arith.constant 256 : i32
    %c0_i32_80 = arith.constant 0 : i32
    %74 = tpu.memref_slice %arg14[%c256_i32_79, %c0_i32_80] : memref<512x256xf32, #tpu.memory_space<vmem>> -> memref<256x256xf32, #tpu.memory_space<vmem>>
    %75 = tpu.memref_slice %arg17[%c1_i32_76] : memref<2x!tpu.dma_semaphore, #tpu.memory_space<semaphore_mem>> -> memref<1x!tpu.dma_semaphore, #tpu.memory_space<semaphore_mem>>
    %76 = tpu.memref_squeeze %75 : memref<1x!tpu.dma_semaphore, #tpu.memory_space<semaphore_mem>> -> memref<!tpu.dma_semaphore, #tpu.memory_space<semaphore_mem>>
    tpu.wait_dma2 semaphore(%76 : memref<!tpu.dma_semaphore, #tpu.memory_space<semaphore_mem>>) src(%73 : memref<256x256xf32, #tpu.memory_space<any>>) dst(%74 : memref<256x256xf32, #tpu.memory_space<vmem>>)
    %77 = vector.extract_strided_slice %65 {offsets = [0, 256], sizes = [2, 256], strides = [1, 1]} : vector<2x512xf32> to vector<2x256xf32>
    %c256_81 = arith.constant 256 : index
    %c0_82 = arith.constant 0 : index
    %78 = vector.load %arg14[%c256_81, %c0_82] : memref<512x256xf32, #tpu.memory_space<vmem>>, vector<256x256xf32>
    %cst_83 = arith.constant dense<0.000000e+00> : vector<2x256xf32>
    %79 = tpu.matmul %77, %78, %cst_83 {dimension_numbers = #tpu.dot_dimension_numbers<[1], [0], [0], [1], [0, 0, 1, 1], [], []>, precision = #tpu.contract_precision<fp32>} : vector<2x256xf32>, vector<256x256xf32>, vector<2x256xf32> -> vector<2x256xf32>
    %80 = arith.addf %72, %79 : vector<2x256xf32>
    %c0_84 = arith.constant 0 : index
    %c0_85 = arith.constant 0 : index
    %81 = vector.load %arg9[%c0_84, %c0_85] : memref<1x256xf32, #tpu.memory_space<vmem>>, vector<1x256xf32>
    %82 = vector.broadcast %81 : vector<1x256xf32> to vector<2x256xf32>
    %83 = arith.addf %80, %82 : vector<2x256xf32>
    %cst_86 = arith.constant 5.000000e-01 : f32
    %84 = vector.broadcast %cst_86 : f32 to vector<2x256xf32>
    %85 = arith.mulf %84, %83 : vector<2x256xf32>
    %cst_87 = arith.constant 4.471500e-02 : f32
    %86 = vector.broadcast %cst_87 : f32 to vector<2x256xf32>
    %87 = arith.mulf %86, %83 : vector<2x256xf32>
    %88 = arith.mulf %87, %83 : vector<2x256xf32>
    %89 = arith.mulf %88, %83 : vector<2x256xf32>
    %90 = arith.addf %83, %89 : vector<2x256xf32>
    %cst_88 = arith.constant 0.797884583 : f32
    %91 = vector.broadcast %cst_88 : f32 to vector<2x256xf32>
    %92 = arith.mulf %91, %90 : vector<2x256xf32>
    %93 = math.tanh %92 : vector<2x256xf32>
    %cst_89 = arith.constant 1.000000e+00 : f32
    %94 = vector.broadcast %cst_89 : f32 to vector<2x256xf32>
    %95 = arith.addf %94, %93 : vector<2x256xf32>
    %96 = arith.mulf %85, %95 : vector<2x256xf32>
    %c0_90 = arith.constant 0 : index
    %c0_91 = arith.constant 0 : index
    %97 = vector.load %arg10[%c0_90, %c0_91] : memref<256x2xf32, #tpu.memory_space<vmem>>, vector<256x2xf32>
    %cst_92 = arith.constant dense<0.000000e+00> : vector<2x2xf32>
    %98 = tpu.matmul %96, %97, %cst_92 {dimension_numbers = #tpu.dot_dimension_numbers<[1], [0], [0], [1], [0, 0, 1, 1], [], []>, precision = #tpu.contract_precision<fp32>} : vector<2x256xf32>, vector<256x2xf32>, vector<2x2xf32> -> vector<2x2xf32>
    %c0_93 = arith.constant 0 : index
    %c0_94 = arith.constant 0 : index
    %99 = vector.load %arg11[%c0_93, %c0_94] : memref<1x2xf32, #tpu.memory_space<vmem>>, vector<1x2xf32>
    %100 = vector.broadcast %99 : vector<1x2xf32> to vector<2x2xf32>
    %101 = arith.addf %98, %100 : vector<2x2xf32>
    %cst_95 = arith.constant dense<0xFF800000> : vector<2xf32>
    %102 = vector.multi_reduction <maximumf>, %101, %cst_95 [1] : vector<2x2xf32> to vector<2xf32>
    %103 = vector.shape_cast %102 : vector<2xf32> to vector<2x1xf32>
    %104 = vector.broadcast %103 : vector<2x1xf32> to vector<2x2xf32>
    %105 = arith.subf %101, %104 : vector<2x2xf32>
    %106 = math.exp %105 : vector<2x2xf32>
    %cst_96 = arith.constant dense<0.000000e+00> : vector<2xf32>
    %107 = vector.multi_reduction <add>, %106, %cst_96 [1] : vector<2x2xf32> to vector<2xf32>
    %108 = vector.shape_cast %107 : vector<2xf32> to vector<2x1xf32>
    %109 = math.log %108 : vector<2x1xf32>
    %110 = arith.addf %103, %109 : vector<2x1xf32>
    %111 = vector.broadcast %110 : vector<2x1xf32> to vector<2x2xf32>
    %112 = arith.subf %101, %111 : vector<2x2xf32>
    %c0_97 = arith.constant 0 : index
    %c0_98 = arith.constant 0 : index
    %113 = vector.load %arg12[%c0_97, %c0_98] : memref<2x2xf32, #tpu.memory_space<vmem>>, vector<2x2xf32>
    tpu.vector_store %arg12[%c0_97, %c0_98], %112 {strides = array<i32>} : memref<2x2xf32, #tpu.memory_space<vmem>>, vector<2x2xf32>,
    return
  }
}

</mosaic_0001>

<bundles_post_ra>
// kernel: tahgnn_forward.1
= control target key start
LH: loop header
LB: loop body
LE: loop exit
PB: predicated region body
PF: predicated region fallthrough
CT: control target
= control target key end

     0   :  { %19 = vsyncpa [#allocation7], 0  ;;  %vm83_vm0 = vcmask 261120   ;;  %s9431_s0 = inlined_call_operand.vmem [shape: f32[32,32], index: 0, kind: input, shape index: {}]   ;;  %s9432_s1 = inlined_call_operand.vmem [shape: f32[32,32], index: 1, kind: input, shape index: {}]   ;;  %s9433_s2 = inlined_call_operand.vmem [shape: f32[16,32], index: 2, kind: input, shape index: {}]   ;;  %s9434_s3 = inlined_call_operand.vmem [shape: f32[32,16], index: 3, kind: input, shape index: {}]   ;;  %s9435_s4 = inlined_call_operand.vmem [shape: f32[32,32], index: 4, kind: input, shape index: {}]   ;;  %s9436_s5 = inlined_call_operand.vmem [shape: f32[1,32], index: 5, kind: input, shape index: {}]   ;;  %s9437_s6 = inlined_call_operand.vmem [shape: f32[32,32], index: 6, kind: input, shape index: {}]   ;;  %s9438_s7 = inlined_call_operand.vmem [shape: f32[1,32], index: 7, kind: input, shape index: {}]   ;;  %s9439_s8 = inlined_call_operand.hbm [shape: f32[512,256], index: 8, kind: input, shape index: {}]   ;;  %s9440_s9 = inlined_call_operand.vmem [shape: f32[1,256], index: 9, kind: input, shape index: {}]   ;;  %s9441_s10 = inlined_call_operand.vmem [shape: f32[256,2], index: 10, kind: input, shape index: {}]   ;;  %s9442_s11 = inlined_call_operand.vmem [shape: f32[1,2], index: 11, kind: input, shape index: {}]   ;;  %s9443_s12 = inlined_call_operand.hbm [shape: f32[2,2], index: 12, kind: output, shape index: {0}]   ;;  %s9444_s13 = inlined_call_operand.hbm [shape: f32[16,32], index: 13, kind: output, shape index: {1}]  }
   0x1   :  { %v72_v0 = vld [vmem:[%s9435_s4] sm:$0xff]  ;;  %v73_v1 = vld [vmem:[%s9435_s4 + $0x8] sm:$0xff]  ;;  %v74_v2 = vld [vmem:[%s9435_s4 + $0x10] sm:$0xff] }
   0x2   :  { %v4828_v3 = vpack.c.bf16 %v73_v1, %v72_v0  ;;  %v75_v4 = vld [vmem:[%s9435_s4 + $0x18] sm:$0xff]  ;;  %v68_v5 = vld [vmem:[%s9431_s0] sm:$0xff] }
   0x3   :  { %v4832_v6 = vpack.c.bf16 %v75_v4, %v74_v2  ;;  %4773 = vmatprep.mubr.msk.f32.mxu1 %vm83_vm0, %v68_v5 }
   0x4   :  { %20 = vsyncpa [#allocation9], 0  ;;  %4829 = vmatprep.subr.bf16.mxu1 %v4828_v3  ;;  %v69_v7 = vld [vmem:[%s9431_s0 + $0x8] sm:$0xff]  ;;  %v70_v8 = vld [vmem:[%s9431_s0 + $0x10] sm:$0xff]  ;;  %vm485_vm1 = vcmask 130048   ;;  %vm598_vm2 = vcmask 254976  }
   0x5   :  { %4831 = vmatpush3.bf16.msra.mxu1 %v4828_v3  ;;  %v71_v9 = vld [vmem:[%s9431_s0 + $0x18] sm:$0xff]  ;;  %v181_v10 = vld [vmem:[%s9432_s1] sm:$0xff]  ;;  %v291_v21 = vld [vmem:[%s9437_s6 + $0x8] sm:$0xff]  ;;  %s6153_s15 = scalar_lea.hbm %s9439_s8, 8192  ;;  %s5966_s16 = smov [#allocation2]  }
   0x6   :  { %4833 = vmatprep.subr.bf16.mxu1 %v4832_v6  ;;  %v4496_v11 = vld [vmem:[%s9436_s5] ss:$0 sm:$0xff]  ;;  %v182_v25 = vld [vmem:[%s9432_s1 + $0x8] sm:$0xff]  ;;  %v183_v26 = vld [vmem:[%s9432_s1 + $0x10] sm:$0xff]  ;;  %s5965_s5 = smov 32   ;;  %s50_s17 = sshll.u32 %s5966_s16, 4  ;;  %s6157_s17 = int_to_ptr.vmem [resolvable:$true] %s50_s17 }
   0x7   :  { %v290_v20 = vld [vmem:[%s9437_s6] sm:$0xff]  ;;  %v184_v27 = vld [vmem:[%s9432_s1 + $0x18] sm:$0xff]  ;;  %v292_v28 = vld [vmem:[%s9437_s6 + $0x10] sm:$0xff]  ;;  %s5967_s18 = smov 96   ;;  %s5968_s19 = smov [#allocation2 + $0x200]  }
   0x8   :  { %v4844_v24 = vpack.c.bf16 %v291_v21, %v290_v20  ;;  %v293_v29 = vld [vmem:[%s9437_s6 + $0x18] sm:$0xff]  ;;  %v398_v43 = vld [vmem:[%s9433_s2] sm:$0xff]  ;;  %v399_v55 = vld [vmem:[%s9433_s2 + $0x8] sm:$0xff]  ;;  %s64_s20 = sshll.u32 %s5968_s19, 4  ;;  %p5865_p0 = scmp.ne.s32.totalorder %s9439_s8, %s6153_s15  ;;  %s65_s20 = int_to_ptr.vmem [resolvable:$true] %s64_s20 }
   0x9   :  { %4835 = vmatpush3.bf16.msra.mxu1 %v4832_v6  ;;  %v4848_v30 = vpack.c.bf16 %v293_v29, %v292_v28  ;;  %v4505_v44 = vld [vmem:[%s9438_s7] ss:$0 sm:$0xff]  ;;  %v482_v60 = vld [vmem:[%s9434_s3 + $0x8] sm:$0xff]  ;;  %v483_v61 = vld [vmem:[%s9434_s3 + $0x10] sm:$0xff]  ;;  %s5866_s22 = scalar_lea.hbm %s9439_s8, 16384  ;;  %p5868_p2 = scmp.lt.u32.totalorder %s6153_s15, %s9439_s8 }
   0xa   :  { %v481_v56 = vld [vmem:[%s9434_s3] sm:$0xff]  ;;  %v484_v62 = vld [vmem:[%s9434_s3 + $0x18] sm:$0xff]  ;;  %s5964_s3 = smov 64   ;;  %p5867_p1 = scmp.lt.u32.totalorder %s5866_s22, %s6153_s15 }
   0xc   :  { %4774 = vmatmul.mubr.msk.f32.vlgmr.msra.gmra.mrb[0].mxu1 %vm83_vm0, %v69_v7  ;;  %p5869_p3 = por %p5868_p2, %p5867_p1 }
   0xd   :  { %4776 = vmatprep.mubr.msk.f32.mxu1 %vm83_vm0, %v70_v8 }
   0xe   :  { %p5870_p4 = pnand %p5869_p3, %p5865_p0 }
  0x10   :  { %4777 = vmatmul.mubr.msk.f32.gmra.mrb[2].mxu1 %vm83_vm0, %v71_v9 }
  0x11   :  { %4787 = vmatprep.mubr.msk.f32.mxu1 %vm83_vm0, %v181_v10  ;;  %v606_v10 = vlaneseq }
  0xdf   :  { %v4775_v12 = vpop.f32.mrb[0].mxu1 }
  0xe0   :  { %v168_v13 = vadd.f32 %v4775_v12, %v4496_v11  ;;  %v162_v14 = vpop.f32.mrb[1].mxu1 }
  0xe1   :  { %v163_v15 = vadd.f32 %v4496_v11, %v162_v14 }
  0xe3   :  { %v4836_v16 = vpack.c.bf16 %v168_v13, %v163_v15  ;;  %v4778_v17 = vpop.f32.mrb[2].mxu1  ;;  %v6134_v15 = vshrl.u32 %v606_v10, 7 }
  0xe4   :  { %v178_v18 = vadd.f32 %v4778_v17, %v4496_v11  ;;  %v172_v19 = vpop.f32.mrb[3].mxu1 }
  0xe5   :  { %v173_v22 = vadd.f32 %v4496_v11, %v172_v19  ;;  %4837 = vmatprep.subr.bf16.mxu1 %v4836_v16  ;;  %10069 = vst [vmem:[#allocation20_spill] sm:$0xff] %v6134_v15 }
  0xe6   :  { %4839 = vmatpush3.bf16.msra.mxu1 %v4836_v16 }
  0xe7   :  { %v4840_v23 = vpack.c.bf16 %v178_v18, %v173_v22 }
  0xe9   :  { %4841 = vmatprep.subr.bf16.mxu1 %v4840_v23 }
  0xea   :  { %4843 = vmatpush3.bf16.msra.mxu1 %v4840_v23 }
  0xeb   :  { %4845 = vmatprep.subr.bf16.mxu1 %v4844_v24 }
  0xed   :  { %4788 = vmatmul.mubr.msk.f32.vlgmr.msra.gmra.mrb[4].mxu1 %vm83_vm0, %v182_v25 }
  0xee   :  { %4790 = vmatprep.mubr.msk.f32.mxu1 %vm83_vm0, %v183_v26  ;;  %4847 = vmatpush3.bf16.msra.mxu1 %v4844_v24 }
  0xef   :  { %4849 = vmatprep.subr.bf16.mxu1 %v4848_v30 }
  0xf1   :  { %4791 = vmatmul.mubr.msk.f32.gmra.mrb[6].mxu1 %vm83_vm0, %v184_v27 }
  0xf2   :  { %4851 = vmatpush3.bf16.msra.mxu1 %v4848_v30 }
 0x1c0   :  { %v4789_v31 = vpop.f32.mrb[4].mxu1 }
 0x1c1   :  { %v283_v32 = vmax.f32 %v4789_v31, 0.0  ;;  %v263_v33 = vpop.f32.mrb[5].mxu1 }
 0x1c2   :  { %v282_v34 = vmax.f32 %v263_v33, 0.0 }
 0x1c3   :  { %v287_v37 = vadd.f32 %v283_v32, %v69_v7 }
 0x1c4   :  { %v286_v35 = vadd.f32 %v282_v34, %v68_v5  ;;  %v4792_v36 = vpop.f32.mrb[6].mxu1 }
 0x1c5   :  { %v285_v38 = vmax.f32 %v4792_v36, 0.0  ;;  %v273_v39 = vpop.f32.mrb[7].mxu1 }
 0x1c6   :  { %v284_v40 = vmax.f32 %v273_v39, 0.0  ;;  %4801 = vmatprep.mubr.msk.f32.mxu1 %vm83_vm0, %v286_v35 }
 0x1c7   :  { %4802 = vmatmul.mubr.msk.f32.vlgmr.msra.gmra.mrb[8].mxu1 %vm83_vm0, %v287_v37  ;;  %v289_v42 = vadd.f32 %v285_v38, %v71_v9 }
 0x1c8   :  { %v288_v41 = vadd.f32 %v284_v40, %v70_v8  ;;  %v5963_v8 = vmov 1983009808  }
 0x1c9   :  { %v604_v9 = vunpack.c.l.s4 %v5963_v8 }
 0x1ca   :  { %4804 = vmatprep.mubr.msk.f32.mxu1 %vm83_vm0, %v288_v41 }
 0x1cb   :  { %4805 = vmatmul.mubr.msk.f32.gmra.mrb[10].mxu1 %vm83_vm0, %v289_v42  ;;  %v605_v14 = vunpack.c.0.s8 %v604_v9 }
 0x1cc   :  { %4815 = vmatprep.mubr.msk.f32.mxu1 %vm83_vm0, %v398_v43 }
 0x1cd   :  { %v6138_v16 = vsub.s32 %v605_v14, %v6134_v15 }
 0x1cf   :  { %10070 = vst [vmem:[#allocation21_spill] sm:$0xff] %v6138_v16 }
 0x29a   :  { %v4803_v45 = vpop.f32.mrb[8].mxu1 }
 0x29b   :  { %v385_v46 = vadd.f32 %v4803_v45, %v4505_v44  ;;  %v379_v47 = vpop.f32.mrb[9].mxu1 }
 0x29c   :  { %v380_v48 = vadd.f32 %v4505_v44, %v379_v47 }
 0x29e   :  { %v4852_v49 = vpack.c.bf16 %v385_v46, %v380_v48  ;;  %v4806_v50 = vpop.f32.mrb[10].mxu1 }
 0x29f   :  { %v395_v51 = vadd.f32 %v4806_v50, %v4505_v44  ;;  %v389_v52 = vpop.f32.mrb[11].mxu1 }
 0x2a0   :  { %v390_v53 = vadd.f32 %v4505_v44, %v389_v52  ;;  %4853 = vmatprep.subr.bf16.mxu1 %v4852_v49 }
 0x2a1   :  { %4855 = vmatpush3.bf16.msra.mxu1 %v4852_v49 }
 0x2a2   :  { %v4856_v54 = vpack.c.bf16 %v395_v51, %v390_v53 }
 0x2a4   :  { %4857 = vmatprep.subr.bf16.mxu1 %v4856_v54 }
 0x2a5   :  { %4859 = vmatpush3.bf16.msra.mxu1 %v4856_v54 }
 0x2a8   :  { %4816 = vmatmul.mubr.msk.f32.vlgmr.msra.gmra.mrb[12].mxu1 %vm83_vm0, %v399_v55 }
 0x2a9   :  { %4822 = vmatprep.mubr.msk.f32.mxu1 %vm485_vm1, %v481_v56 }
 0x37b   :  { %v4817_v57 = vpop.f32.mrb[12].mxu1 }
 0x37c   :  { %592 = vst.msk [vmem:[#allocation8 + $0x8] sm:$0xff] %vm83_vm0, %v4817_v57  ;;  %v472_v58 = vpop.f32.mrb[13].mxu1 }
 0x37d   :  { %v4860_v59 = vpack.c.bf16 %v4817_v57, %v472_v58  ;;  %591 = vst.msk [vmem:[#allocation8] sm:$0xff] %vm83_vm0, %v472_v58 }
 0x37f   :  { %4861 = vmatprep.subr.bf16.mxu1 %v4860_v59 }
 0x380   :  { %4863 = vmatpush3.bf16.msra.mxu1 %v4860_v59 }
 0x383   :  { %4823 = vmatmul.mubr.msk.f32.vlgmr.msra.gmra.mrb[14].mxu1 %vm485_vm1, %v482_v60 }
 0x384   :  { %4825 = vmatprep.mubr.msk.f32.mxu1 %vm485_vm1, %v483_v61 }
 0x387   :  { %4826 = vmatmul.mubr.msk.f32.gmra.mrb[16].mxu1 %vm485_vm1, %v484_v62 }
 0x456   :  { %v4824_v63 = vpop.f32.mrb[14].mxu1 }
 0x457   :  { %v584_v0 = vmax.f32 %v4824_v63, 0.0  ;;  %v564_v1 = vpop.f32.mrb[15].mxu1 }
 0x458   :  { %v583_v2 = vmax.f32 %v564_v1, 0.0 }
 0x459   :  { %v588_v3 = vadd.f32 %v584_v0, %v287_v37 }
 0x45a   :  { %v587_v4 = vadd.f32 %v583_v2, %v286_v35  ;;  %v4827_v5 = vpop.f32.mrb[16].mxu1 }
 0x45b   :  { %594 = vst.msk [vmem:[#allocation3 + $0x8] sm:$0xff] %vm83_vm0, %v588_v3  ;;  %v586_v6 = vmax.f32 %v4827_v5, 0.0  ;;  %v574_v7 = vpop.f32.mrb[17].mxu1 }
 0x45c   :  { %593 = vst.msk [vmem:[#allocation3] sm:$0xff] %vm83_vm0, %v587_v4  ;;  %v585_v11 = vmax.f32 %v574_v7, 0.0 }
 0x45d   :  { %v590_v12 = vadd.f32 %v586_v6, %v289_v42 }
 0x45e   :  { %v589_v13 = vadd.f32 %v585_v11, %v288_v41 }
 0x45f   :  { %596 = vst.msk [vmem:[#allocation3 + $0x18] sm:$0xff] %vm83_vm0, %v590_v12 }
 0x460   :  { %595 = vst.msk [vmem:[#allocation3 + $0x10] sm:$0xff] %vm83_vm0, %v589_v13 }
 0x466   :  { %v708_v17 = vld [vmem:[#allocation3 + $0xa] ss:$16 sm:$0x3]  ;;  %v694_v18 = vld [vmem:[#allocation3 + $0x9] ss:$16 sm:$0x3] }
 0x467   :  { %v716_v19 = vrot.slane %v708_v17, %v6138_v16  ;;  %v702_v20 = vrot.slane %v694_v18, %v6138_v16  ;;  %v739_v21 = vld [vmem:[#allocation3 + $0xd] ss:$16 sm:$0x3]  ;;  %v601_v22 = vld [vmem:[#allocation3 + $0x1] ss:$16 sm:$0x3] }
 0x468   :  { %v747_v23 = vrot.slane %v739_v21, %v6138_v16  ;;  %v609_v24 = vrot.slane %v601_v22, %v6138_v16  ;;  %v753_v25 = vld [vmem:[#allocation3 + $0xe] ss:$16 sm:$0x3]  ;;  %v649_v26 = vld [vmem:[#allocation3 + $0x5] ss:$16 sm:$0x3] }
 0x469   :  { %717 = vrot.lane.b32.xlu0 %v716_v19, %s5964_s3  ;;  %703 = vrot.lane.b32.xlu1 %v702_v20, %s5965_s5  ;;  %v691_v27 = vld [vmem:[#allocation3 + $0x8] ss:$16 sm:$0x3]  ;;  %v736_v28 = vld [vmem:[#allocation3 + $0xc] ss:$16 sm:$0x3]  ;;  %v761_v31 = vrot.slane %v753_v25, %v6138_v16  ;;  %v657_v32 = vrot.slane %v649_v26, %v6138_v16 }
 0x46a   :  { %692 = vst.msk [vmem:[#allocation4 + $0x4] sm:$0x3] %vm598_vm2, %v691_v27  ;;  %737 = vst.msk [vmem:[#allocation4 + $0x6] sm:$0x3] %vm598_vm2, %v736_v28 }
 0x46b   :  { %v597_v29 = vld [vmem:[#allocation3] ss:$16 sm:$0x3]  ;;  %v646_v30 = vld [vmem:[#allocation3 + $0x4] ss:$16 sm:$0x3] }
 0x46c   :  { %599 = vst.msk [vmem:[#allocation4] sm:$0x3] %vm598_vm2, %v597_v29  ;;  %647 = vst.msk [vmem:[#allocation4 + $0x2] sm:$0x3] %vm598_vm2, %v646_v30 }
 0x46d   :  { %748 = vrot.lane.b32.xlu1 %v747_v23, %s5965_s5  ;;  %610 = vrot.lane.b32.xlu0 %v609_v24, %s5965_s5  ;;  %v663_v33 = vld [vmem:[#allocation3 + $0x6] ss:$16 sm:$0x3]  ;;  %v616_v34 = vld [vmem:[#allocation3 + $0x2] ss:$16 sm:$0x3] }
 0x46e   :  { %v671_v35 = vrot.slane %v663_v33, %v6138_v16  ;;  %v624_v36 = vrot.slane %v616_v34, %v6138_v16  ;;  %v677_v37 = vld [vmem:[#allocation3 + $0x7] ss:$16 sm:$0x3]  ;;  %v631_v38 = vld [vmem:[#allocation3 + $0x3] ss:$16 sm:$0x3] }
 0x46f   :  { %v685_v39 = vrot.slane %v677_v37, %v6138_v16  ;;  %v639_v40 = vrot.slane %v631_v38, %v6138_v16  ;;  %v767_v41 = vld [vmem:[#allocation3 + $0xf] ss:$16 sm:$0x3]  ;;  %v722_v42 = vld [vmem:[#allocation3 + $0xb] ss:$16 sm:$0x3] }
 0x471   :  { %762 = vrot.lane.b32.xlu1 %v761_v31, %s5964_s3  ;;  %658 = vrot.lane.b32.xlu0 %v657_v32, %s5965_s5 }
 0x475   :  { %672 = vrot.lane.b32.xlu1 %v671_v35, %s5964_s3  ;;  %625 = vrot.lane.b32.xlu0 %v624_v36, %s5964_s3 }
 0x479   :  { %686 = vrot.lane.b32.xlu1 %v685_v39, %s5967_s18  ;;  %640 = vrot.lane.b32.xlu0 %v639_v40, %s5967_s18 }
 0x47a   :  { %5873 = shalt.err (!%p5870_p4)  }
 0x47b   :  { %s5874_s26 = scalar_lea.vmem %s6157_s17, 8192  ;;  %s5878_s0 = scalar_lea.vmem %s6157_s17, 16384 }
 0x47c   :  { %p5875_p5 = scmp.ne.s32.totalorder %s6157_s17, %s5874_s26  ;;  %p5879_p6 = scmp.lt.s32.totalorder %s6157_s17, %s6157_s17 }
 0x47d   :  { %p5880_p7 = scmp.lt.s32.totalorder %s5878_s0, %s5874_s26 }
 0x47f   :  { %p5881_p8 = por %p5880_p7, %p5879_p6 }
 0x481   :  { %p5882_p9 = pnand %p5881_p8, %p5875_p5 }
 0x483   :  { %5885 = shalt.err (!%p5882_p9)  }
 0x484   :  { %53 = dma.hbm_to_vmem [thread:$0]  %s9439_s8, 8192, %s6157_s17, [#allocation5]  ;;  %v775_v43 = vrot.slane %v767_v41, %v6138_v16  ;;  %v730_v44 = vrot.slane %v722_v42, %v6138_v16 }
 0x485   :  { %p5887_p10 = scmp.ne.s32.totalorder %s6153_s15, %s5866_s22  ;;  %p5890_p11 = scmp.lt.u32.totalorder %s5866_s22, %s5866_s22 }
 0x487   :  { %p5891_p12 = por %p5890_p11, %p5868_p2 }
 0x489   :  { %p5893_p13 = por %p5891_p12, %p5867_p1 }
 0x48b   :  { %p5894_p0 = pnand %p5893_p13, %p5887_p10 }
 0x48d   :  { %5897 = shalt.err (!%p5894_p0)  }
 0x48e   :  { %s5898_s3 = scalar_lea.vmem %s65_s20, 8192  ;;  %p5903_p4 = scmp.lt.s32.totalorder %s65_s20, %s6157_s17 }
 0x48f   :  { %p5899_p3 = scmp.ne.s32.totalorder %s65_s20, %s5898_s3  ;;  %p5904_p5 = scmp.lt.s32.totalorder %s5878_s0, %s5898_s3 }
 0x491   :  { %p5905_p6 = por %p5904_p5, %p5903_p4 }
 0x493   :  { %p5906_p7 = pnand %p5905_p6, %p5899_p3 }
 0x495   :  { %5909 = shalt.err (!%p5906_p7)  }
 0x496   :  { %67 = dma.hbm_to_vmem [thread:$0]  %s6153_s15, 8192, %s65_s20, [#allocation5 + $0x1]  ;;  %776 = vrot.lane.b32.xlu1 %v775_v43, %s5967_s18  ;;  %731 = vrot.lane.b32.xlu0 %v730_v44, %s5967_s18  ;;  %vm613_vm3 = vcmask 517376   ;;  %vm628_vm4 = vcmask 779776   ;;  %vm643_vm5 = vcmask 1042176  }
 0x4db   :  { %v718_v45 = vpop.permute.xlu0 %717  ;;  %v704_v46 = vpop.permute.xlu1 %703 }
 0x4dc   :  { %706 = vst.msk [vmem:[#allocation4 + $0x4] sm:$0x3] %vm613_vm3, %v704_v46 }
 0x4dd   :  { %720 = vst.msk [vmem:[#allocation4 + $0x4] sm:$0x3] %vm628_vm4, %v718_v45 }
 0x4df   :  { %v749_v47 = vpop.permute.xlu1 %748  ;;  %v611_v48 = vpop.permute.xlu0 %610 }
 0x4e0   :  { %751 = vst.msk [vmem:[#allocation4 + $0x6] sm:$0x3] %vm613_vm3, %v749_v47  ;;  %614 = vst.msk [vmem:[#allocation4] sm:$0x3] %vm613_vm3, %v611_v48 }
 0x4e3   :  { %v763_v49 = vpop.permute.xlu1 %762  ;;  %v659_v50 = vpop.permute.xlu0 %658 }
 0x4e4   :  { %765 = vst.msk [vmem:[#allocation4 + $0x6] sm:$0x3] %vm628_vm4, %v763_v49 }
 0x4e5   :  { %661 = vst.msk [vmem:[#allocation4 + $0x2] sm:$0x3] %vm613_vm3, %v659_v50 }
 0x4e7   :  { %v673_v51 = vpop.permute.xlu1 %672  ;;  %v626_v52 = vpop.permute.xlu0 %625 }
 0x4e8   :  { %675 = vst.msk [vmem:[#allocation4 + $0x2] sm:$0x3] %vm628_vm4, %v673_v51  ;;  %629 = vst.msk [vmem:[#allocation4] sm:$0x3] %vm628_vm4, %v626_v52 }
 0x4eb   :  { %v687_v53 = vpop.permute.xlu1 %686  ;;  %v641_v54 = vpop.permute.xlu0 %640 }
 0x4ec   :  { %689 = vst.msk [vmem:[#allocation4 + $0x2] sm:$0x3] %vm643_vm5, %v687_v53  ;;  %644 = vst.msk [vmem:[#allocation4] sm:$0x3] %vm643_vm5, %v641_v54 }
 0x508   :  { %v777_v55 = vpop.permute.xlu1 %776  ;;  %v732_v56 = vpop.permute.xlu0 %731 }
 0x509   :  { %779 = vst.msk [vmem:[#allocation4 + $0x6] sm:$0x3] %vm643_vm5, %v777_v55  ;;  %734 = vst.msk [vmem:[#allocation4 + $0x4] sm:$0x3] %vm643_vm5, %v732_v56 }
 0x510   :  { %v6205_v57 = vld [vmem:[#allocation4] sm:$0xff] }
 0x511   :  { %10071 = vst [vmem:[#allocation22_spill] sm:$0xff] %v6205_v57 }
 0x512   :  { %5955 = dma.done.wait [#allocation5], 8192 }
 0x513   :  { %5956 = vsyncadd [#allocation5], 4294959104  ;;  %v6207_v58 = vld [vmem:[#allocation2] sm:$0xff]  ;;  %v6209_v59 = vld [vmem:[#allocation2 + $0x8] sm:$0xff] }
 0x514   :  { %10072 = vst [vmem:[#allocation23_spill] sm:$0xff] %v6207_v58  ;;  %10073 = vst [vmem:[#allocation24_spill] sm:$0xff] %v6209_v59  ;;  %v6211_v60 = vld [vmem:[#allocation2 + $0x10] sm:$0xff]  ;;  %v6213_v61 = vld [vmem:[#allocation2 + $0x18] sm:$0xff] }
 0x515   :  { %10074 = vst [vmem:[#allocation25_spill] sm:$0xff] %v6211_v60  ;;  %10075 = vst [vmem:[#allocation26_spill] sm:$0xff] %v6213_v61  ;;  %v6215_v62 = vld [vmem:[#allocation2 + $0x20] sm:$0xff]  ;;  %v6217_v63 = vld [vmem:[#allocation2 + $0x28] sm:$0xff] }
 0x516   :  { %10076 = vst [vmem:[#allocation27_spill] sm:$0xff] %v6215_v62  ;;  %10077 = vst [vmem:[#allocation28_spill] sm:$0xff] %v6217_v63  ;;  %v6219_v0 = vld [vmem:[#allocation2 + $0x30] sm:$0xff]  ;;  %v6221_v1 = vld [vmem:[#allocation2 + $0x38] sm:$0xff] }
 0x517   :  { %10078 = vst [vmem:[#allocation29_spill] sm:$0xff] %v6219_v0  ;;  %10079 = vst [vmem:[#allocation30_spill] sm:$0xff] %v6221_v1  ;;  %v6223_v2 = vld [vmem:[#allocation2 + $0x40] sm:$0xff]  ;;  %v6225_v3 = vld [vmem:[#allocation2 + $0x48] sm:$0xff] }
 0x518   :  { %10080 = vst [vmem:[#allocation31_spill] sm:$0xff] %v6223_v2  ;;  %10081 = vst [vmem:[#allocation32_spill] sm:$0xff] %v6225_v3  ;;  %v6227_v4 = vld [vmem:[#allocation2 + $0x50] sm:$0xff]  ;;  %v6229_v5 = vld [vmem:[#allocation2 + $0x58] sm:$0xff] }
 0x519   :  { %10082 = vst [vmem:[#allocation33_spill] sm:$0xff] %v6227_v4  ;;  %10083 = vst [vmem:[#allocation34_spill] sm:$0xff] %v6229_v5  ;;  %v6231_v6 = vld [vmem:[#allocation2 + $0x60] sm:$0xff]  ;;  %v6233_v7 = vld [vmem:[#allocation2 + $0x68] sm:$0xff] }
 0x51a   :  { %10084 = vst [vmem:[#allocation35_spill] sm:$0xff] %v6231_v6  ;;  %10085 = vst [vmem:[#allocation36_spill] sm:$0xff] %v6233_v7  ;;  %v6235_v8 = vld [vmem:[#allocation2 + $0x70] sm:$0xff]  ;;  %v6237_v9 = vld [vmem:[#allocation2 + $0x78] sm:$0xff] }
 0x51b   :  { %10086 = vst [vmem:[#allocation37_spill] sm:$0xff] %v6235_v8  ;;  %10087 = vst [vmem:[#allocation38_spill] sm:$0xff] %v6237_v9  ;;  %v6239_v10 = vld [vmem:[#allocation2 + $0x80] sm:$0xff]  ;;  %v6241_v11 = vld [vmem:[#allocation2 + $0x88] sm:$0xff] }
 0x51c   :  { %10088 = vst [vmem:[#allocation39_spill] sm:$0xff] %v6239_v10  ;;  %10089 = vst [vmem:[#allocation40_spill] sm:$0xff] %v6241_v11  ;;  %v6243_v12 = vld [vmem:[#allocation2 + $0x90] sm:$0xff]  ;;  %v6245_v13 = vld [vmem:[#allocation2 + $0x98] sm:$0xff] }
 0x51d   :  { %10090 = vst [vmem:[#allocation41_spill] sm:$0xff] %v6243_v12  ;;  %10091 = vst [vmem:[#allocation42_spill] sm:$0xff] %v6245_v13  ;;  %v6247_v14 = vld [vmem:[#allocation2 + $0xa0] sm:$0xff]  ;;  %v6249_v17 = vld [vmem:[#allocation2 + $0xa8] sm:$0xff] }
 0x51e   :  { %10092 = vst [vmem:[#allocation43_spill] sm:$0xff] %v6247_v14  ;;  %10093 = vst [vmem:[#allocation44_spill] sm:$0xff] %v6249_v17  ;;  %v6251_v18 = vld [vmem:[#allocation2 + $0xb0] sm:$0xff]  ;;  %v6253_v19 = vld [vmem:[#allocation2 + $0xb8] sm:$0xff] }
 0x51f   :  { %10094 = vst [vmem:[#allocation45_spill] sm:$0xff] %v6251_v18  ;;  %10095 = vst [vmem:[#allocation46_spill] sm:$0xff] %v6253_v19  ;;  %v6255_v20 = vld [vmem:[#allocation2 + $0xc0] sm:$0xff]  ;;  %v6257_v21 = vld [vmem:[#allocation2 + $0xc8] sm:$0xff] }
 0x520   :  { %10096 = vst [vmem:[#allocation47_spill] sm:$0xff] %v6255_v20  ;;  %10097 = vst [vmem:[#allocation48_spill] sm:$0xff] %v6257_v21  ;;  %v6259_v22 = vld [vmem:[#allocation2 + $0xd0] sm:$0xff]  ;;  %v6261_v23 = vld [vmem:[#allocation2 + $0xd8] sm:$0xff] }
 0x521   :  { %10098 = vst [vmem:[#allocation49_spill] sm:$0xff] %v6259_v22  ;;  %10099 = vst [vmem:[#allocation50_spill] sm:$0xff] %v6261_v23  ;;  %v6263_v24 = vld [vmem:[#allocation2 + $0xe0] sm:$0xff]  ;;  %v6265_v25 = vld [vmem:[#allocation2 + $0xe8] sm:$0xff] }
 0x522   :  { %10100 = vst [vmem:[#allocation51_spill] sm:$0xff] %v6263_v24  ;;  %10101 = vst [vmem:[#allocation52_spill] sm:$0xff] %v6265_v25  ;;  %v6267_v26 = vld [vmem:[#allocation2 + $0xf0] sm:$0xff]  ;;  %v6269_v27 = vld [vmem:[#allocation2 + $0xf8] sm:$0xff] }
 0x523   :  { %10102 = vst [vmem:[#allocation53_spill] sm:$0xff] %v6267_v26  ;;  %10103 = vst [vmem:[#allocation54_spill] sm:$0xff] %v6269_v27  ;;  %v6271_v28 = vld [vmem:[#allocation2 + $0x100] sm:$0xff]  ;;  %v6273_v29 = vld [vmem:[#allocation2 + $0x108] sm:$0xff] }
 0x524   :  { %10104 = vst [vmem:[#allocation55_spill] sm:$0xff] %v6271_v28  ;;  %10105 = vst [vmem:[#allocation56_spill] sm:$0xff] %v6273_v29  ;;  %v6275_v30 = vld [vmem:[#allocation2 + $0x110] sm:$0xff]  ;;  %v6277_v31 = vld [vmem:[#allocation2 + $0x118] sm:$0xff] }
 0x525   :  { %10106 = vst [vmem:[#allocation57_spill] sm:$0xff] %v6275_v30  ;;  %10107 = vst [vmem:[#allocation58_spill] sm:$0xff] %v6277_v31  ;;  %v6279_v32 = vld [vmem:[#allocation2 + $0x120] sm:$0xff]  ;;  %v6281_v33 = vld [vmem:[#allocation2 + $0x128] sm:$0xff] }
 0x526   :  { %10108 = vst [vmem:[#allocation59_spill] sm:$0xff] %v6279_v32  ;;  %10109 = vst [vmem:[#allocation60_spill] sm:$0xff] %v6281_v33  ;;  %v6283_v34 = vld [vmem:[#allocation2 + $0x130] sm:$0xff]  ;;  %v6285_v35 = vld [vmem:[#allocation2 + $0x138] sm:$0xff] }
 0x527   :  { %10110 = vst [vmem:[#allocation61_spill] sm:$0xff] %v6283_v34  ;;  %10111 = vst [vmem:[#allocation62_spill] sm:$0xff] %v6285_v35  ;;  %v6287_v36 = vld [vmem:[#allocation2 + $0x140] sm:$0xff]  ;;  %v6289_v37 = vld [vmem:[#allocation2 + $0x148] sm:$0xff] }
 0x528   :  { %10112 = vst [vmem:[#allocation63_spill] sm:$0xff] %v6287_v36  ;;  %10113 = vst [vmem:[#allocation64_spill] sm:$0xff] %v6289_v37  ;;  %v6291_v38 = vld [vmem:[#allocation2 + $0x150] sm:$0xff]  ;;  %v6293_v39 = vld [vmem:[#allocation2 + $0x158] sm:$0xff] }
 0x529   :  { %10114 = vst [vmem:[#allocation65_spill] sm:$0xff] %v6291_v38  ;;  %10115 = vst [vmem:[#allocation66_spill] sm:$0xff] %v6293_v39  ;;  %v6295_v40 = vld [vmem:[#allocation2 + $0x160] sm:$0xff]  ;;  %v6297_v41 = vld [vmem:[#allocation2 + $0x168] sm:$0xff] }
 0x52a   :  { %10116 = vst [vmem:[#allocation67_spill] sm:$0xff] %v6295_v40  ;;  %10117 = vst [vmem:[#allocation68_spill] sm:$0xff] %v6297_v41  ;;  %v6299_v42 = vld [vmem:[#allocation2 + $0x170] sm:$0xff]  ;;  %v6301_v43 = vld [vmem:[#allocation2 + $0x178] sm:$0xff] }
 0x52b   :  { %10118 = vst [vmem:[#allocation69_spill] sm:$0xff] %v6299_v42  ;;  %10119 = vst [vmem:[#allocation70_spill] sm:$0xff] %v6301_v43  ;;  %v6303_v44 = vld [vmem:[#allocation2 + $0x180] sm:$0xff]  ;;  %v6305_v45 = vld [vmem:[#allocation2 + $0x188] sm:$0xff] }
 0x52c   :  { %10120 = vst [vmem:[#allocation71_spill] sm:$0xff] %v6303_v44  ;;  %10121 = vst [vmem:[#allocation72_spill] sm:$0xff] %v6305_v45  ;;  %v6307_v46 = vld [vmem:[#allocation2 + $0x190] sm:$0xff]  ;;  %v6309_v47 = vld [vmem:[#allocation2 + $0x198] sm:$0xff] }
 0x52d   :  { %10122 = vst [vmem:[#allocation73_spill] sm:$0xff] %v6307_v46  ;;  %10123 = vst [vmem:[#allocation74_spill] sm:$0xff] %v6309_v47  ;;  %v6311_v48 = vld [vmem:[#allocation2 + $0x1a0] sm:$0xff]  ;;  %v6313_v49 = vld [vmem:[#allocation2 + $0x1a8] sm:$0xff] }
 0x52e   :  { %10124 = vst [vmem:[#allocation75_spill] sm:$0xff] %v6311_v48  ;;  %10125 = vst [vmem:[#allocation76_spill] sm:$0xff] %v6313_v49  ;;  %v6315_v50 = vld [vmem:[#allocation2 + $0x1b0] sm:$0xff]  ;;  %v6317_v51 = vld [vmem:[#allocation2 + $0x1b8] sm:$0xff] }
 0x52f   :  { %10126 = vst [vmem:[#allocation77_spill] sm:$0xff] %v6315_v50  ;;  %10127 = vst [vmem:[#allocation78_spill] sm:$0xff] %v6317_v51  ;;  %v6319_v52 = vld [vmem:[#allocation2 + $0x1c0] sm:$0xff]  ;;  %v6321_v53 = vld [vmem:[#allocation2 + $0x1c8] sm:$0xff] }
 0x530   :  { %10128 = vst [vmem:[#allocation79_spill] sm:$0xff] %v6319_v52  ;;  %10129 = vst [vmem:[#allocation80_spill] sm:$0xff] %v6321_v53  ;;  %v6323_v54 = vld [vmem:[#allocation2 + $0x1d0] sm:$0xff]  ;;  %v6325_v55 = vld [vmem:[#allocation2 + $0x1d8] sm:$0xff] }
 0x531   :  { %10130 = vst [vmem:[#allocation81_spill] sm:$0xff] %v6323_v54  ;;  %10131 = vst [vmem:[#allocation82_spill] sm:$0xff] %v6325_v55  ;;  %v6327_v56 = vld [vmem:[#allocation2 + $0x1e0] sm:$0xff]  ;;  %v6329_v15 = vld [vmem:[#allocation2 + $0x1e8] sm:$0xff] }
 0x532   :  { %10132 = vst [vmem:[#allocation83_spill] sm:$0xff] %v6327_v56  ;;  %10133 = vst [vmem:[#allocation84_spill] sm:$0xff] %v6329_v15  ;;  %v6331_v46 = vld [vmem:[#allocation2 + $0x1f0] sm:$0xff]  ;;  %v6333_v48 = vld [vmem:[#allocation2 + $0x1f8] sm:$0xff] }
 0x533   :  { %10134 = vst [vmem:[#allocation85_spill] sm:$0xff] %v6331_v46  ;;  %10135 = vst [vmem:[#allocation86_spill] sm:$0xff] %v6333_v48 }
 0x534   :  { %5957 = dma.done.wait [#allocation5 + $0x1], 8192 }
 0x535   :  { %5958 = vsyncadd [#allocation5 + $0x1], 4294959104  ;;  %v916_v50 = vcombine.high %v6205_v57, %v6205_v57  ;;  %v6347_v15 = vld [vmem:[#allocation2 + $0x208] sm:$0xff]  ;;  %v6349_v46 = vld [vmem:[#allocation2 + $0x218] sm:$0xff]  ;;  %vm4438_vm6 = vcmask 9216  }
 0x536   :  { %v6351_v48 = vld [vmem:[#allocation2 + $0x200] sm:$0xff]  ;;  %v6355_v51 = vld [vmem:[#allocation2 + $0x210] sm:$0xff]  ;;  %v6358_v49 = vld [vmem:[#allocation2 + $0x228] sm:$0xff]  ;;  %v10138_v53 = vand.u32 4294901760, %v6347_v15  ;;  %v10140_v43 = vand.u32 4294901760, %v6349_v46 }
 0x537   :  { %v6338_v52 = vrot.slane %v916_v50, %v6138_v16  ;;  %v6360_v44 = vld [vmem:[#allocation2 + $0x238] sm:$0xff]  ;;  %v6366_v40 = vld [vmem:[#allocation2 + $0x220] sm:$0xff]  ;;  %v6368_v55 = vld [vmem:[#allocation2 + $0x230] sm:$0xff]  ;;  %v10142_v47 = vand.u32 4294901760, %v6351_v48  ;;  %v10144_v38 = vand.u32 4294901760, %v6355_v51 }
 0x538   :  { %v6373_v50 = vsub.f32 %v6347_v15, %v10138_v53  ;;  %v6378_v41 = vsub.f32 %v6349_v46, %v10140_v43  ;;  %v10146_v53 = vand.u32 4294901760, %v6358_v49  ;;  %v10148_v43 = vand.u32 4294901760, %v6360_v44  ;;  %v6422_v28 = vld [vmem:[#allocation2 + $0x248] sm:$0xff]  ;;  %v6435_v24 = vld [vmem:[#allocation2 + $0x240] sm:$0xff]  ;;  %v6437_v27 = vld [vmem:[#allocation2 + $0x250] sm:$0xff] }
 0x539   :  { %v6342_v54 = vcombine.high %v6338_v52, %v6338_v52  ;;  %v6383_v45 = vsub.f32 %v6351_v48, %v10142_v47  ;;  %v6389_v36 = vsub.f32 %v6355_v51, %v10144_v38  ;;  %v9479_v47 = vand.u32 4294901760, %v6368_v55  ;;  %v6452_v57 = vld [vmem:[#allocation2 + $0x260] sm:$0xff]  ;;  %v6465_v22 = vld [vmem:[#allocation2 + $0x270] sm:$0xff]  ;;  %v6478_v20 = vld [vmem:[#allocation2 + $0x288] sm:$0xff] }
 0x53a   :  { %10139 = vst [vmem:[#allocation89_spill] sm:$0xff] %v6373_v50  ;;  %10141 = vst [vmem:[#allocation90_spill] sm:$0xff] %v6378_v41  ;;  %v6394_v39 = vsub.f32 %v6358_v49, %v10146_v53  ;;  %v6399_v37 = vsub.f32 %v6360_v44, %v10148_v43  ;;  %v9484_v34 = vand.u32 4294901760, %v6373_v50  ;;  %v9483_v42 = vand.u32 4294901760, %v6378_v41  ;;  %v6528_v8 = vld [vmem:[#allocation2 + $0x290] sm:$0xff]  ;;  %v6604_v0 = vld [vmem:[#allocation2 + $0x2c0] sm:$0xff] }
 0x53b   :  { %10136 = vst [vmem:[#allocation87_spill] sm:$0xff] %v6342_v54  ;;  %v6345_v56 = vand.u32 4294901760, %v6342_v54  ;;  %10143 = vst [vmem:[#allocation91_spill] sm:$0xff] %v6383_v45  ;;  %v10150_v38 = vand.u32 4294901760, %v6366_v40  ;;  %v6416_v30 = vsub.f32 %v6368_v55, %v9479_v47  ;;  %v10153_v53 = vand.u32 4294901760, %v6383_v45  ;;  %v6556_v6 = vld [vmem:[#allocation2 + $0x2b0] sm:$0xff] }
 0x53c   :  { %10145 = vst [vmem:[#allocation92_spill] sm:$0xff] %v6389_v36  ;;  %10147 = vst [vmem:[#allocation93_spill] sm:$0xff] %v6394_v39  ;;  %v5120_v32 = vpack.c.bf16 %v9483_v42, %v9484_v34  ;;  %v10154_v33 = vand.u32 4294901760, %v6389_v36  ;;  %v10155_v43 = vand.u32 4294901760, %v6394_v39  ;;  %v10156_v29 = vand.u32 4294901760, %v6399_v37  ;;  %v6440_v34 = vld [vmem:[#allocation2 + $0x268] sm:$0xff] }
 0x53d   :  { %10137 = vst [vmem:[#allocation88_spill] sm:$0xff] %v6345_v56  ;;  %2073 = vmatprep.mubr.f32.mxu0 %v6345_v56  ;;  %10149 = vst [vmem:[#allocation94_spill] sm:$0xff] %v6399_v37  ;;  %v6408_v35 = vsub.f32 %v6366_v40, %v10150_v38  ;;  %v6424_v38 = vld [vmem:[#allocation2 + $0x258] sm:$0xff]  ;;  %v9489_v42 = vand.u32 4294901760, %v6416_v30  ;;  %v9491_v25 = vand.u32 4294901760, %v6422_v28  ;;  %v10161_v23 = vand.u32 4294901760, %v6440_v34 }
 0x53e   :  { %10152 = vst [vmem:[#allocation96_spill] sm:$0xff] %v6416_v30  ;;  %v5122_v31 = vpack.c.bf16 %v10154_v33, %v10153_v53  ;;  %v5124_v47 = vpack.c.bf16 %v10156_v29, %v10155_v43  ;;  %5121 = vmatprep.subr.bf16.mxu0 %v5120_v32  ;;  %v9493_v33 = vand.u32 4294901760, %v6424_v38  ;;  %v6444_v53 = vld [vmem:[#allocation2 + $0x278] sm:$0xff]  ;;  %v9496_v43 = vand.u32 4294901760, %v6435_v24  ;;  %v6606_v62 = vld [vmem:[#allocation2 + $0x2d0] sm:$0xff]  ;;  %v6656_v39 = vld [vmem:[#allocation2 + $0x308] sm:$0xff] }
 0x53f   :  { %10151 = vst [vmem:[#allocation95_spill] sm:$0xff] %v6408_v35  ;;  %v9490_v26 = vand.u32 4294901760, %v6408_v35  ;;  %v9498_v32 = vand.u32 4294901760, %v6437_v27  ;;  %v6485_v21 = vsub.f32 %v6440_v34, %v10161_v23  ;;  %v10166_v18 = vand.u32 4294901760, %v6452_v57  ;;  %v6654_v37 = vld [vmem:[#allocation2 + $0x2f0] sm:$0xff]  ;;  %v6780_v54 = vld [vmem:[#allocation2 + $0x340] sm:$0xff] }
 0x540   :  { %5123 = vmatpush1.bf16.msra.mxu0 %v5122_v31  ;;  %v6457_v31 = vsub.f32 %v6422_v28, %v9491_v25  ;;  %v9502_v25 = vand.u32 4294901760, %v6444_v53  ;;  %v9509_v17 = vand.u32 4294901760, %v6478_v20  ;;  %10227 = vst [vmem:[#allocation136_spill] sm:$0xff] %v6780_v54  ;;  %v6782_v56 = vld [vmem:[#allocation2 + $0x350] sm:$0xff] }
 0x541   :  { %5125 = vmatprep.subr.bf16.mxu0 %v5124_v47  ;;  %v5126_v29 = vpack.c.bf16 %v9489_v42, %v9490_v26  ;;  %v6462_v47 = vsub.f32 %v6424_v38, %v9493_v33  ;;  %v6470_v42 = vsub.f32 %v6435_v24, %v9496_v43  ;;  %v6475_v26 = vsub.f32 %v6437_v27, %v9498_v32  ;;  %v6496_v33 = vld [vmem:[#allocation2 + $0x298] sm:$0xff] }
 0x542   :  { %10157 = vst [vmem:[#allocation97_spill] sm:$0xff] %v6457_v31  ;;  %10162 = vst [vmem:[#allocation101_spill] sm:$0xff] %v6485_v21  ;;  %v6493_v14 = vsub.f32 %v6444_v53, %v9502_v25  ;;  %v10164_v16 = vand.u32 4294901760, %v6457_v31  ;;  %v6506_v32 = vsub.f32 %v6452_v57, %v10166_v18  ;;  %v6509_v25 = vld [vmem:[#allocation2 + $0x280] sm:$0xff]  ;;  %v6526_v11 = vsub.f32 %v6478_v20, %v9509_v17 }
 0x543   :  { %10158 = vst [vmem:[#allocation98_spill] sm:$0xff] %v6462_v47  ;;  %10159 = vst [vmem:[#allocation99_spill] sm:$0xff] %v6470_v42  ;;  %v10165_v23 = vand.u32 4294901760, %v6462_v47  ;;  %v10169_v12 = vand.u32 4294901760, %v6475_v26  ;;  %v10174_v17 = vand.u32 4294901760, %v6496_v33  ;;  %v6554_v18 = vld [vmem:[#allocation2 + $0x2a0] sm:$0xff] }
 0x544   :  { %10160 = vst [vmem:[#allocation100_spill] sm:$0xff] %v6475_v26  ;;  %5127 = vmatpush1.bf16.msra.mxu0 %v5126_v29  ;;  %10163 = vst [vmem:[#allocation102_spill] sm:$0xff] %v6493_v14  ;;  %v10168_v29 = vand.u32 4294901760, %v6470_v42  ;;  %v9512_v13 = vand.u32 4294901760, %v6493_v14  ;;  %v10177_v4 = vand.u32 4294901760, %v6506_v32  ;;  %v10184_v2 = vand.u32 4294901760, %v6526_v11 }
 0x545   :  { %v5128_v19 = vpack.c.bf16 %v10165_v23, %v10164_v16  ;;  %10167 = vst [vmem:[#allocation103_spill] sm:$0xff] %v6506_v32  ;;  %v10170_v23 = vand.u32 4294901760, %v6465_v22  ;;  %10172 = vst [vmem:[#allocation105_spill] sm:$0xff] %v6526_v11  ;;  %v9515_v16 = vand.u32 4294901760, %v6509_v25  ;;  %v6544_v9 = vsub.f32 %v6496_v33, %v10174_v17 }
 0x546   :  { %v5130_v10 = vpack.c.bf16 %v10169_v12, %v10168_v29  ;;  %v6530_v12 = vld [vmem:[#allocation2 + $0x2a8] sm:$0xff]  ;;  %v6532_v29 = vld [vmem:[#allocation2 + $0x2b8] sm:$0xff]  ;;  %v9528_v3 = vand.u32 4294901760, %v6554_v18  ;;  %10228 = vst [vmem:[#allocation137_spill] sm:$0xff] %v6782_v56 }
 0x547   :  { %5129 = vmatprep.subr.bf16.mxu0 %v5128_v19  ;;  %v6520_v43 = vsub.f32 %v6465_v22, %v10170_v23  ;;  %v10173_v19 = vand.u32 4294901760, %v6485_v21  ;;  %10175 = vst [vmem:[#allocation106_spill] sm:$0xff] %v6544_v9  ;;  %v9525_v7 = vand.u32 4294901760, %v6544_v9  ;;  %v10182_v21 = vand.u32 4294901760, %v6532_v29  ;;  %v6635_v9 = vld [vmem:[#allocation2 + $0x2e0] sm:$0xff] }
 0x548   :  { %5131 = vmatpush1.bf16.msra.mxu0 %v5130_v10  ;;  %v6550_v10 = vsub.f32 %v6509_v25, %v9515_v16  ;;  %v10179_v16 = vand.u32 4294901760, %v6528_v8 }
 0x549   :  { %10171 = vst [vmem:[#allocation104_spill] sm:$0xff] %v6520_v43  ;;  %v5132_v23 = vpack.c.bf16 %v9512_v13, %v10173_v19  ;;  %v9522_v19 = vand.u32 4294901760, %v6530_v12  ;;  %v10178_v17 = vand.u32 4294901760, %v6520_v43  ;;  %v6577_v5 = vsub.f32 %v6532_v29, %v10182_v21  ;;  %v6608_v21 = vld [vmem:[#allocation2 + $0x2e8] sm:$0xff] }
 0x54a   :  { %10176 = vst [vmem:[#allocation107_spill] sm:$0xff] %v6550_v10  ;;  %v6567_v14 = vsub.f32 %v6528_v8, %v10179_v16  ;;  %v5136_v16 = vpack.c.bf16 %v9525_v7, %v10184_v2 }
 0x54b   :  { %5133 = vmatprep.subr.bf16.mxu0 %v5132_v23  ;;  %v5134_v23 = vpack.c.bf16 %v10178_v17, %v10177_v4  ;;  %v6572_v13 = vsub.f32 %v6530_v12, %v9522_v19  ;;  %10183 = vst [vmem:[#allocation110_spill] sm:$0xff] %v6577_v5  ;;  %v6579_v4 = vld [vmem:[#allocation2 + $0x2c8] sm:$0xff]  ;;  %v6581_v17 = vld [vmem:[#allocation2 + $0x2d8] sm:$0xff]  ;;  %v9533_v19 = vand.u32 4294901760, %v6556_v6 }
 0x54c   :  { %10180 = vst [vmem:[#allocation108_spill] sm:$0xff] %v6567_v14  ;;  %v10191_v1 = vand.u32 4294901760, %v6579_v4  ;;  %v10193_v60 = vand.u32 4294901760, %v6581_v17 }
 0x54d   :  { %10181 = vst [vmem:[#allocation109_spill] sm:$0xff] %v6572_v13  ;;  %5135 = vmatpush1.bf16.msra.mxu0 %v5134_v23  ;;  %v6595_v23 = vsub.f32 %v6554_v18, %v9528_v3  ;;  %v6600_v2 = vsub.f32 %v6556_v6, %v9533_v19  ;;  %v10188_v3 = vand.u32 4294901760, %v6567_v14  ;;  %v10189_v47 = vand.u32 4294901760, %v6572_v13 }
 0x54e   :  { %5137 = vmatprep.subr.bf16.mxu0 %v5136_v16  ;;  %v10187_v16 = vand.u32 4294901760, %v6550_v10  ;;  %v10190_v19 = vand.u32 4294901760, %v6577_v5  ;;  %v6623_v63 = vsub.f32 %v6579_v4, %v10191_v1  ;;  %v6628_v58 = vsub.f32 %v6581_v17, %v10193_v60  ;;  %v6732_v10 = vld [vmem:[#allocation2 + $0x330] sm:$0xff] }
 0x54f   :  { %10185 = vst [vmem:[#allocation111_spill] sm:$0xff] %v6595_v23  ;;  %10186 = vst [vmem:[#allocation112_spill] sm:$0xff] %v6600_v2  ;;  %v9548_v7 = vand.u32 4294901760, %v6595_v23  ;;  %v10195_v1 = vand.u32 4294901760, %v6600_v2  ;;  %v9564_v13 = vand.u32 4294901760, %v6635_v9  ;;  %v6675_v23 = vld [vmem:[#allocation2 + $0x318] sm:$0xff] }
 0x550   :  { %v5138_v11 = vpack.c.bf16 %v10188_v3, %v10187_v16  ;;  %v5140_v31 = vpack.c.bf16 %v10190_v19, %v10189_v47  ;;  %10192 = vst [vmem:[#allocation113_spill] sm:$0xff] %v6623_v63  ;;  %10194 = vst [vmem:[#allocation114_spill] sm:$0xff] %v6628_v58  ;;  %v6630_v3 = vld [vmem:[#allocation2 + $0x2f8] sm:$0xff]  ;;  %v9549_v16 = vand.u32 4294901760, %v6604_v0  ;;  %v9550_v47 = vand.u32 4294901760, %v6606_v62 }
 0x551   :  { %v5142_v5 = vpack.c.bf16 %v10195_v1, %v9548_v7  ;;  %v9559_v60 = vand.u32 4294901760, %v6623_v63  ;;  %v10198_v1 = vand.u32 4294901760, %v6608_v21  ;;  %v10201_v59 = vand.u32 4294901760, %v6630_v3  ;;  %10214 = vst [vmem:[#allocation128_spill] sm:$0xff] %v6732_v10 }
 0x552   :  { %5139 = vmatpush1.bf16.msra.mxu0 %v5138_v11  ;;  %v6646_v11 = vsub.f32 %v6604_v0, %v9549_v16  ;;  %v6651_v19 = vsub.f32 %v6606_v62, %v9550_v47  ;;  %v10200_v16 = vand.u32 4294901760, %v6628_v58  ;;  %v6682_v58 = vsub.f32 %v6635_v9, %v9564_v13  ;;  %v6730_v13 = vld [vmem:[#allocation2 + $0x320] sm:$0xff] }
 0x553   :  { %5141 = vmatprep.subr.bf16.mxu0 %v5140_v31  ;;  %v6661_v7 = vsub.f32 %v6608_v21, %v10198_v1  ;;  %v6673_v2 = vsub.f32 %v6630_v3, %v10201_v59  ;;  %10213 = vst [vmem:[#allocation127_spill] sm:$0xff] %v6730_v13 }
 0x554   :  { %10196 = vst [vmem:[#allocation115_spill] sm:$0xff] %v6646_v11  ;;  %10197 = vst [vmem:[#allocation116_spill] sm:$0xff] %v6651_v19  ;;  %v5144_v47 = vpack.c.bf16 %v10200_v16, %v9559_v60  ;;  %v9570_v61 = vand.u32 4294901760, %v6646_v11  ;;  %v9569_v31 = vand.u32 4294901760, %v6651_v19  ;;  %v9574_v16 = vand.u32 4294901760, %v6656_v39  ;;  %v6685_v60 = vld [vmem:[#allocation2 + $0x300] sm:$0xff] }
 0x555   :  { %10199 = vst [vmem:[#allocation117_spill] sm:$0xff] %v6661_v7  ;;  %10202 = vst [vmem:[#allocation118_spill] sm:$0xff] %v6673_v2  ;;  %v9579_v63 = vand.u32 4294901760, %v6673_v2  ;;  %v6704_v11 = vld [vmem:[#allocation2 + $0x310] sm:$0xff]  ;;  %v6706_v19 = vld [vmem:[#allocation2 + $0x328] sm:$0xff]  ;;  %v9584_v1 = vand.u32 4294901760, %v6685_v60 }
 0x556   :  { %5143 = vmatpush1.bf16.msra.mxu0 %v5142_v5  ;;  %v9571_v5 = vand.u32 4294901760, %v6654_v37  ;;  %10203 = vst [vmem:[#allocation119_spill] sm:$0xff] %v6682_v58  ;;  %v5146_v59 = vpack.c.bf16 %v9569_v31, %v9570_v61  ;;  %10206 = vst [vmem:[#allocation122_spill] sm:$0xff] %v6704_v11  ;;  %v6708_v31 = vld [vmem:[#allocation2 + $0x338] sm:$0xff]  ;;  %v10209_v61 = vand.u32 4294901760, %v6661_v7  ;;  %v10215_v2 = vand.u32 4294901760, %v6682_v58 }
 0x557   :  { %5145 = vmatprep.subr.bf16.mxu0 %v5144_v47  ;;  %v6702_v47 = vsub.f32 %v6656_v39, %v9574_v16  ;;  %10207 = vst [vmem:[#allocation123_spill] sm:$0xff] %v6706_v19  ;;  %10208 = vst [vmem:[#allocation124_spill] sm:$0xff] %v6708_v31  ;;  %v10210_v16 = vand.u32 4294901760, %v6675_v23  ;;  %v10220_v42 = vand.u32 4294901760, %v6708_v31 }
 0x558   :  { %v6696_v14 = vsub.f32 %v6654_v37, %v9571_v5  ;;  %v5148_v5 = vpack.c.bf16 %v9579_v63, %v10209_v61  ;;  %v9593_v61 = vand.u32 4294901760, %v6706_v19 }
 0x559   :  { %10205 = vst [vmem:[#allocation121_spill] sm:$0xff] %v6702_v47  ;;  %v6720_v43 = vsub.f32 %v6675_v23, %v10210_v16  ;;  %v6753_v58 = vsub.f32 %v6708_v31, %v10220_v42  ;;  %v10224_v7 = vand.u32 4294901760, %v6702_v47  ;;  %v6784_v42 = vld [vmem:[#allocation2 + $0x368] sm:$0xff] }
 0x55a   :  { %10204 = vst [vmem:[#allocation120_spill] sm:$0xff] %v6696_v14  ;;  %5147 = vmatpush1.bf16.msra.mxu0 %v5146_v59  ;;  %v6726_v59 = vsub.f32 %v6685_v60, %v9584_v1  ;;  %v10216_v16 = vand.u32 4294901760, %v6696_v14  ;;  %v10217_v1 = vand.u32 4294901760, %v6704_v11  ;;  %v6748_v63 = vsub.f32 %v6706_v19, %v9593_v61  ;;  %10229 = vst [vmem:[#allocation138_spill] sm:$0xff] %v6784_v42 }
 0x55b   :  { %10211 = vst [vmem:[#allocation125_spill] sm:$0xff] %v6720_v43  ;;  %5149 = vmatprep.subr.bf16.mxu0 %v5148_v5  ;;  %v9597_v32 = vand.u32 4294901760, %v6720_v43  ;;  %10221 = vst [vmem:[#allocation131_spill] sm:$0xff] %v6753_v58  ;;  %v9600_v14 = vand.u32 4294901760, %v6730_v13  ;;  %v9604_v61 = vand.u32 4294901760, %v6732_v10  ;;  %v6811_v43 = vld [vmem:[#allocation2 + $0x360] sm:$0xff] }
 0x55c   :  { %10212 = vst [vmem:[#allocation126_spill] sm:$0xff] %v6726_v59  ;;  %v5150_v5 = vpack.c.bf16 %v10216_v16, %v10215_v2  ;;  %v6743_v26 = vsub.f32 %v6704_v11, %v10217_v1  ;;  %10219 = vst [vmem:[#allocation130_spill] sm:$0xff] %v6748_v63  ;;  %v6755_v2 = vld [vmem:[#allocation2 + $0x348] sm:$0xff]  ;;  %v6757_v16 = vld [vmem:[#allocation2 + $0x358] sm:$0xff] }
 0x55d   :  { %10222 = vst [vmem:[#allocation132_spill] sm:$0xff] %v6755_v2  ;;  %10223 = vst [vmem:[#allocation133_spill] sm:$0xff] %v6757_v16  ;;  %v5152_v1 = vpack.c.bf16 %v9597_v32, %v10224_v7  ;;  %v6776_v7 = vsub.f32 %v6732_v10, %v9604_v61  ;;  %v10233_v61 = vand.u32 4294901760, %v6753_v58  ;;  %v10234_v31 = vand.u32 4294901760, %v6755_v2 }
 0x55e   :  { %10218 = vst [vmem:[#allocation129_spill] sm:$0xff] %v6743_v26  ;;  %5151 = vmatpush1.bf16.msra.mxu0 %v5150_v5  ;;  %v6771_v5 = vsub.f32 %v6730_v13, %v9600_v14  ;;  %v10231_v14 = vand.u32 4294901760, %v6743_v26  ;;  %v10232_v13 = vand.u32 4294901760, %v6748_v63  ;;  %v10236_v11 = vand.u32 4294901760, %v6757_v16  ;;  %10239 = vst [vmem:[#allocation142_spill] sm:$0xff] %v6811_v43 }
 0x55f   :  { %5153 = vmatprep.subr.bf16.mxu0 %v5152_v1  ;;  %10226 = vst [vmem:[#allocation135_spill] sm:$0xff] %v6776_v7  ;;  %v10230_v1 = vand.u32 4294901760, %v6726_v59  ;;  %v6799_v19 = vsub.f32 %v6755_v2, %v10234_v31  ;;  %v10240_v31 = vand.u32 4294901760, %v6776_v7  ;;  %v6832_v7 = vld [vmem:[#allocation2 + $0x388] sm:$0xff]  ;;  %v9633_v63 = vand.u32 4294901760, %v6811_v43 }
 0x560   :  { %10225 = vst [vmem:[#allocation134_spill] sm:$0xff] %v6771_v5  ;;  %v5156_v10 = vpack.c.bf16 %v10233_v61, %v10232_v13  ;;  %v9619_v32 = vand.u32 4294901760, %v6771_v5  ;;  %v6804_v59 = vsub.f32 %v6757_v16, %v10236_v11  ;;  %v9621_v13 = vand.u32 4294901760, %v6782_v56  ;;  %v6830_v5 = vld [vmem:[#allocation2 + $0x370] sm:$0xff]  ;;  %10244 = vst [vmem:[#allocation146_spill] sm:$0xff] %v6832_v7 }
 0x561   :  { %v5154_v47 = vpack.c.bf16 %v10231_v14, %v10230_v1  ;;  %10235 = vst [vmem:[#allocation139_spill] sm:$0xff] %v6799_v19  ;;  %v6806_v14 = vld [vmem:[#allocation2 + $0x378] sm:$0xff]  ;;  %v9620_v1 = vand.u32 4294901760, %v6780_v54  ;;  %v9629_v11 = vand.u32 4294901760, %v6799_v19  ;;  %10243 = vst [vmem:[#allocation145_spill] sm:$0xff] %v6830_v5 }
 0x562   :  { %10237 = vst [vmem:[#allocation140_spill] sm:$0xff] %v6804_v59  ;;  %10238 = vst [vmem:[#allocation141_spill] sm:$0xff] %v6806_v14  ;;  %v5158_v58 = vpack.c.bf16 %v10240_v31, %v9619_v32  ;;  %v6827_v61 = vsub.f32 %v6782_v56, %v9621_v13  ;;  %v10245_v31 = vand.u32 4294901760, %v6784_v42  ;;  %v10248_v2 = vand.u32 4294901760, %v6806_v14  ;;  %v6851_v56 = vld [vmem:[#allocation2 + $0x398] sm:$0xff] }
 0x563   :  { %5155 = vmatpush1.bf16.msra.mxu0 %v5154_v47  ;;  %v6822_v47 = vsub.f32 %v6780_v54, %v9620_v1  ;;  %v10247_v1 = vand.u32 4294901760, %v6804_v59  ;;  %10250 = vst [vmem:[#allocation149_spill] sm:$0xff] %v6851_v56  ;;  %v6858_v59 = vsub.f32 %v6811_v43, %v9633_v63  ;;  %v6880_v43 = vld [vmem:[#allocation2 + $0x390] sm:$0xff]  ;;  %v6906_v63 = vld [vmem:[#allocation2 + $0x3a0] sm:$0xff] }
 0x564   :  { %5157 = vmatprep.subr.bf16.mxu0 %v5156_v10  ;;  %10242 = vst [vmem:[#allocation144_spill] sm:$0xff] %v6827_v61  ;;  %v6837_v32 = vsub.f32 %v6784_v42, %v10245_v31  ;;  %v9636_v10 = vand.u32 4294901760, %v6827_v61  ;;  %v6849_v26 = vsub.f32 %v6806_v14, %v10248_v2  ;;  %10255 = vst [vmem:[#allocation154_spill] sm:$0xff] %v6880_v43  ;;  %v6882_v42 = vld [vmem:[#allocation2 + $0x3a8] sm:$0xff] }
 0x565   :  { %10241 = vst [vmem:[#allocation143_spill] sm:$0xff] %v6822_v47  ;;  %v5160_v13 = vpack.c.bf16 %v10247_v1, %v9629_v11  ;;  %v9637_v16 = vand.u32 4294901760, %v6822_v47  ;;  %10251 = vst [vmem:[#allocation150_spill] sm:$0xff] %v6858_v59  ;;  %v9640_v1 = vand.u32 4294901760, %v6832_v7  ;;  %v6861_v11 = vld [vmem:[#allocation2 + $0x380] sm:$0xff] }
 0x566   :  { %10246 = vst [vmem:[#allocation147_spill] sm:$0xff] %v6837_v32  ;;  %10249 = vst [vmem:[#allocation148_spill] sm:$0xff] %v6849_v26  ;;  %v9644_v19 = vand.u32 4294901760, %v6849_v26  ;;  %v9649_v31 = vand.u32 4294901760, %v6861_v11  ;;  %v10264_v26 = vand.u32 4294901760, %v6858_v59 }
 0x567   :  { %5159 = vmatpush1.bf16.msra.mxu0 %v5158_v58  ;;  %v9638_v58 = vand.u32 4294901760, %v6830_v5  ;;  %10252 = vst [vmem:[#allocation151_spill] sm:$0xff] %v6861_v11  ;;  %v5162_v2 = vpack.c.bf16 %v9636_v10, %v9637_v16  ;;  %10256 = vst [vmem:[#allocation155_spill] sm:$0xff] %v6882_v42  ;;  %v6884_v10 = vld [vmem:[#allocation2 + $0x3b8] sm:$0xff]  ;;  %v10258_v16 = vand.u32 4294901760, %v6837_v32 }
 0x568   :  { %5161 = vmatprep.subr.bf16.mxu0 %v5160_v13  ;;  %v6878_v13 = vsub.f32 %v6832_v7, %v9640_v1  ;;  %10257 = vst [vmem:[#allocation156_spill] sm:$0xff] %v6884_v10  ;;  %v10259_v1 = vand.u32 4294901760, %v6851_v56  ;;  %10262 = vst [vmem:[#allocation159_spill] sm:$0xff] %v6906_v63 }
 0x569   :  { %v6872_v14 = vsub.f32 %v6830_v5, %v9638_v58  ;;  %v5164_v58 = vpack.c.bf16 %v9644_v19, %v10258_v16  ;;  %v9655_v16 = vand.u32 4294901760, %v6882_v42  ;;  %v6908_v5 = vld [vmem:[#allocation2 + $0x3b0] sm:$0xff] }
 0x56a   :  { %10254 = vst [vmem:[#allocation153_spill] sm:$0xff] %v6878_v13  ;;  %v6896_v7 = vsub.f32 %v6851_v56, %v10259_v1  ;;  %10263 = vst [vmem:[#allocation160_spill] sm:$0xff] %v6908_v5  ;;  %v10269_v56 = vand.u32 4294901760, %v6884_v10  ;;  %v10273_v32 = vand.u32 4294901760, %v6878_v13 }
 0x56b   :  { %10253 = vst [vmem:[#allocation152_spill] sm:$0xff] %v6872_v14  ;;  %5163 = vmatpush1.bf16.msra.mxu0 %v5162_v2  ;;  %v6902_v2 = vsub.f32 %v6861_v11, %v9649_v31  ;;  %v10265_v1 = vand.u32 4294901760, %v6872_v14  ;;  %v10266_v31 = vand.u32 4294901760, %v6880_v43  ;;  %v6924_v19 = vsub.f32 %v6882_v42, %v9655_v16  ;;  %v6956_v42 = vld [vmem:[#allocation2 + $0x3c0] sm:$0xff]  ;;  %v6958_v14 = vld [vmem:[#allocation2 + $0x3d0] sm:$0xff] }
 0x56c   :  { %10260 = vst [vmem:[#allocation157_spill] sm:$0xff] %v6896_v7  ;;  %5165 = vmatprep.subr.bf16.mxu0 %v5164_v58  ;;  %v9659_v61 = vand.u32 4294901760, %v6896_v7  ;;  %v6929_v59 = vsub.f32 %v6884_v10, %v10269_v56  ;;  %v9666_v16 = vand.u32 4294901760, %v6908_v5  ;;  %10276 = vst [vmem:[#allocation168_spill] sm:$0xff] %v6956_v42  ;;  %v6960_v56 = vld [vmem:[#allocation2 + $0x3e8] sm:$0xff]  ;;  %v6987_v7 = vld [vmem:[#allocation2 + $0x3e0] sm:$0xff] }
 0x56d   :  { %10261 = vst [vmem:[#allocation158_spill] sm:$0xff] %v6902_v2  ;;  %v5166_v58 = vpack.c.bf16 %v10265_v1, %v10264_v26  ;;  %v6919_v11 = vsub.f32 %v6880_v43, %v10266_v31  ;;  %10268 = vst [vmem:[#allocation162_spill] sm:$0xff] %v6924_v19  ;;  %v6931_v26 = vld [vmem:[#allocation2 + $0x3c8] sm:$0xff]  ;;  %v6933_v1 = vld [vmem:[#allocation2 + $0x3d8] sm:$0xff]  ;;  %v9662_v43 = vand.u32 4294901760, %v6906_v63 }
 0x56e   :  { %10270 = vst [vmem:[#allocation163_spill] sm:$0xff] %v6929_v59  ;;  %10271 = vst [vmem:[#allocation164_spill] sm:$0xff] %v6931_v26  ;;  %v5168_v31 = vpack.c.bf16 %v9659_v61, %v10273_v32  ;;  %v6952_v32 = vsub.f32 %v6908_v5, %v9666_v16  ;;  %v10282_v16 = vand.u32 4294901760, %v6929_v59  ;;  %v10283_v10 = vand.u32 4294901760, %v6931_v26 }
 0x56f   :  { %10267 = vst [vmem:[#allocation161_spill] sm:$0xff] %v6919_v11  ;;  %10272 = vst [vmem:[#allocation165_spill] sm:$0xff] %v6933_v1  ;;  %5167 = vmatpush1.bf16.msra.mxu0 %v5166_v58  ;;  %v6947_v58 = vsub.f32 %v6906_v63, %v9662_v43  ;;  %v10280_v43 = vand.u32 4294901760, %v6919_v11  ;;  %v10281_v63 = vand.u32 4294901760, %v6924_v19  ;;  %v10285_v54 = vand.u32 4294901760, %v6933_v1 }
 0x570   :  { %5169 = vmatprep.subr.bf16.mxu0 %v5168_v31  ;;  %10275 = vst [vmem:[#allocation167_spill] sm:$0xff] %v6952_v32  ;;  %10277 = vst [vmem:[#allocation169_spill] sm:$0xff] %v6958_v14  ;;  %v10279_v31 = vand.u32 4294901760, %v6902_v2  ;;  %v6975_v47 = vsub.f32 %v6931_v26, %v10283_v10  ;;  %v10287_v10 = vand.u32 4294901760, %v6952_v32  ;;  %v9692_v19 = vand.u32 4294901760, %v6987_v7 }
 0x571   :  { %10274 = vst [vmem:[#allocation166_spill] sm:$0xff] %v6947_v58  ;;  %10278 = vst [vmem:[#allocation170_spill] sm:$0xff] %v6960_v56  ;;  %v5172_v5 = vpack.c.bf16 %v10282_v16, %v10281_v63  ;;  %v9679_v61 = vand.u32 4294901760, %v6947_v58  ;;  %v6980_v2 = vsub.f32 %v6933_v1, %v10285_v54  ;;  %v9682_v63 = vand.u32 4294901760, %v6958_v14  ;;  %v7006_v1 = vld [vmem:[#allocation2 + $0x3f0] sm:$0xff] }
 0x572   :  { %v5170_v13 = vpack.c.bf16 %v10280_v43, %v10279_v31  ;;  %10284 = vst [vmem:[#allocation171_spill] sm:$0xff] %v6975_v47  ;;  %v6982_v43 = vld [vmem:[#allocation2 + $0x3f8] sm:$0xff]  ;;  %v9680_v31 = vand.u32 4294901760, %v6956_v42  ;;  %v9686_v54 = vand.u32 4294901760, %v6975_v47 }
 0x573   :  { %10286 = vst [vmem:[#allocation172_spill] sm:$0xff] %v6980_v2  ;;  %v5174_v59 = vpack.c.bf16 %v10287_v10, %v9679_v61  ;;  %v7003_v16 = vsub.f32 %v6958_v14, %v9682_v63  ;;  %v10290_v10 = vand.u32 4294901760, %v6960_v56  ;;  %v10298_v14 = vand.u32 4294901760, %v6373_v50 }
 0x574   :  { %5171 = vmatpush1.bf16.msra.mxu0 %v5170_v13  ;;  %v6998_v13 = vsub.f32 %v6956_v42, %v9680_v31  ;;  %v10292_v31 = vand.u32 4294901760, %v6980_v2 }
 0x575   :  { %5173 = vmatprep.subr.bf16.mxu0 %v5172_v5  ;;  %10289 = vst [vmem:[#allocation174_spill] sm:$0xff] %v7003_v16  ;;  %v9687_v5 = vand.u32 4294901760, %v6982_v43  ;;  %v7011_v61 = vsub.f32 %v6960_v56, %v10290_v10  ;;  %v10300_v56 = vand.u32 4294901760, %v7003_v16 }
 0x576   :  { %10288 = vst [vmem:[#allocation173_spill] sm:$0xff] %v6998_v13  ;;  %v5176_v42 = vpack.c.bf16 %v10292_v31, %v9686_v54  ;;  %v10295_v31 = vand.u32 4294901760, %v6347_v15  ;;  %v10296_v54 = vand.u32 4294901760, %v6349_v46  ;;  %v10299_v10 = vand.u32 4294901760, %v6998_v13 }
 0x577   :  { %10291 = vst [vmem:[#allocation175_spill] sm:$0xff] %v7011_v61  ;;  %v7023_v26 = vsub.f32 %v6982_v43, %v9687_v5  ;;  %v1082_v5 = vsub.f32 %v6373_v50, %v10298_v14  ;;  %v10301_v15 = vand.u32 4294901760, %v7006_v1 }
 0x578   :  { %5175 = vmatpush1.bf16.msra.mxu0 %v5174_v59  ;;  %v7030_v59 = vsub.f32 %v6987_v7, %v9692_v19  ;;  %v7036_v63 = vpack.c.bf16 %v10296_v54, %v10295_v31  ;;  %v5178_v2 = vpack.c.bf16 %v10300_v56, %v10299_v10  ;;  %v10303_v54 = vand.u32 4294901760, %v6351_v48 }
 0x579   :  { %10293 = vst [vmem:[#allocation176_spill] sm:$0xff] %v7023_v26  ;;  %5177 = vmatprep.subr.bf16.mxu0 %v5176_v42  ;;  %v7050_v46 = vsub.f32 %v7006_v1, %v10301_v15  ;;  %v10304_v42 = vand.u32 4294901760, %v6355_v51  ;;  %v10306_v31 = vand.u32 4294901760, %v6358_v49  ;;  %v10307_v56 = vand.u32 4294901760, %v6360_v44 }
 0x57a   :  { %10294 = vst [vmem:[#allocation177_spill] sm:$0xff] %v7030_v59  ;;  %10297 = vst [vmem:[#allocation178_spill] sm:$0xff] %v7036_v63  ;;  %4865 = vmatprep.subr.bf16.mxu1 %v7036_v63  ;;  %v10309_v19 = vand.u32 4294901760, %v6378_v41  ;;  %v10310_v15 = vand.u32 4294901760, %v6383_v45  ;;  %v10311_v48 = vand.u32 4294901760, %v6389_v36  ;;  %v10313_v49 = vand.u32 4294901760, %v7023_v26 }
 0x57b   :  { %10302 = vst [vmem:[#allocation179_spill] sm:$0xff] %v7050_v46  ;;  %v7057_v14 = vpack.c.bf16 %v10304_v42, %v10303_v54  ;;  %v7063_v10 = vpack.c.bf16 %v10307_v56, %v10306_v31  ;;  %v10312_v54 = vand.u32 4294901760, %v7011_v61  ;;  %v10315_v31 = vand.u32 4294901760, %v6368_v55 }
 0x57c   :  { %v1094_v47 = vsub.f32 %v6378_v41, %v10309_v19  ;;  %v1088_v50 = vsub.f32 %v6383_v45, %v10310_v15  ;;  %v1100_v51 = vsub.f32 %v6389_v36, %v10311_v48  ;;  %5179 = vmatpush1.bf16.msra.mxu0 %v5178_v2  ;;  %v10314_v19 = vand.u32 4294901760, %v6366_v40  ;;  %v10504_v45 = vld [vmem:[#allocation29_spill] sm:$0xff] }
 0x57d   :  { %10305 = vst [vmem:[#allocation180_spill] sm:$0xff] %v7057_v14  ;;  %10308 = vst [vmem:[#allocation181_spill] sm:$0xff] %v7063_v10  ;;  %v5180_v44 = vpack.c.bf16 %v10313_v49, %v10312_v54  ;;  %4867 = vmatpush1.bf16.msra.mxu1 %v7057_v14  ;;  %v10317_v15 = vand.u32 4294901760, %v6422_v28  ;;  %v10318_v48 = vand.u32 4294901760, %v6424_v38  ;;  %v10320_v36 = vand.u32 4294901760, %v6435_v24 }
 0x57e   :  { %v7084_v56 = vpack.c.bf16 %v10315_v31, %v10314_v19  ;;  %v10321_v54 = vand.u32 4294901760, %v6437_v27  ;;  %v7099_v42 = vand.u32 4294901760, %v6338_v52  ;;  %4869 = vmatprep.subr.bf16.mxu1 %v7063_v10  ;;  %v10323_v40 = vand.u32 4294901760, %v6440_v34 }
 0x57f   :  { %v7090_v2 = vpack.c.bf16 %v10318_v48, %v10317_v15  ;;  %5181 = vmatprep.subr.bf16.mxu0 %v5180_v44  ;;  %v10324_v28 = vand.u32 4294901760, %v6444_v53  ;;  %v10326_v38 = vand.u32 4294901760, %v6452_v57  ;;  %v10327_v24 = vand.u32 4294901760, %v6465_v22 }
 0x580   :  { %10316 = vst [vmem:[#allocation182_spill] sm:$0xff] %v7084_v56  ;;  %v7096_v49 = vpack.c.bf16 %v10321_v54, %v10320_v36  ;;  %v10329_v27 = vand.u32 4294901760, %v6478_v20  ;;  %v10330_v36 = vand.u32 4294901760, %v6496_v33  ;;  %v10332_v31 = vand.u32 4294901760, %v6408_v35 }
 0x581   :  { %10319 = vst [vmem:[#allocation183_spill] sm:$0xff] %v7090_v2  ;;  %v7106_v55 = vpack.c.bf16 %v10324_v28, %v10323_v40  ;;  %v7112_v19 = vpack.c.bf16 %v10327_v24, %v10326_v38  ;;  %v10333_v53 = vand.u32 4294901760, %v6416_v30  ;;  %v10334_v57 = vand.u32 4294901760, %v7030_v59  ;;  %4871 = vmatpush1.bf16.msra.mxu1 %v7084_v56 }
 0x582   :  { %10322 = vst [vmem:[#allocation184_spill] sm:$0xff] %v7096_v49  ;;  %v7118_v44 = vpack.c.bf16 %v10330_v36, %v10329_v27  ;;  %v1112_v34 = vsub.f32 %v6408_v35, %v10332_v31  ;;  %v10335_v22 = vand.u32 4294901760, %v7050_v46  ;;  %v10336_v54 = vand.u32 4294901760, %v6509_v25  ;;  %4873 = vmatprep.subr.bf16.mxu1 %v7090_v2 }
 0x583   :  { %10325 = vst [vmem:[#allocation185_spill] sm:$0xff] %v7106_v55  ;;  %10328 = vst [vmem:[#allocation186_spill] sm:$0xff] %v7112_v19  ;;  %v1124_v15 = vsub.f32 %v6416_v30, %v10333_v53  ;;  %v10337_v20 = vand.u32 4294901760, %v6528_v8  ;;  %v10339_v40 = vand.u32 4294901760, %v6530_v12  ;;  %v10340_v28 = vand.u32 4294901760, %v6532_v29 }
 0x584   :  { %10331 = vst [vmem:[#allocation187_spill] sm:$0xff] %v7118_v44  ;;  %v5182_v48 = vpack.c.bf16 %v10335_v22, %v10334_v57  ;;  %v10342_v24 = vand.u32 4294901760, %v6554_v18  ;;  %v10343_v27 = vand.u32 4294901760, %v6556_v6  ;;  %v10345_v31 = vand.u32 4294901760, %v6579_v4 }
 0x585   :  { %v7134_v33 = vpack.c.bf16 %v10337_v20, %v10336_v54  ;;  %v7140_v38 = vpack.c.bf16 %v10340_v28, %v10339_v40  ;;  %v10346_v25 = vand.u32 4294901760, %v6581_v17  ;;  %v10348_v8 = vand.u32 4294901760, %v6604_v0  ;;  %v10366_v28 = vld [vmem:[#allocation124_spill] sm:$0xff]  ;;  %4875 = vmatpush1.bf16.msra.mxu1 %v7096_v49 }
 0x586   :  { %v7146_v36 = vpack.c.bf16 %v10343_v27, %v10342_v24  ;;  %v10349_v12 = vand.u32 4294901760, %v6606_v62  ;;  %v1083_v29 = vand.u32 4294901760, %v1082_v5  ;;  %5183 = vmatpush1.bf16.msra.mxu0 %v5182_v48  ;;  %v10351_v6 = vand.u32 4294901760, %v6608_v21  ;;  %4877 = vmatprep.subr.bf16.mxu1 %v7106_v55 }
 0x587   :  { %10338 = vst [vmem:[#allocation188_spill] sm:$0xff] %v7134_v33  ;;  %10341 = vst [vmem:[#allocation189_spill] sm:$0xff] %v7140_v38  ;;  %v7152_v53 = vpack.c.bf16 %v10346_v25, %v10345_v31  ;;  %v10352_v18 = vand.u32 4294901760, %v6630_v3  ;;  %v10354_v4 = vand.u32 4294901760, %v6635_v9  ;;  %v10355_v17 = vand.u32 4294901760, %v6654_v37  ;;  %5185 = vmatprep.subr.bf16.mxu0 %v7036_v63  ;;  %v10361_v3 = vld [vmem:[#allocation122_spill] sm:$0xff] }
 0x588   :  { %10344 = vst [vmem:[#allocation190_spill] sm:$0xff] %v7146_v36  ;;  %v7158_v57 = vpack.c.bf16 %v10349_v12, %v10348_v8  ;;  %v10357_v62 = vand.u32 4294901760, %v6656_v39  ;;  %v10358_v0 = vand.u32 4294901760, %v6675_v23  ;;  %v1095_v48 = vand.u32 4294901760, %v1094_v47  ;;  %v10364_v37 = vld [vmem:[#allocation123_spill] sm:$0xff]  ;;  %v10371_v31 = vld [vmem:[#allocation128_spill] sm:$0xff] }
 0x589   :  { %10347 = vst [vmem:[#allocation191_spill] sm:$0xff] %v7152_v53  ;;  %v7165_v22 = vpack.c.bf16 %v10352_v18, %v10351_v6  ;;  %v7171_v54 = vpack.c.bf16 %v10355_v17, %v10354_v4  ;;  %v10360_v21 = vand.u32 4294901760, %v6685_v60  ;;  %v10362_v20 = vand.u32 4294901760, %v10361_v3  ;;  %v10369_v23 = vld [vmem:[#allocation127_spill] sm:$0xff]  ;;  %v10374_v8 = vld [vmem:[#allocation136_spill] sm:$0xff]  ;;  %v10376_v6 = vld [vmem:[#allocation137_spill] sm:$0xff]  ;;  %2075 = vmatmul.mubr.f32.vlgmr.msra.gmra.mrb[0].mxu0 %v7099_v42  ;;  %4879 = vmatpush1.bf16.msra.mxu1 %v7112_v19 }
 0x58a   :  { %10350 = vst [vmem:[#allocation192_spill] sm:$0xff] %v7158_v57  ;;  %v7177_v5 = vpack.c.bf16 %v10358_v0, %v10357_v62  ;;  %v10365_v40 = vand.u32 4294901760, %v10364_v37  ;;  %v10367_v24 = vand.u32 4294901760, %v10366_v28  ;;  %v10370_v27 = vand.u32 4294901760, %v10369_v23  ;;  %5187 = vmatpush1.bf16.msra.mxu0 %v7057_v14  ;;  %v10380_v3 = vld [vmem:[#allocation87_spill] sm:$0xff]  ;;  %v10384_v28 = vld [vmem:[#allocation100_spill] sm:$0xff]  ;;  %4881 = vmatprep.subr.bf16.mxu1 %v7118_v44 }
 0x58b   :  { %10353 = vst [vmem:[#allocation193_spill] sm:$0xff] %v7165_v22  ;;  %10356 = vst [vmem:[#allocation194_spill] sm:$0xff] %v7171_v54  ;;  %v7185_v9 = vpack.c.bf16 %v10362_v20, %v10360_v21  ;;  %v10372_v47 = vand.u32 4294901760, %v10371_v31  ;;  %v10375_v12 = vand.u32 4294901760, %v10374_v8  ;;  %v10377_v60 = vand.u32 4294901760, %v10376_v6  ;;  %5189 = vmatprep.subr.bf16.mxu0 %v7063_v10  ;;  %v10379_v21 = vld [vmem:[#allocation88_spill] sm:$0xff] }
 0x58c   :  { %10359 = vst [vmem:[#allocation195_spill] sm:$0xff] %v7177_v5  ;;  %v7191_v39 = vpack.c.bf16 %v10367_v24, %v10365_v40  ;;  %v1089_v4 = vand.u32 4294901760, %v1088_v50  ;;  %v1101_v17 = vand.u32 4294901760, %v1100_v51  ;;  %v1113_v62 = vand.u32 4294901760, %v1112_v34  ;;  %v10382_v50 = vld [vmem:[#allocation99_spill] sm:$0xff]  ;;  %2210 = vmatprep.mubr.f32.mxu0 %v10379_v21  ;;  %v10388_v6 = vld [vmem:[#allocation104_spill] sm:$0xff] }
 0x58d   :  { %10363 = vst [vmem:[#allocation122_spill] sm:$0xff] %v7185_v9  ;;  %v7197_v25 = vpack.c.bf16 %v10372_v47, %v10370_v27  ;;  %v7203_v18 = vpack.c.bf16 %v10377_v60, %v10375_v12  ;;  %v1125_v0 = vand.u32 4294901760, %v1124_v15  ;;  %v7212_v20 = vsub.f32 %v10380_v3, %v10379_v21  ;;  %v10386_v47 = vld [vmem:[#allocation103_spill] sm:$0xff]  ;;  %4883 = vmatpush1.bf16.msra.mxu1 %v7134_v33 }
 0x58e   :  { %10368 = vst [vmem:[#allocation123_spill] sm:$0xff] %v7191_v39  ;;  %v7214_v37 = vpack.c.bf16 %v1095_v48, %v1083_v29  ;;  %v10383_v51 = vand.u32 4294901760, %v10382_v50  ;;  %v10385_v24 = vand.u32 4294901760, %v10384_v28  ;;  %v7224_v15 = vpack.c.bf16 %v1101_v17, %v1089_v4  ;;  %5191 = vmatpush1.bf16.msra.mxu0 %v7084_v56  ;;  %v10390_v3 = vld [vmem:[#allocation107_spill] sm:$0xff]  ;;  %4885 = vmatprep.subr.bf16.mxu1 %v7140_v38 }
 0x58f   :  { %10373 = vst [vmem:[#allocation124_spill] sm:$0xff] %v7197_v25  ;;  %10378 = vst [vmem:[#allocation127_spill] sm:$0xff] %v7203_v18  ;;  %v9695_v34 = vand.u32 4294901760, %v7212_v20  ;;  %5193 = vmatprep.subr.bf16.mxu0 %v7090_v2  ;;  %v7233_v48 = vpack.c.bf16 %v1125_v0, %v1113_v62  ;;  %v10387_v8 = vand.u32 4294901760, %v10386_v47  ;;  %v10389_v60 = vand.u32 4294901760, %v10388_v6  ;;  %v10392_v0 = vld [vmem:[#allocation108_spill] sm:$0xff] }
 0x590   :  { %10381 = vst [vmem:[#allocation128_spill] sm:$0xff] %v7212_v20  ;;  %v1136_v40 = vsub.f32 %v10382_v50, %v10383_v51  ;;  %v1148_v23 = vsub.f32 %v10384_v28, %v10385_v24  ;;  %v10391_v51 = vand.u32 4294901760, %v10390_v3  ;;  %v10480_v28 = vld [vmem:[#allocation169_spill] sm:$0xff]  ;;  %v2235_v41 = vand.u32 4294901760, %v10504_v45 }
 0x591   :  { %v1065_v29 = vsub.f32 %v7212_v20, %v9695_v34  ;;  %v1160_v12 = vsub.f32 %v10386_v47, %v10387_v8  ;;  %v1172_v4 = vsub.f32 %v10388_v6, %v10389_v60  ;;  %v10394_v60 = vld [vmem:[#allocation111_spill] sm:$0xff]  ;;  %4887 = vmatpush1.bf16.msra.mxu1 %v7146_v36  ;;  %v10478_v47 = vld [vmem:[#allocation168_spill] sm:$0xff] }
 0x592   :  { %v1137_v27 = vand.u32 4294901760, %v1136_v40  ;;  %v1149_v31 = vand.u32 4294901760, %v1148_v23  ;;  %5195 = vmatpush1.bf16.msra.mxu0 %v7096_v49  ;;  %v1184_v62 = vsub.f32 %v10390_v3, %v10391_v51  ;;  %v10393_v40 = vand.u32 4294901760, %v10392_v0  ;;  %4889 = vmatprep.subr.bf16.mxu1 %v7152_v53 }
 0x593   :  { %v1066_v17 = vand.u32 4294901760, %v1065_v29  ;;  %5197 = vmatprep.subr.bf16.mxu0 %v7106_v55  ;;  %v1161_v23 = vand.u32 4294901760, %v1160_v12  ;;  %v1173_v8 = vand.u32 4294901760, %v1172_v4  ;;  %v10395_v34 = vand.u32 4294901760, %v10394_v60  ;;  %v10398_v12 = vld [vmem:[#allocation115_spill] sm:$0xff] }
 0x594   :  { %v1196_v24 = vsub.f32 %v10392_v0, %v10393_v40  ;;  %v7251_v29 = vpack.c.bf16 %v1149_v31, %v1137_v27  ;;  %v1185_v51 = vand.u32 4294901760, %v1184_v62  ;;  %v10396_v40 = vld [vmem:[#allocation112_spill] sm:$0xff]  ;;  %v10399_v4 = vand.u32 4294901760, %v10398_v12 }
 0x595   :  { %1067 = vmatprep.mubr.f32.mxu1 %v1066_v17  ;;  %v1208_v49 = vsub.f32 %v10394_v60, %v10395_v34  ;;  %v10397_v56 = vand.u32 4294901760, %v10396_v40  ;;  %v7263_v27 = vpack.c.bf16 %v1173_v8, %v1161_v23  ;;  %4891 = vmatpush1.bf16.msra.mxu1 %v7158_v57  ;;  %v10400_v62 = vld [vmem:[#allocation116_spill] sm:$0xff] }
 0x596   :  { %5199 = vmatpush1.bf16.msra.mxu0 %v7112_v19  ;;  %v1197_v2 = vand.u32 4294901760, %v1196_v24  ;;  %v1232_v17 = vsub.f32 %v10398_v12, %v10399_v4  ;;  %v10401_v24 = vand.u32 4294901760, %v10400_v62  ;;  %4893 = vmatprep.subr.bf16.mxu1 %v7165_v22 }
 0x597   :  { %v1220_v55 = vsub.f32 %v10396_v40, %v10397_v56  ;;  %5201 = vmatprep.subr.bf16.mxu0 %v7118_v44  ;;  %v1209_v31 = vand.u32 4294901760, %v1208_v49  ;;  %v10402_v49 = vld [vmem:[#allocation119_spill] sm:$0xff]  ;;  %v10404_v44 = vld [vmem:[#allocation120_spill] sm:$0xff]  ;;  %v7421_v40 = vsub.f32 %v6338_v52, %v7099_v42  ;;  %v10469_v52 = vld [vmem:[#allocation93_spill] sm:$0xff] }
 0x598   :  { %v1244_v56 = vsub.f32 %v10400_v62, %v10401_v24  ;;  %v7275_v23 = vpack.c.bf16 %v1197_v2, %v1185_v51  ;;  %v10403_v8 = vand.u32 4294901760, %v10402_v49  ;;  %v10405_v19 = vand.u32 4294901760, %v10404_v44 }
 0x599   :  { %v1221_v34 = vand.u32 4294901760, %v1220_v55  ;;  %4895 = vmatpush1.bf16.msra.mxu1 %v7171_v54  ;;  %v1233_v55 = vand.u32 4294901760, %v1232_v17  ;;  %v10470_v20 = vand.u32 4294901760, %v10469_v52 }
 0x59a   :  { %5203 = vmatpush1.bf16.msra.mxu0 %v7134_v33  ;;  %v1256_v33 = vsub.f32 %v10402_v49, %v10403_v8  ;;  %v1245_v4 = vand.u32 4294901760, %v1244_v56  ;;  %v1268_v24 = vsub.f32 %v10404_v44, %v10405_v19  ;;  %4897 = vmatprep.subr.bf16.mxu1 %v7177_v5  ;;  %v10408_v56 = vld [vmem:[#allocation129_spill] sm:$0xff] }
 0x59b   :  { %5205 = vmatprep.subr.bf16.mxu0 %v7140_v38  ;;  %v7287_v2 = vpack.c.bf16 %v1221_v34, %v1209_v31  ;;  %v10406_v38 = vld [vmem:[#allocation126_spill] sm:$0xff]  ;;  %v10410_v31 = vld [vmem:[#allocation132_spill] sm:$0xff] }
 0x59c   :  { %v1257_v51 = vand.u32 4294901760, %v1256_v33  ;;  %v10407_v10 = vand.u32 4294901760, %v10406_v38  ;;  %v1269_v17 = vand.u32 4294901760, %v1268_v24  ;;  %v10411_v34 = vand.u32 4294901760, %v10410_v31  ;;  %v10412_v33 = vld [vmem:[#allocation133_spill] sm:$0xff]  ;;  %v10421_v31 = vld [vmem:[#allocation144_spill] sm:$0xff] }
 0x59d   :  { %4899 = vmatpush1.bf16.msra.mxu1 %v7185_v9  ;;  %v10422_v62 = vand.u32 4294901760, %v10421_v31  ;;  %10458 = vst [vmem:[#allocation133_spill] sm:$0xff] %v7421_v40 }
 0x59e   :  { %5207 = vmatpush1.bf16.msra.mxu0 %v7146_v36  ;;  %v1280_v8 = vsub.f32 %v10406_v38, %v10407_v10  ;;  %v10409_v36 = vand.u32 4294901760, %v10408_v56  ;;  %4901 = vmatprep.subr.bf16.mxu1 %v7191_v39  ;;  %v7305_v10 = vpack.c.bf16 %v1245_v4, %v1233_v55  ;;  %v10417_v38 = vld [vmem:[#allocation135_spill] sm:$0xff]  ;;  %v10423_v55 = vld [vmem:[#allocation150_spill] sm:$0xff] }
 0x59f   :  { %5209 = vmatprep.subr.bf16.mxu0 %v7152_v53  ;;  %v10413_v53 = vand.u32 4294901760, %v10412_v33  ;;  %v10418_v44 = vand.u32 4294901760, %v10417_v38  ;;  %v10424_v4 = vand.u32 4294901760, %v10423_v55  ;;  %v10425_v33 = vld [vmem:[#allocation152_spill] sm:$0xff] }
 0x5a0   :  { %v1292_v19 = vsub.f32 %v10408_v56, %v10409_v36  ;;  %v10419_v56 = vld [vmem:[#allocation143_spill] sm:$0xff] }
 0x5a1   :  { %v7303_v14 = vpack.c.bf16 %v10413_v53, %v10411_v34  ;;  %v1316_v36 = vsub.f32 %v10417_v38, %v10418_v44  ;;  %v7321_v53 = vsub.f32 %v10421_v31, %v10422_v62  ;;  %v7326_v34 = vsub.f32 %v10423_v55, %v10424_v4  ;;  %v10427_v38 = vld [vmem:[#allocation158_spill] sm:$0xff]  ;;  %4903 = vmatpush1.bf16.msra.mxu1 %v7197_v25 }
 0x5a2   :  { %5211 = vmatpush1.bf16.msra.mxu0 %v7158_v57  ;;  %v10415_v57 = vld [vmem:[#allocation134_spill] sm:$0xff]  ;;  %v10428_v12 = vand.u32 4294901760, %v10427_v38  ;;  %v1293_v62 = vand.u32 4294901760, %v1292_v19  ;;  %v10429_v31 = vand.u32 4294901760, %v6919_v11  ;;  %v10435_v19 = vand.u32 4294901760, %v6947_v58 }
 0x5a3   :  { %5213 = vmatprep.subr.bf16.mxu0 %v7165_v22  ;;  %10414 = vst [vmem:[#allocation136_spill] sm:$0xff] %v7303_v14  ;;  %v10416_v63 = vand.u32 4294901760, %v10415_v57  ;;  %v10420_v22 = vand.u32 4294901760, %v10419_v56  ;;  %4905 = vmatprep.subr.bf16.mxu1 %v7303_v14 }
 0x5a4   :  { %v7343_v4 = vsub.f32 %v6919_v11, %v10429_v31  ;;  %v10436_v31 = vand.u32 4294901760, %v6952_v32  ;;  %v1317_v11 = vand.u32 4294901760, %v1316_v36  ;;  %v10438_v36 = vld [vmem:[#allocation142_spill] sm:$0xff] }
 0x5a5   :  { %v1304_v24 = vsub.f32 %v10415_v57, %v10416_v63  ;;  %v7316_v49 = vsub.f32 %v10419_v56, %v10420_v22  ;;  %v1281_v63 = vand.u32 4294901760, %v1280_v8  ;;  %v10426_v57 = vand.u32 4294901760, %v10425_v33  ;;  %4907 = vmatpush1.bf16.msra.mxu1 %v7203_v18 }
 0x5a6   :  { %v7336_v22 = vsub.f32 %v10427_v38, %v10428_v12  ;;  %5215 = vmatpush1.bf16.msra.mxu0 %v7171_v54  ;;  %v7353_v38 = vpack.c.bf16 %v1269_v17, %v1257_v51  ;;  %v7358_v56 = vsub.f32 %v6947_v58, %v10435_v19  ;;  %v10439_v19 = vand.u32 4294901760, %v10438_v36 }
 0x5a7   :  { %v7331_v44 = vsub.f32 %v10425_v33, %v10426_v57  ;;  %5217 = vmatprep.subr.bf16.mxu0 %v7177_v5  ;;  %v10430_v57 = vld [vmem:[#allocation138_spill] sm:$0xff]  ;;  %v10432_v33 = vld [vmem:[#allocation141_spill] sm:$0xff]  ;;  %v1305_v54 = vand.u32 4294901760, %v1304_v24  ;;  %v7363_v5 = vsub.f32 %v6952_v32, %v10436_v31  ;;  %v10437_v24 = vand.u32 4294901760, %v6998_v13 }
 0x5a8   :  { %v10431_v8 = vand.u32 4294901760, %v10430_v57  ;;  %v10433_v55 = vand.u32 4294901760, %v10432_v33  ;;  %v1329_v57 = vand.u32 4294901760, %v7316_v49  ;;  %v1341_v33 = vand.u32 4294901760, %v7321_v53  ;;  %v10440_v49 = vld [vmem:[#allocation145_spill] sm:$0xff] }
 0x5a9   :  { %v10441_v31 = vand.u32 4294901760, %v10440_v49  ;;  %v10443_v51 = vand.u32 4294901760, %v7003_v16  ;;  %v7397_v49 = vpack.c.bf16 %v1293_v62, %v1281_v63  ;;  %v10451_v58 = vand.u32 4294901760, %v7050_v46 }
 0x5aa   :  { %v7351_v12 = vpack.c.bf16 %v10433_v55, %v10431_v8  ;;  %v7373_v8 = vsub.f32 %v6998_v13, %v10437_v24  ;;  %5219 = vmatpush1.bf16.msra.mxu0 %v7185_v9  ;;  %v10444_v24 = vld [vmem:[#allocation146_spill] sm:$0xff]  ;;  %v10446_v13 = vld [vmem:[#allocation149_spill] sm:$0xff]  ;;  %v10449_v55 = vand.u32 4294901760, %v7030_v59 }
 0x5ab   :  { %v7381_v53 = vpack.c.bf16 %v10441_v31, %v10439_v19  ;;  %v7387_v17 = vsub.f32 %v7003_v16, %v10443_v51  ;;  %5221 = vmatprep.subr.bf16.mxu0 %v7191_v39  ;;  %v10445_v9 = vand.u32 4294901760, %v10444_v24  ;;  %v10447_v32 = vand.u32 4294901760, %v10446_v13  ;;  %v10450_v39 = vld [vmem:[#allocation24_spill] sm:$0xff]  ;;  %v10457_v19 = vld [vmem:[#allocation26_spill] sm:$0xff] }
 0x5ac   :  { %10434 = vst [vmem:[#allocation137_spill] sm:$0xff] %v7351_v12  ;;  %4909 = vmatprep.subr.bf16.mxu1 %v7351_v12  ;;  %v7404_v51 = vsub.f32 %v7030_v59, %v10449_v55  ;;  %v2221_v16 = vand.u32 4294901760, %v10450_v39  ;;  %v7410_v24 = vsub.f32 %v7050_v46, %v10451_v58  ;;  %v2225_v31 = vand.u32 4294901760, %v10457_v19  ;;  %v10459_v58 = vld [vmem:[#allocation155_spill] sm:$0xff]  ;;  %v10461_v59 = vld [vmem:[#allocation156_spill] sm:$0xff] }
 0x5ad   :  { %10442 = vst [vmem:[#allocation88_spill] sm:$0xff] %v7381_v53  ;;  %v7395_v36 = vpack.c.bf16 %v10447_v32, %v10445_v9  ;;  %v10452_v32 = vld [vmem:[#allocation151_spill] sm:$0xff]  ;;  %v10454_v9 = vld [vmem:[#allocation154_spill] sm:$0xff]  ;;  %4911 = vmatpush1.bf16.msra.mxu1 %v7381_v53  ;;  %v10460_v46 = vand.u32 4294901760, %v10459_v58  ;;  %v1106_v55 = vsub.f32 %v10469_v52, %v10470_v20  ;;  %v10471_v58 = vld [vmem:[#allocation164_spill] sm:$0xff]  ;;  %v10479_v20 = vand.u32 4294901760, %v10478_v47 }
 0x5ae   :  { %v10453_v13 = vand.u32 4294901760, %v10452_v32  ;;  %v10455_v63 = vand.u32 4294901760, %v10454_v9  ;;  %5223 = vmatpush1.bf16.msra.mxu0 %v7197_v25  ;;  %v10462_v32 = vand.u32 4294901760, %v10461_v59  ;;  %v10472_v59 = vand.u32 4294901760, %v10471_v58 }
 0x5af   :  { %10448 = vst [vmem:[#allocation87_spill] sm:$0xff] %v7395_v36  ;;  %5225 = vmatprep.subr.bf16.mxu0 %v7303_v14  ;;  %4913 = vmatprep.subr.bf16.mxu1 %v7395_v36  ;;  %v10481_v25 = vand.u32 4294901760, %v10480_v28  ;;  %v10483_v14 = vld [vmem:[#allocation170_spill] sm:$0xff]  ;;  %v10485_v58 = vand.u32 4294901760, %v6982_v43  ;;  %v7475_v47 = vpack.c.bf16 %v2225_v31, %v2221_v16  ;;  %v1107_v43 = vand.u32 4294901760, %v1106_v55 }
 0x5b0   :  { %v7416_v62 = vpack.c.bf16 %v10455_v63, %v10453_v13  ;;  %v7430_v60 = vpack.c.bf16 %v10462_v32, %v10460_v46  ;;  %v10464_v13 = vld [vmem:[#allocation159_spill] sm:$0xff]  ;;  %v10466_v63 = vld [vmem:[#allocation160_spill] sm:$0xff]  ;;  %v10473_v46 = vld [vmem:[#allocation165_spill] sm:$0xff]  ;;  %v10484_v30 = vand.u32 4294901760, %v10483_v14 }
 0x5b1   :  { %v10465_v9 = vand.u32 4294901760, %v10464_v13  ;;  %v10467_v0 = vand.u32 4294901760, %v10466_v63  ;;  %v10474_v32 = vand.u32 4294901760, %v10473_v46  ;;  %v10476_v13 = vld [vmem:[#allocation94_spill] sm:$0xff]  ;;  %v7459_v50 = vpack.c.bf16 %v10481_v25, %v10479_v20  ;;  %10492 = vst [vmem:[#allocation24_spill] sm:$0xff] %v7475_v47 }
 0x5b2   :  { %10456 = vst [vmem:[#allocation132_spill] sm:$0xff] %v7416_v62  ;;  %10463 = vst [vmem:[#allocation138_spill] sm:$0xff] %v7430_v60  ;;  %v10477_v63 = vand.u32 4294901760, %v10476_v13  ;;  %v7465_v35 = vpack.c.bf16 %v10485_v58, %v10484_v30  ;;  %v7478_v25 = vsub.f32 %v10450_v39, %v2221_v16  ;;  %5227 = vmatpush1.bf16.msra.mxu0 %v7203_v18  ;;  %4915 = vmatpush1.bf16.msra.mxu1 %v7416_v62  ;;  %v10497_v39 = vld [vmem:[#allocation97_spill] sm:$0xff] }
 0x5b3   :  { %v7436_v3 = vpack.c.bf16 %v10467_v0, %v10465_v9  ;;  %v7448_v6 = vpack.c.bf16 %v10474_v32, %v10472_v59  ;;  %v7453_v9 = vpack.c.bf16 %v1317_v11, %v1305_v54  ;;  %10482 = vst [vmem:[#allocation145_spill] sm:$0xff] %v7459_v50  ;;  %v10487_v59 = vld [vmem:[#allocation23_spill] sm:$0xff]  ;;  %v10488_v32 = vld [vmem:[#allocation25_spill] sm:$0xff]  ;;  %v10490_v11 = vand.u32 4294901760, %v7006_v1  ;;  %v10496_v1 = vld [vmem:[#allocation30_spill] sm:$0xff]  ;;  %5229 = vmatprep.subr.bf16.mxu0 %v7351_v12 }
 0x5b4   :  { %v1118_v0 = vsub.f32 %v10476_v13, %v10477_v63  ;;  %10486 = vst [vmem:[#allocation146_spill] sm:$0xff] %v7465_v35  ;;  %v2223_v46 = vand.u32 4294901760, %v10487_v59  ;;  %v2227_v52 = vand.u32 4294901760, %v10488_v32  ;;  %v10489_v63 = vand.u32 4294901760, %v6987_v7  ;;  %10493 = vst [vmem:[#allocation151_spill] sm:$0xff] %v7478_v25  ;;  %v10495_v7 = vld [vmem:[#allocation28_spill] sm:$0xff]  ;;  %4917 = vmatprep.subr.bf16.mxu1 %v7430_v60 }
 0x5b5   :  { %10468 = vst [vmem:[#allocation141_spill] sm:$0xff] %v7436_v3  ;;  %10475 = vst [vmem:[#allocation142_spill] sm:$0xff] %v7448_v6  ;;  %v7484_v30 = vsub.f32 %v10457_v19, %v2225_v31  ;;  %v2229_v28 = vand.u32 4294901760, %v10495_v7  ;;  %v2233_v20 = vand.u32 4294901760, %v10496_v1  ;;  %v10498_v58 = vand.u32 4294901760, %v10497_v39  ;;  %v10503_v13 = vld [vmem:[#allocation27_spill] sm:$0xff] }
 0x5b6   :  { %v7473_v54 = vpack.c.bf16 %v10490_v11, %v10489_v63  ;;  %v1119_v16 = vand.u32 4294901760, %v1118_v0  ;;  %v10499_v11 = vld [vmem:[#allocation98_spill] sm:$0xff]  ;;  %v7496_v19 = vpack.c.bf16 %v1341_v33, %v1329_v57  ;;  %v7498_v31 = vpack.c.bf16 %v2227_v52, %v2223_v46  ;;  %5231 = vmatpush1.bf16.msra.mxu0 %v7381_v53  ;;  %4919 = vmatpush1.bf16.msra.mxu1 %v7436_v3 }
 0x5b7   :  { %10494 = vst [vmem:[#allocation154_spill] sm:$0xff] %v7484_v30  ;;  %v1130_v63 = vsub.f32 %v10497_v39, %v10498_v58  ;;  %v10500_v14 = vand.u32 4294901760, %v10499_v11  ;;  %v7501_v55 = vsub.f32 %v10487_v59, %v2223_v46  ;;  %v2231_v12 = vand.u32 4294901760, %v10503_v13  ;;  %v10507_v39 = vld [vmem:[#allocation32_spill] sm:$0xff]  ;;  %v10508_v57 = vld [vmem:[#allocation34_spill] sm:$0xff]  ;;  %5233 = vmatprep.subr.bf16.mxu0 %v7395_v36  ;;  %4921 = vmatprep.subr.bf16.mxu1 %v7448_v6 }
 0x5b8   :  { %10491 = vst [vmem:[#allocation149_spill] sm:$0xff] %v7473_v54  ;;  %10501 = vst [vmem:[#allocation26_spill] sm:$0xff] %v7498_v31  ;;  %v10505_v0 = vand.u32 4294901760, %v7421_v40  ;;  %v7509_v58 = vsub.f32 %v10488_v32, %v2227_v52  ;;  %v2241_v33 = vand.u32 4294901760, %v10508_v57  ;;  %v7516_v59 = vpack.c.bf16 %v2233_v20, %v2229_v28  ;;  %v10518_v36 = vld [vmem:[#allocation102_spill] sm:$0xff] }
 0x5b9   :  { %v1142_v18 = vsub.f32 %v10499_v11, %v10500_v14  ;;  %10502 = vst [vmem:[#allocation155_spill] sm:$0xff] %v7501_v55  ;;  %v2237_v14 = vand.u32 4294901760, %v10507_v39  ;;  %v7519_v46 = vsub.f32 %v10495_v7, %v2229_v28  ;;  %v4932_v52 = vpack.c.bf16 %v1119_v16, %v1107_v43  ;;  %v10516_v28 = vld [vmem:[#allocation101_spill] sm:$0xff] }
 0x5ba   :  { %v1071_v30 = vsub.f32 %v7421_v40, %v10505_v0  ;;  %10506 = vst [vmem:[#allocation156_spill] sm:$0xff] %v7509_v58  ;;  %10509 = vst [vmem:[#allocation159_spill] sm:$0xff] %v7516_v59  ;;  %v7522_v0 = vsub.f32 %v10496_v1, %v2233_v20  ;;  %v1131_v32 = vand.u32 4294901760, %v1130_v63  ;;  %v10512_v11 = vand.u32 4294901760, %v7326_v34  ;;  %v10523_v16 = vld [vmem:[#allocation33_spill] sm:$0xff]  ;;  %5235 = vmatpush1.bf16.msra.mxu0 %v7416_v62 }
 0x5bb   :  { %10510 = vst [vmem:[#allocation160_spill] sm:$0xff] %v7519_v46  ;;  %v1143_v40 = vand.u32 4294901760, %v1142_v18  ;;  %v10513_v53 = vand.u32 4294901760, %v7331_v44  ;;  %v7532_v55 = vpack.c.bf16 %v2235_v41, %v2231_v12  ;;  %v7535_v7 = vsub.f32 %v10503_v13, %v2231_v12  ;;  %v10522_v44 = vld [vmem:[#allocation31_spill] sm:$0xff]  ;;  %4923 = vmatpush1.bf16.msra.mxu1 %v7459_v50  ;;  %5237 = vmatprep.subr.bf16.mxu0 %v7430_v60 }
 0x5bc   :  { %10511 = vst [vmem:[#allocation164_spill] sm:$0xff] %v7522_v0  ;;  %v10517_v1 = vand.u32 4294901760, %v10516_v28  ;;  %v10519_v0 = vand.u32 4294901760, %v10518_v36  ;;  %v7544_v18 = vsub.f32 %v10504_v45, %v2235_v41  ;;  %v7546_v34 = vpack.c.bf16 %v2241_v33, %v2237_v14  ;;  %v10527_v41 = vld [vmem:[#allocation38_spill] sm:$0xff]  ;;  %4925 = vmatprep.subr.bf16.mxu1 %v7465_v35  ;;  %v10553_v46 = vld [vmem:[#allocation39_spill] sm:$0xff] }
 0x5bd   :  { %v7530_v58 = vpack.c.bf16 %v10513_v53, %v10512_v11  ;;  %10514 = vst [vmem:[#allocation165_spill] sm:$0xff] %v7532_v55  ;;  %10515 = vst [vmem:[#allocation168_spill] sm:$0xff] %v7535_v7  ;;  %v2239_v53 = vand.u32 4294901760, %v10522_v44  ;;  %v2243_v63 = vand.u32 4294901760, %v10523_v16  ;;  %v7553_v12 = vsub.f32 %v10507_v39, %v2237_v14  ;;  %v10526_v11 = vld [vmem:[#allocation36_spill] sm:$0xff] }
 0x5be   :  { %v1154_v20 = vsub.f32 %v10516_v28, %v10517_v1  ;;  %v1166_v43 = vsub.f32 %v10518_v36, %v10519_v0  ;;  %10520 = vst [vmem:[#allocation169_spill] sm:$0xff] %v7544_v18  ;;  %10521 = vst [vmem:[#allocation170_spill] sm:$0xff] %v7546_v34  ;;  %v7556_v13 = vsub.f32 %v10508_v57, %v2241_v33  ;;  %v2245_v0 = vand.u32 4294901760, %v10526_v11  ;;  %v10533_v18 = vld [vmem:[#allocation37_spill] sm:$0xff] }
 0x5bf   :  { %10524 = vst [vmem:[#allocation23_spill] sm:$0xff] %v7553_v12  ;;  %v2249_v45 = vand.u32 4294901760, %v10527_v41  ;;  %v1072_v1 = vand.u32 4294901760, %v1071_v30  ;;  %v4936_v36 = vpack.c.bf16 %v1143_v40, %v1131_v32  ;;  %v7563_v62 = vsub.f32 %v10522_v44, %v2239_v53  ;;  %v10536_v40 = vld [vmem:[#allocation105_spill] sm:$0xff]  ;;  %5239 = vmatpush1.bf16.msra.mxu0 %v7436_v3  ;;  %4927 = vmatpush1.bf16.msra.mxu1 %v7473_v54 }
 0x5c0   :  { %10525 = vst [vmem:[#allocation25_spill] sm:$0xff] %v7556_v13  ;;  %v10529_v28 = vand.u32 4294901760, %v7336_v22  ;;  %v10530_v39 = vand.u32 4294901760, %v7343_v4  ;;  %v1155_v57 = vand.u32 4294901760, %v1154_v20  ;;  %v1167_v33 = vand.u32 4294901760, %v1166_v43  ;;  %v10532_v13 = vld [vmem:[#allocation35_spill] sm:$0xff]  ;;  %5241 = vmatprep.subr.bf16.mxu0 %v7448_v6  ;;  %4929 = vmatprep.subr.bf16.mxu1 %v7214_v37 }
 0x5c1   :  { %10528 = vst [vmem:[#allocation28_spill] sm:$0xff] %v7563_v62  ;;  %v2247_v12 = vand.u32 4294901760, %v10532_v13  ;;  %v2251_v7 = vand.u32 4294901760, %v10533_v18  ;;  %v7573_v60 = vpack.c.bf16 %v2243_v63, %v2239_v53  ;;  %v7576_v30 = vsub.f32 %v10523_v16, %v2243_v63  ;;  %v10538_v22 = vld [vmem:[#allocation106_spill] sm:$0xff]  ;;  %v10542_v43 = vld [vmem:[#allocation40_spill] sm:$0xff] }
 0x5c2   :  { %v7569_v14 = vpack.c.bf16 %v10530_v39, %v10529_v28  ;;  %v10537_v32 = vand.u32 4294901760, %v10536_v40  ;;  %v10539_v62 = vand.u32 4294901760, %v10538_v22  ;;  %v7586_v28 = vpack.c.bf16 %v2249_v45, %v2245_v0  ;;  %v10543_v16 = vld [vmem:[#allocation42_spill] sm:$0xff]  ;;  %1073 = vmatmul.mubr.f32.vlgmr.msra.gmra.mrb[18].mxu1 %v1072_v1 }
 0x5c3   :  { %10534 = vst [vmem:[#allocation27_spill] sm:$0xff] %v7573_v60  ;;  %10535 = vst [vmem:[#allocation29_spill] sm:$0xff] %v7576_v30  ;;  %v7589_v20 = vsub.f32 %v10526_v11, %v2245_v0  ;;  %v2253_v53 = vand.u32 4294901760, %v10542_v43  ;;  %v2257_v63 = vand.u32 4294901760, %v10543_v16  ;;  %v1461_v39 = vand.u32 4294901760, %v7410_v24  ;;  %5243 = vmatpush1.bf16.msra.mxu0 %v7459_v50  ;;  %4931 = vmatpush1.bf16.msra.mxu1 %v7224_v15 }
 0x5c4   :  { %10531 = vst [vmem:[#allocation30_spill] sm:$0xff] %v7569_v14  ;;  %v1178_v44 = vsub.f32 %v10536_v40, %v10537_v32  ;;  %v1190_v4 = vsub.f32 %v10538_v22, %v10539_v62  ;;  %10540 = vst [vmem:[#allocation32_spill] sm:$0xff] %v7586_v28  ;;  %v10544_v62 = vld [vmem:[#allocation109_spill] sm:$0xff]  ;;  %v10546_v22 = vld [vmem:[#allocation110_spill] sm:$0xff]  ;;  %v10548_v11 = vand.u32 4294901760, %v7358_v56  ;;  %v10549_v0 = vand.u32 4294901760, %v7363_v5  ;;  %5245 = vmatprep.subr.bf16.mxu0 %v7465_v35 }
 0x5c5   :  { %10541 = vst [vmem:[#allocation34_spill] sm:$0xff] %v7589_v20  ;;  %v10545_v32 = vand.u32 4294901760, %v10544_v62  ;;  %v10547_v40 = vand.u32 4294901760, %v10546_v22  ;;  %v4940_v14 = vpack.c.bf16 %v1167_v33, %v1155_v57  ;;  %v7609_v24 = vsub.f32 %v10527_v41, %v2249_v45  ;;  %v10557_v45 = vld [vmem:[#allocation44_spill] sm:$0xff]  ;;  %4933 = vmatprep.subr.bf16.mxu1 %v4932_v52  ;;  %v10566_v52 = vld [vmem:[#allocation114_spill] sm:$0xff]  ;;  %1464 = vmatprep.mubr.f32.mxu1 %v10379_v21 }
 0x5c6   :  { %v7606_v20 = vpack.c.bf16 %v10549_v0, %v10548_v11  ;;  %v7611_v6 = vpack.c.bf16 %v2251_v7, %v2247_v12  ;;  %v7614_v37 = vsub.f32 %v10532_v13, %v2247_v12  ;;  %v7621_v5 = vsub.f32 %v10533_v18, %v2251_v7  ;;  %v10558_v12 = vld [vmem:[#allocation46_spill] sm:$0xff]  ;;  %v10562_v18 = vld [vmem:[#allocation43_spill] sm:$0xff]  ;;  %v10563_v0 = vld [vmem:[#allocation45_spill] sm:$0xff] }
 0x5c7   :  { %v1202_v3 = vsub.f32 %v10544_v62, %v10545_v32  ;;  %v1214_v30 = vsub.f32 %v10546_v22, %v10547_v40  ;;  %10550 = vst [vmem:[#allocation31_spill] sm:$0xff] %v7609_v24  ;;  %v1179_v32 = vand.u32 4294901760, %v1178_v44  ;;  %v1191_v62 = vand.u32 4294901760, %v1190_v4  ;;  %v10554_v22 = vld [vmem:[#allocation41_spill] sm:$0xff]  ;;  %5247 = vmatpush1.bf16.msra.mxu0 %v7473_v54  ;;  %4935 = vmatpush1.bf16.msra.mxu1 %v7233_v48 }
 0x5c8   :  { %10551 = vst [vmem:[#allocation33_spill] sm:$0xff] %v7611_v6  ;;  %10552 = vst [vmem:[#allocation36_spill] sm:$0xff] %v7614_v37  ;;  %v2255_v40 = vand.u32 4294901760, %v10553_v46  ;;  %v2259_v56 = vand.u32 4294901760, %v10554_v22  ;;  %v7623_v41 = vpack.c.bf16 %v2257_v63, %v2253_v53  ;;  %v2261_v57 = vand.u32 4294901760, %v10557_v45  ;;  %5249 = vmatprep.subr.bf16.mxu0 %v7475_v47  ;;  %4937 = vmatprep.subr.bf16.mxu1 %v4936_v36 }
 0x5c9   :  { %10555 = vst [vmem:[#allocation38_spill] sm:$0xff] %v7621_v5  ;;  %v2265_v13 = vand.u32 4294901760, %v10558_v12  ;;  %v7629_v1 = vsub.f32 %v10542_v43, %v2253_v53  ;;  %v1203_v33 = vand.u32 4294901760, %v1202_v3  ;;  %v1215_v44 = vand.u32 4294901760, %v1214_v30  ;;  %v10564_v5 = vld [vmem:[#allocation113_spill] sm:$0xff] }
 0x5ca   :  { %10556 = vst [vmem:[#allocation35_spill] sm:$0xff] %v7623_v41  ;;  %v10560_v4 = vand.u32 4294901760, %v7373_v8  ;;  %v10561_v15 = vand.u32 4294901760, %v7387_v17  ;;  %v2263_v11 = vand.u32 4294901760, %v10562_v18  ;;  %v2267_v50 = vand.u32 4294901760, %v10563_v0  ;;  %2212 = vmatmul.mubr.f32.vlgmr.msra.gmra.mrb[0].mxu0 %v7099_v42 }
 0x5cb   :  { %10559 = vst [vmem:[#allocation37_spill] sm:$0xff] %v7629_v1  ;;  %v10565_v37 = vand.u32 4294901760, %v10564_v5  ;;  %v10567_v24 = vand.u32 4294901760, %v10566_v52  ;;  %v4944_v3 = vpack.c.bf16 %v1191_v62, %v1179_v32  ;;  %v7647_v8 = vsub.f32 %v10543_v16, %v2257_v63  ;;  %v10576_v62 = vld [vmem:[#allocation50_spill] sm:$0xff]  ;;  %5251 = vmatpush1.bf16.msra.mxu0 %v7498_v31  ;;  %4939 = vmatpush1.bf16.msra.mxu1 %v7251_v29  ;;  %v10591_v29 = vld [vmem:[#allocation52_spill] sm:$0xff] }
 0x5cc   :  { %v7635_v7 = vpack.c.bf16 %v10561_v15, %v10560_v4  ;;  %v7649_v17 = vpack.c.bf16 %v2259_v56, %v2255_v40  ;;  %v7652_v30 = vsub.f32 %v10553_v46, %v2255_v40  ;;  %v7657_v53 = vsub.f32 %v10554_v22, %v2259_v56  ;;  %v10575_v46 = vld [vmem:[#allocation48_spill] sm:$0xff]  ;;  %v10582_v15 = vld [vmem:[#allocation117_spill] sm:$0xff]  ;;  %5253 = vmatprep.subr.bf16.mxu0 %v7516_v59 }
 0x5cd   :  { %v1226_v35 = vsub.f32 %v10564_v5, %v10565_v37  ;;  %v1238_v43 = vsub.f32 %v10566_v52, %v10567_v24  ;;  %10568 = vst [vmem:[#allocation40_spill] sm:$0xff] %v7647_v8  ;;  %v7659_v37 = vpack.c.bf16 %v2265_v13, %v2261_v57  ;;  %v7662_v21 = vsub.f32 %v10557_v45, %v2261_v57  ;;  %v10580_v57 = vld [vmem:[#allocation47_spill] sm:$0xff]  ;;  %v10598_v59 = vld [vmem:[#allocation125_spill] sm:$0xff] }
 0x5ce   :  { %10569 = vst [vmem:[#allocation42_spill] sm:$0xff] %v7649_v17  ;;  %10570 = vst [vmem:[#allocation39_spill] sm:$0xff] %v7652_v30  ;;  %v7666_v16 = vsub.f32 %v10558_v12, %v2265_v13  ;;  %v2269_v63 = vand.u32 4294901760, %v10575_v46  ;;  %v2273_v24 = vand.u32 4294901760, %v10576_v62  ;;  %v10577_v48 = vand.u32 4294901760, %v7404_v51  ;;  %v10581_v13 = vld [vmem:[#allocation49_spill] sm:$0xff]  ;;  %4941 = vmatprep.subr.bf16.mxu1 %v4940_v14 }
 0x5cf   :  { %10571 = vst [vmem:[#allocation41_spill] sm:$0xff] %v7657_v53  ;;  %10572 = vst [vmem:[#allocation44_spill] sm:$0xff] %v7659_v37  ;;  %v4948_v22 = vpack.c.bf16 %v1215_v44, %v1203_v33  ;;  %v7674_v40 = vpack.c.bf16 %v2267_v50, %v2263_v11  ;;  %v1227_v56 = vand.u32 4294901760, %v1226_v35  ;;  %v1239_v45 = vand.u32 4294901760, %v1238_v43  ;;  %5255 = vmatpush1.bf16.msra.mxu0 %v7532_v55  ;;  %v10606_v55 = vld [vmem:[#allocation58_spill] sm:$0xff] }
 0x5d0   :  { %10573 = vst [vmem:[#allocation46_spill] sm:$0xff] %v7662_v21  ;;  %10574 = vst [vmem:[#allocation43_spill] sm:$0xff] %v7666_v16  ;;  %v7672_v32 = vpack.c.bf16 %v1461_v39, %v10577_v48  ;;  %v7678_v36 = vsub.f32 %v10562_v18, %v2263_v11  ;;  %v2271_v12 = vand.u32 4294901760, %v10580_v57  ;;  %v2275_v4 = vand.u32 4294901760, %v10581_v13  ;;  %v10585_v39 = vld [vmem:[#allocation118_spill] sm:$0xff]  ;;  %v10587_v18 = vld [vmem:[#allocation21_spill] sm:$0xff]  ;;  %4943 = vmatpush1.bf16.msra.mxu1 %v7263_v27 }
 0x5d1   :  { %10578 = vst [vmem:[#allocation45_spill] sm:$0xff] %v7674_v40  ;;  %v10583_v47 = vand.u32 4294901760, %v10582_v15  ;;  %v7688_v35 = vsub.f32 %v10563_v0, %v2267_v50  ;;  %v10586_v33 = vand.u32 4294901760, %v10585_v39  ;;  %v10588_v11 = vld [vmem:[#allocation22_spill] sm:$0xff]  ;;  %v7698_v48 = vpack.c.bf16 %v2273_v24, %v2269_v63  ;;  %5257 = vmatprep.subr.bf16.mxu0 %v7546_v34  ;;  %4945 = vmatprep.subr.bf16.mxu1 %v4944_v3  ;;  %v10610_v34 = vld [vmem:[#allocation55_spill] sm:$0xff] }
 0x5d2   :  { %10579 = vst [vmem:[#allocation48_spill] sm:$0xff] %v7678_v36  ;;  %v7695_v43 = vrot.slane %v10588_v11, %v10587_v18  ;;  %v2277_v31 = vand.u32 4294901760, %v10591_v29  ;;  %v10592_v50 = vld [vmem:[#allocation54_spill] sm:$0xff]  ;;  %v4952_v54 = vpack.c.bf16 %v1239_v45, %v1227_v56  ;;  %v7713_v11 = vpack.c.bf16 %v2275_v4, %v2271_v12 }
 0x5d3   :  { %v1250_v51 = vsub.f32 %v10582_v15, %v10583_v47  ;;  %10584 = vst [vmem:[#allocation50_spill] sm:$0xff] %v7688_v35  ;;  %v1262_v44 = vsub.f32 %v10585_v39, %v10586_v33  ;;  %10589 = vst [vmem:[#allocation47_spill] sm:$0xff] %v7698_v48  ;;  %v7701_v47 = vsub.f32 %v10575_v46, %v2269_v63  ;;  %v2281_v0 = vand.u32 4294901760, %v10592_v50  ;;  %v10594_v33 = vld [vmem:[#allocation121_spill] sm:$0xff] }
 0x5d4   :  { %v7706_v15 = vsub.f32 %v10576_v62, %v2273_v24  ;;  %v10595_v39 = vand.u32 4294901760, %v10594_v33  ;;  %v2218_v14 = vcombine.high %v7695_v43, %v7695_v43  ;;  %10596 = vst [vmem:[#allocation22_spill] sm:$0xff] %v7713_v11  ;;  %v7716_v46 = vsub.f32 %v10580_v57, %v2271_v12  ;;  %v10600_v24 = vld [vmem:[#allocation51_spill] sm:$0xff]  ;;  %5259 = vmatpush1.bf16.msra.mxu0 %v7573_v60 }
 0x5d5   :  { %10590 = vst [vmem:[#allocation49_spill] sm:$0xff] %v7701_v47  ;;  %v1251_v63 = vand.u32 4294901760, %v1250_v51  ;;  %v10599_v52 = vand.u32 4294901760, %v10598_v59  ;;  %v1263_v62 = vand.u32 4294901760, %v1262_v44  ;;  %v2279_v45 = vand.u32 4294901760, %v10600_v24  ;;  %v10612_v47 = vld [vmem:[#allocation130_spill] sm:$0xff]  ;;  %4947 = vmatpush1.bf16.msra.mxu1 %v7275_v23  ;;  %5261 = vmatprep.subr.bf16.mxu0 %v7586_v28 }
 0x5d6   :  { %10593 = vst [vmem:[#allocation21_spill] sm:$0xff] %v7706_v15  ;;  %v1274_v18 = vsub.f32 %v10594_v33, %v10595_v39  ;;  %10597 = vst [vmem:[#allocation52_spill] sm:$0xff] %v7716_v46  ;;  %v10601_v39 = vld [vmem:[#allocation53_spill] sm:$0xff]  ;;  %v7725_v5 = vand.u32 4294901760, %v2218_v14  ;;  %v7729_v57 = vsub.f32 %v10581_v13, %v2275_v4  ;;  %v7731_v12 = vpack.c.bf16 %v2281_v0, %v2277_v31 }
 0x5d7   :  { %v1286_v56 = vsub.f32 %v10598_v59, %v10599_v52  ;;  %v2283_v33 = vand.u32 4294901760, %v10601_v39  ;;  %v10605_v52 = vld [vmem:[#allocation56_spill] sm:$0xff]  ;;  %v2289_v59 = vand.u32 4294901760, %v10606_v55  ;;  %v7736_v27 = vsub.f32 %v10591_v29, %v2277_v31  ;;  %v10611_v4 = vld [vmem:[#allocation57_spill] sm:$0xff]  ;;  %4949 = vmatprep.subr.bf16.mxu1 %v4948_v22 }
 0x5d8   :  { %10602 = vst [vmem:[#allocation54_spill] sm:$0xff] %v7725_v5  ;;  %10603 = vst [vmem:[#allocation51_spill] sm:$0xff] %v7729_v57  ;;  %v2285_v51 = vand.u32 4294901760, %v10605_v52  ;;  %v7739_v44 = vsub.f32 %v10592_v50, %v2281_v0  ;;  %v1275_v46 = vand.u32 4294901760, %v1274_v18  ;;  %v7742_v15 = vsub.f32 %v2218_v14, %v7725_v5  ;;  %v10615_v50 = vld [vmem:[#allocation131_spill] sm:$0xff]  ;;  %5263 = vmatpush1.bf16.msra.mxu0 %v7611_v6 }
 0x5d9   :  { %10604 = vst [vmem:[#allocation53_spill] sm:$0xff] %v7731_v12  ;;  %10607 = vst [vmem:[#allocation56_spill] sm:$0xff] %v7736_v27  ;;  %v1287_v3 = vand.u32 4294901760, %v1286_v56  ;;  %v2287_v13 = vand.u32 4294901760, %v10610_v34  ;;  %v2291_v57 = vand.u32 4294901760, %v10611_v4  ;;  %v10613_v35 = vand.u32 4294901760, %v10612_v47  ;;  %4951 = vmatpush1.bf16.msra.mxu1 %v7287_v2  ;;  %5265 = vmatprep.subr.bf16.mxu0 %v7623_v41 }
 0x5da   :  { %10608 = vst [vmem:[#allocation58_spill] sm:$0xff] %v7739_v44  ;;  %10609 = vst [vmem:[#allocation196_spill] sm:$0xff] %v7742_v15  ;;  %v4956_v31 = vpack.c.bf16 %v1263_v62, %v1251_v63  ;;  %v7751_v29 = vpack.c.bf16 %v2283_v33, %v2279_v45  ;;  %v10616_v0 = vand.u32 4294901760, %v10615_v50  ;;  %v9819_v14 = vand.u32 4294901760, %v7742_v15  ;;  %v10621_v63 = vld [vmem:[#allocation60_spill] sm:$0xff]  ;;  %4953 = vmatprep.subr.bf16.mxu1 %v4952_v54  ;;  %v10635_v41 = vld [vmem:[#allocation66_spill] sm:$0xff] }
 0x5db   :  { %v1298_v36 = vsub.f32 %v10612_v47, %v10613_v35  ;;  %v7759_v56 = vsub.f32 %v10600_v24, %v2279_v45  ;;  %v7762_v35 = vsub.f32 %v10601_v39, %v2283_v33  ;;  %v7764_v60 = vpack.c.bf16 %v2289_v59, %v2285_v51  ;;  %v10622_v47 = vld [vmem:[#allocation62_spill] sm:$0xff] }
 0x5dc   :  { %10614 = vst [vmem:[#allocation55_spill] sm:$0xff] %v7751_v29  ;;  %v1310_v18 = vsub.f32 %v10615_v50, %v10616_v0  ;;  %v7767_v23 = vsub.f32 %v10605_v52, %v2285_v51  ;;  %v2293_v62 = vand.u32 4294901760, %v10621_v63  ;;  %v2297_v0 = vand.u32 4294901760, %v10622_v47  ;;  %v10625_v52 = vld [vmem:[#allocation59_spill] sm:$0xff]  ;;  %v10626_v50 = vld [vmem:[#allocation61_spill] sm:$0xff]  ;;  %5267 = vmatpush1.bf16.msra.mxu0 %v7649_v17 }
 0x5dd   :  { %10617 = vst [vmem:[#allocation57_spill] sm:$0xff] %v7759_v56  ;;  %10618 = vst [vmem:[#allocation197_spill] sm:$0xff] %v7762_v35  ;;  %v2352_v28 = vsub.f32 %v7742_v15, %v9819_v14  ;;  %v4960_v22 = vpack.c.bf16 %v1287_v3, %v1275_v46  ;;  %v7775_v24 = vsub.f32 %v10606_v55, %v2289_v59  ;;  %v1299_v33 = vand.u32 4294901760, %v1298_v36  ;;  %v10628_v55 = vld [vmem:[#allocation139_spill] sm:$0xff]  ;;  %v10630_v3 = vld [vmem:[#allocation140_spill] sm:$0xff] }
 0x5de   :  { %10619 = vst [vmem:[#allocation198_spill] sm:$0xff] %v7764_v60  ;;  %10620 = vst [vmem:[#allocation199_spill] sm:$0xff] %v7767_v23  ;;  %v7777_v45 = vpack.c.bf16 %v2291_v57, %v2287_v13  ;;  %v1311_v39 = vand.u32 4294901760, %v1310_v18  ;;  %v2295_v51 = vand.u32 4294901760, %v10625_v52  ;;  %v2299_v23 = vand.u32 4294901760, %v10626_v50  ;;  %4955 = vmatpush1.bf16.msra.mxu1 %v7305_v10  ;;  %5269 = vmatprep.subr.bf16.mxu0 %v7659_v37  ;;  %v10648_v10 = vld [vmem:[#allocation68_spill] sm:$0xff] }
 0x5df   :  { %10623 = vst [vmem:[#allocation60_spill] sm:$0xff] %v7775_v24  ;;  %v2353_v35 = vand.u32 4294901760, %v2352_v28  ;;  %v7785_v46 = vsub.f32 %v10610_v34, %v2287_v13  ;;  %v10629_v59 = vand.u32 4294901760, %v10628_v55  ;;  %v10631_v14 = vand.u32 4294901760, %v10630_v3  ;;  %v10634_v28 = vld [vmem:[#allocation64_spill] sm:$0xff]  ;;  %4957 = vmatprep.subr.bf16.mxu1 %v4956_v31 }
 0x5e0   :  { %10624 = vst [vmem:[#allocation62_spill] sm:$0xff] %v7777_v45  ;;  %v7794_v18 = vsub.f32 %v10611_v4, %v2291_v57  ;;  %v7796_v6 = vpack.c.bf16 %v2297_v0, %v2293_v62  ;;  %v2301_v15 = vand.u32 4294901760, %v10634_v28  ;;  %v2305_v54 = vand.u32 4294901760, %v10635_v41  ;;  %5271 = vmatpush1.bf16.msra.mxu0 %v7674_v40  ;;  %v10662_v40 = vld [vmem:[#allocation72_spill] sm:$0xff] }
 0x5e1   :  { %10627 = vst [vmem:[#allocation59_spill] sm:$0xff] %v7785_v46  ;;  %v1322_v36 = vsub.f32 %v10628_v55, %v10629_v59  ;;  %v1334_v2 = vsub.f32 %v10630_v3, %v10631_v14  ;;  %2354 = vmatprep.mubr.f32.mxu0 %v2353_v35  ;;  %v7801_v34 = vsub.f32 %v10621_v63, %v2293_v62  ;;  %v10638_v59 = vld [vmem:[#allocation147_spill] sm:$0xff]  ;;  %v10640_v3 = vld [vmem:[#allocation148_spill] sm:$0xff]  ;;  %v10656_v46 = vld [vmem:[#allocation157_spill] sm:$0xff] }
 0x5e2   :  { %10632 = vst [vmem:[#allocation61_spill] sm:$0xff] %v7794_v18  ;;  %10633 = vst [vmem:[#allocation200_spill] sm:$0xff] %v7796_v6  ;;  %v7804_v13 = vsub.f32 %v10622_v47, %v2297_v0  ;;  %v10639_v55 = vand.u32 4294901760, %v10638_v59  ;;  %v10641_v57 = vand.u32 4294901760, %v10640_v3  ;;  %v4964_v18 = vpack.c.bf16 %v1311_v39, %v1299_v33  ;;  %v10644_v0 = vld [vmem:[#allocation63_spill] sm:$0xff]  ;;  %v10649_v39 = vld [vmem:[#allocation70_spill] sm:$0xff]  ;;  %4959 = vmatpush1.bf16.msra.mxu1 %v7353_v38 }
 0x5e3   :  { %10636 = vst [vmem:[#allocation64_spill] sm:$0xff] %v7801_v34  ;;  %v7814_v35 = vpack.c.bf16 %v2299_v23, %v2295_v51  ;;  %v7817_v63 = vsub.f32 %v10625_v52, %v2295_v51  ;;  %v1323_v47 = vand.u32 4294901760, %v1322_v36  ;;  %v1335_v62 = vand.u32 4294901760, %v1334_v2  ;;  %v10653_v2 = vld [vmem:[#allocation69_spill] sm:$0xff]  ;;  %5273 = vmatprep.subr.bf16.mxu0 %v7698_v48  ;;  %4961 = vmatprep.subr.bf16.mxu1 %v4960_v22  ;;  %v10777_v24 = vld [vmem:[#allocation128_spill] sm:$0xff] }
 0x5e4   :  { %10637 = vst [vmem:[#allocation66_spill] sm:$0xff] %v7804_v13  ;;  %v1346_v14 = vsub.f32 %v10638_v59, %v10639_v55  ;;  %v1358_v4 = vsub.f32 %v10640_v3, %v10641_v57  ;;  %v2303_v55 = vand.u32 4294901760, %v10644_v0  ;;  %v10645_v59 = vld [vmem:[#allocation65_spill] sm:$0xff]  ;;  %v7823_v57 = vsub.f32 %v10626_v50, %v2299_v23  ;;  %v10652_v50 = vld [vmem:[#allocation67_spill] sm:$0xff]  ;;  %5275 = vmatpush1.bf16.msra.mxu0 %v7713_v11 }
 0x5e5   :  { %10642 = vst [vmem:[#allocation201_spill] sm:$0xff] %v7814_v35  ;;  %10643 = vst [vmem:[#allocation202_spill] sm:$0xff] %v7817_v63  ;;  %v2307_v13 = vand.u32 4294901760, %v10645_v59  ;;  %v7825_v17 = vpack.c.bf16 %v2305_v54, %v2301_v15  ;;  %v2309_v33 = vand.u32 4294901760, %v10648_v10  ;;  %v2313_v3 = vand.u32 4294901760, %v10649_v39  ;;  %5277 = vmatprep.subr.bf16.mxu0 %v7731_v12 }
 0x5e6   :  { %10646 = vst [vmem:[#allocation63_spill] sm:$0xff] %v7823_v57  ;;  %v7830_v52 = vsub.f32 %v10634_v28, %v2301_v15  ;;  %v7833_v31 = vsub.f32 %v10635_v41, %v2305_v54  ;;  %v1347_v51 = vand.u32 4294901760, %v1346_v14  ;;  %v1359_v36 = vand.u32 4294901760, %v1358_v4  ;;  %v10654_v57 = vld [vmem:[#allocation153_spill] sm:$0xff]  ;;  %4963 = vmatpush1.bf16.msra.mxu1 %v7397_v49 }
 0x5e7   :  { %10647 = vst [vmem:[#allocation65_spill] sm:$0xff] %v7825_v17  ;;  %v2311_v23 = vand.u32 4294901760, %v10652_v50  ;;  %v2315_v37 = vand.u32 4294901760, %v10653_v2  ;;  %v10655_v63 = vand.u32 4294901760, %v10654_v57  ;;  %v10657_v15 = vand.u32 4294901760, %v10656_v46  ;;  %4965 = vmatprep.subr.bf16.mxu1 %v4964_v18 }
 0x5e8   :  { %10650 = vst [vmem:[#allocation68_spill] sm:$0xff] %v7830_v52  ;;  %10651 = vst [vmem:[#allocation70_spill] sm:$0xff] %v7833_v31  ;;  %v4968_v41 = vpack.c.bf16 %v1335_v62, %v1323_v47  ;;  %v7846_v54 = vpack.c.bf16 %v2307_v13, %v2303_v55  ;;  %v7849_v38 = vsub.f32 %v10644_v0, %v2303_v55  ;;  %v10666_v47 = vld [vmem:[#allocation162_spill] sm:$0xff]  ;;  %v10668_v55 = vld [vmem:[#allocation163_spill] sm:$0xff]  ;;  %5279 = vmatpush1.bf16.msra.mxu0 %v7751_v29 }
 0x5e9   :  { %v1370_v34 = vsub.f32 %v10654_v57, %v10655_v63  ;;  %v1382_v28 = vsub.f32 %v10656_v46, %v10657_v15  ;;  %v7852_v14 = vsub.f32 %v10645_v59, %v2307_v13  ;;  %v7854_v4 = vpack.c.bf16 %v2313_v3, %v2309_v33  ;;  %v10663_v57 = vld [vmem:[#allocation74_spill] sm:$0xff]  ;;  %5281 = vmatprep.subr.bf16.mxu0 %v7764_v60 }
 0x5ea   :  { %10658 = vst [vmem:[#allocation67_spill] sm:$0xff] %v7846_v54  ;;  %10659 = vst [vmem:[#allocation69_spill] sm:$0xff] %v7849_v38  ;;  %v2317_v63 = vand.u32 4294901760, %v10662_v40  ;;  %v2321_v31 = vand.u32 4294901760, %v10663_v57  ;;  %v7859_v15 = vsub.f32 %v10648_v10, %v2309_v33  ;;  %v7862_v22 = vsub.f32 %v10649_v39, %v2313_v3  ;;  %4967 = vmatpush1.bf16.msra.mxu1 %v7453_v9  ;;  %v10773_v38 = vld [vmem:[#allocation106_spill] sm:$0xff] }
 0x5eb   :  { %10660 = vst [vmem:[#allocation203_spill] sm:$0xff] %v7852_v14  ;;  %10661 = vst [vmem:[#allocation204_spill] sm:$0xff] %v7854_v4  ;;  %v10667_v62 = vand.u32 4294901760, %v10666_v47  ;;  %v10669_v48 = vand.u32 4294901760, %v10668_v55  ;;  %v4972_v59 = vpack.c.bf16 %v1359_v36, %v1347_v51  ;;  %v7872_v46 = vpack.c.bf16 %v2315_v37, %v2311_v23  ;;  %v10678_v36 = vld [vmem:[#allocation78_spill] sm:$0xff]  ;;  %4969 = vmatprep.subr.bf16.mxu1 %v4968_v41 }
 0x5ec   :  { %10664 = vst [vmem:[#allocation72_spill] sm:$0xff] %v7859_v15  ;;  %10665 = vst [vmem:[#allocation74_spill] sm:$0xff] %v7862_v22  ;;  %v1371_v10 = vand.u32 4294901760, %v1370_v34  ;;  %v1383_v33 = vand.u32 4294901760, %v1382_v28  ;;  %v7876_v3 = vsub.f32 %v10652_v50, %v2311_v23  ;;  %v7879_v39 = vsub.f32 %v10653_v2, %v2315_v37  ;;  %v10677_v34 = vld [vmem:[#allocation76_spill] sm:$0xff]  ;;  %v10679_v50 = vld [vmem:[#allocation171_spill] sm:$0xff]  ;;  %5283 = vmatpush1.bf16.msra.mxu0 %v7777_v45 }
 0x5ed   :  { %v1394_v0 = vsub.f32 %v10666_v47, %v10667_v62  ;;  %v1406_v13 = vsub.f32 %v10668_v55, %v10669_v48  ;;  %10670 = vst [vmem:[#allocation205_spill] sm:$0xff] %v7872_v46  ;;  %v10673_v62 = vld [vmem:[#allocation71_spill] sm:$0xff]  ;;  %v10674_v55 = vld [vmem:[#allocation73_spill] sm:$0xff]  ;;  %v7883_v47 = vpack.c.bf16 %v2321_v31, %v2317_v63  ;;  %v7886_v49 = vsub.f32 %v10662_v40, %v2317_v63  ;;  %v10681_v2 = vld [vmem:[#allocation172_spill] sm:$0xff] }
 0x5ee   :  { %10671 = vst [vmem:[#allocation206_spill] sm:$0xff] %v7876_v3  ;;  %10672 = vst [vmem:[#allocation207_spill] sm:$0xff] %v7879_v39  ;;  %v2319_v48 = vand.u32 4294901760, %v10673_v62  ;;  %v2323_v11 = vand.u32 4294901760, %v10674_v55  ;;  %v2325_v51 = vand.u32 4294901760, %v10677_v34  ;;  %v2329_v28 = vand.u32 4294901760, %v10678_v36  ;;  %4971 = vmatpush1.bf16.msra.mxu1 %v7496_v19  ;;  %5285 = vmatprep.subr.bf16.mxu0 %v7796_v6 }
 0x5ef   :  { %10675 = vst [vmem:[#allocation71_spill] sm:$0xff] %v7883_v47  ;;  %10676 = vst [vmem:[#allocation73_spill] sm:$0xff] %v7886_v49  ;;  %v1395_v18 = vand.u32 4294901760, %v1394_v0  ;;  %v1407_v12 = vand.u32 4294901760, %v1406_v13  ;;  %v10680_v23 = vand.u32 4294901760, %v10679_v50  ;;  %v10682_v39 = vand.u32 4294901760, %v10681_v2  ;;  %4973 = vmatprep.subr.bf16.mxu1 %v4972_v59 }
 0x5f0   :  { %v4976_v40 = vpack.c.bf16 %v1383_v33, %v1371_v10  ;;  %v7899_v63 = vsub.f32 %v10663_v57, %v2321_v31  ;;  %v10684_v49 = vld [vmem:[#allocation75_spill] sm:$0xff]  ;;  %v10685_v0 = vld [vmem:[#allocation77_spill] sm:$0xff]  ;;  %v7912_v9 = vpack.c.bf16 %v2329_v28, %v2325_v51  ;;  %v7915_v57 = vsub.f32 %v10677_v34, %v2325_v51  ;;  %v10691_v31 = vld [vmem:[#allocation80_spill] sm:$0xff]  ;;  %5287 = vmatpush1.bf16.msra.mxu0 %v7814_v35 }
 0x5f1   :  { %v1418_v37 = vsub.f32 %v10679_v50, %v10680_v23  ;;  %v1430_v3 = vsub.f32 %v10681_v2, %v10682_v39  ;;  %v2327_v22 = vand.u32 4294901760, %v10684_v49  ;;  %v2331_v13 = vand.u32 4294901760, %v10685_v0  ;;  %v10692_v33 = vld [vmem:[#allocation82_spill] sm:$0xff]  ;;  %5289 = vmatprep.subr.bf16.mxu0 %v7825_v17  ;;  %v10758_v15 = vld [vmem:[#allocation36_spill] sm:$0xff] }
 0x5f2   :  { %10683 = vst [vmem:[#allocation76_spill] sm:$0xff] %v7899_v63  ;;  %v7904_v23 = vpack.c.bf16 %v2323_v11, %v2319_v48  ;;  %v7907_v50 = vsub.f32 %v10673_v62, %v2319_v48  ;;  %v7910_v39 = vsub.f32 %v10674_v55, %v2323_v11  ;;  %10689 = vst [vmem:[#allocation208_spill] sm:$0xff] %v7912_v9  ;;  %v2333_v10 = vand.u32 4294901760, %v10691_v31  ;;  %v10695_v55 = vld [vmem:[#allocation79_spill] sm:$0xff]  ;;  %v10696_v48 = vld [vmem:[#allocation81_spill] sm:$0xff] }
 0x5f3   :  { %10690 = vst [vmem:[#allocation209_spill] sm:$0xff] %v7915_v57  ;;  %v2337_v29 = vand.u32 4294901760, %v10692_v33  ;;  %v4980_v2 = vpack.c.bf16 %v1407_v12, %v1395_v18  ;;  %v7920_v41 = vsub.f32 %v10678_v36, %v2329_v28  ;;  %v1419_v60 = vand.u32 4294901760, %v1418_v37  ;;  %v10705_v6 = vld [vmem:[#allocation86_spill] sm:$0xff]  ;;  %4975 = vmatpush1.bf16.msra.mxu1 %v7530_v58  ;;  %v10713_v58 = vld [vmem:[#allocation156_spill] sm:$0xff] }
 0x5f4   :  { %10686 = vst [vmem:[#allocation78_spill] sm:$0xff] %v7904_v23  ;;  %10687 = vst [vmem:[#allocation75_spill] sm:$0xff] %v7907_v50  ;;  %v1431_v63 = vand.u32 4294901760, %v1430_v3  ;;  %v7924_v11 = vpack.c.bf16 %v2331_v13, %v2327_v22  ;;  %v2335_v62 = vand.u32 4294901760, %v10695_v55  ;;  %v2339_v34 = vand.u32 4294901760, %v10696_v48  ;;  %v10707_v45 = vld [vmem:[#allocation154_spill] sm:$0xff]  ;;  %4977 = vmatprep.subr.bf16.mxu1 %v4976_v40  ;;  %5291 = vmatpush1.bf16.msra.mxu0 %v7846_v54 }
 0x5f5   :  { %10688 = vst [vmem:[#allocation77_spill] sm:$0xff] %v7910_v39  ;;  %10693 = vst [vmem:[#allocation80_spill] sm:$0xff] %v7920_v41  ;;  %v10697_v51 = vand.u32 4294901760, %v7011_v61  ;;  %v7933_v12 = vsub.f32 %v10684_v49, %v2327_v22  ;;  %v7936_v3 = vsub.f32 %v10685_v0, %v2331_v13  ;;  %v10700_v19 = vand.u32 4294901760, %v7023_v26  ;;  %v10721_v13 = vld [vmem:[#allocation169_spill] sm:$0xff]  ;;  %5293 = vmatprep.subr.bf16.mxu0 %v7854_v4  ;;  %v10755_v39 = vld [vmem:[#allocation100_spill] sm:$0xff] }
 0x5f6   :  { %10694 = vst [vmem:[#allocation82_spill] sm:$0xff] %v7924_v11  ;;  %v7942_v28 = vand.u32 4294901760, %v7695_v43  ;;  %v7944_v18 = vpack.c.bf16 %v2337_v29, %v2333_v10  ;;  %v7947_v37 = vsub.f32 %v10691_v31, %v2333_v10  ;;  %v2345_v22 = vand.u32 4294901760, %v10705_v6  ;;  %v10766_v41 = vld [vmem:[#allocation48_spill] sm:$0xff] }
 0x5f7   :  { %v1442_v57 = vsub.f32 %v7011_v61, %v10697_v51  ;;  %10698 = vst [vmem:[#allocation79_spill] sm:$0xff] %v7933_v12  ;;  %10699 = vst [vmem:[#allocation81_spill] sm:$0xff] %v7936_v3  ;;  %v1454_v36 = vsub.f32 %v7023_v26, %v10700_v19  ;;  %v10704_v51 = vld [vmem:[#allocation84_spill] sm:$0xff]  ;;  %v4984_v49 = vpack.c.bf16 %v1431_v63, %v1419_v60  ;;  %v10718_v40 = vand.u32 4294901760, %v7478_v25  ;;  %v10738_v61 = vld [vmem:[#allocation91_spill] sm:$0xff] }
 0x5f8   :  { %10701 = vst [vmem:[#allocation210_spill] sm:$0xff] %v7942_v28  ;;  %10702 = vst [vmem:[#allocation211_spill] sm:$0xff] %v7944_v18  ;;  %v2341_v59 = vand.u32 4294901760, %v10704_v51  ;;  %v7952_v0 = vsub.f32 %v10692_v33, %v2337_v29  ;;  %v7958_v26 = vpack.c.bf16 %v2339_v34, %v2335_v62  ;;  %v7961_v31 = vsub.f32 %v10695_v55, %v2335_v62  ;;  %v10712_v33 = vld [vmem:[#allocation155_spill] sm:$0xff]  ;;  %v10716_v62 = vld [vmem:[#allocation160_spill] sm:$0xff] }
 0x5f9   :  { %10703 = vst [vmem:[#allocation212_spill] sm:$0xff] %v7947_v37  ;;  %v7964_v10 = vsub.f32 %v10696_v48, %v2339_v34  ;;  %v1443_v60 = vand.u32 4294901760, %v1442_v57  ;;  %v1455_v29 = vand.u32 4294901760, %v1454_v36  ;;  %v7969_v63 = vsub.f32 %v7695_v43, %v7942_v28  ;;  %v10717_v57 = vld [vmem:[#allocation164_spill] sm:$0xff]  ;;  %v10724_v34 = vld [vmem:[#allocation83_spill] sm:$0xff]  ;;  %5295 = vmatpush1.bf16.msra.mxu0 %v7872_v46 }
 0x5fa   :  { %10706 = vst [vmem:[#allocation84_spill] sm:$0xff] %v7952_v0  ;;  %10708 = vst [vmem:[#allocation86_spill] sm:$0xff] %v7958_v26  ;;  %v7973_v35 = vpack.c.bf16 %v2345_v22, %v2341_v59  ;;  %v7976_v55 = vsub.f32 %v10704_v51, %v2341_v59  ;;  %v2369_v36 = vsub.f32 %v7478_v25, %v10718_v40  ;;  %v10719_v43 = vand.u32 4294901760, %v10707_v45  ;;  %v10720_v19 = vld [vmem:[#allocation168_spill] sm:$0xff]  ;;  %v10722_v51 = vld [vmem:[#allocation30_spill] sm:$0xff] }
 0x5fb   :  { %10709 = vst [vmem:[#allocation213_spill] sm:$0xff] %v7961_v31  ;;  %10710 = vst [vmem:[#allocation214_spill] sm:$0xff] %v7964_v10  ;;  %4979 = vmatpush1.bf16.msra.mxu1 %v10722_v51  ;;  %v7991_v59 = vsub.f32 %v10705_v6, %v2345_v22  ;;  %v2343_v48 = vand.u32 4294901760, %v10724_v34  ;;  %v10726_v40 = vld [vmem:[#allocation89_spill] sm:$0xff]  ;;  %v10727_v25 = vld [vmem:[#allocation90_spill] sm:$0xff]  ;;  %v10728_v28 = vand.u32 4294901760, %v10712_v33  ;;  %5297 = vmatprep.subr.bf16.mxu0 %v7883_v47 }
 0x5fc   :  { %10711 = vst [vmem:[#allocation215_spill] sm:$0xff] %v7969_v63  ;;  %10714 = vst [vmem:[#allocation155_spill] sm:$0xff] %v7973_v35  ;;  %v2381_v17 = vsub.f32 %v10707_v45, %v10719_v43  ;;  %v4992_v31 = vpack.c.bf16 %v10727_v25, %v10726_v40  ;;  %4981 = vmatprep.subr.bf16.mxu1 %v4980_v2  ;;  %v4988_v43 = vpack.c.bf16 %v1455_v29, %v1443_v60  ;;  %v10732_v2 = vld [vmem:[#allocation23_spill] sm:$0xff]  ;;  %v10733_v29 = vld [vmem:[#allocation25_spill] sm:$0xff] }
 0x5fd   :  { %10715 = vst [vmem:[#allocation156_spill] sm:$0xff] %v7976_v55  ;;  %10723 = vst [vmem:[#allocation160_spill] sm:$0xff] %v7991_v59  ;;  %v10725_v55 = vld [vmem:[#allocation85_spill] sm:$0xff]  ;;  %v2375_v51 = vsub.f32 %v10712_v33, %v10728_v28  ;;  %v10729_v6 = vand.u32 4294901760, %v10713_v58  ;;  %v10730_v54 = vand.u32 4294901760, %v10716_v62  ;;  %v10731_v25 = vand.u32 4294901760, %v10717_v57  ;;  %5299 = vmatpush1.bf16.msra.mxu0 %v7904_v23 }
 0x5fe   :  { %v2347_v10 = vand.u32 4294901760, %v10725_v55  ;;  %v2370_v4 = vand.u32 4294901760, %v2369_v36  ;;  %v2382_v59 = vand.u32 4294901760, %v2381_v17  ;;  %v10734_v28 = vand.u32 4294901760, %v10720_v19  ;;  %v10739_v36 = vld [vmem:[#allocation92_spill] sm:$0xff]  ;;  %5301 = vmatprep.subr.bf16.mxu0 %v7912_v9  ;;  %v10757_v9 = vld [vmem:[#allocation102_spill] sm:$0xff] }
 0x5ff   :  { %v2387_v22 = vsub.f32 %v10713_v58, %v10729_v6  ;;  %v2393_v45 = vsub.f32 %v10716_v62, %v10730_v54  ;;  %v2405_v40 = vsub.f32 %v10717_v57, %v10731_v25  ;;  %v10735_v6 = vand.u32 4294901760, %v10721_v13  ;;  %4983 = vmatpush1.bf16.msra.mxu1 %v7606_v20 }
 0x600   :  { %v2399_v0 = vsub.f32 %v10720_v19, %v10734_v28  ;;  %v8021_v54 = vpack.c.bf16 %v2347_v10, %v2343_v48  ;;  %v8024_v25 = vsub.f32 %v10724_v34, %v2343_v48  ;;  %v4994_v17 = vpack.c.bf16 %v10739_v36, %v10738_v61  ;;  %4985 = vmatprep.subr.bf16.mxu1 %v4984_v49 }
 0x601   :  { %v2411_v37 = vsub.f32 %v10721_v13, %v10735_v6  ;;  %v8030_v28 = vsub.f32 %v10725_v55, %v2347_v10  ;;  %v10741_v6 = vand.u32 4294901760, %v7969_v63  ;;  %v2376_v20 = vand.u32 4294901760, %v2375_v51  ;;  %v10744_v10 = vld [vmem:[#allocation93_spill] sm:$0xff]  ;;  %v10745_v55 = vld [vmem:[#allocation94_spill] sm:$0xff]  ;;  %v10747_v51 = vld [vmem:[#allocation96_spill] sm:$0xff]  ;;  %5303 = vmatpush1.bf16.msra.mxu0 %v7924_v11 }
 0x602   :  { %10736 = vst [vmem:[#allocation164_spill] sm:$0xff] %v8021_v54  ;;  %10737 = vst [vmem:[#allocation169_spill] sm:$0xff] %v8024_v25  ;;  %v2388_v46 = vand.u32 4294901760, %v2387_v22  ;;  %v2394_v3 = vand.u32 4294901760, %v2393_v45  ;;  %v2406_v12 = vand.u32 4294901760, %v2405_v40  ;;  %v10742_v48 = vand.u32 4294901760, %v10732_v2  ;;  %5305 = vmatprep.subr.bf16.mxu0 %v7944_v18 }
 0x603   :  { %10740 = vst [vmem:[#allocation30_spill] sm:$0xff] %v8030_v28  ;;  %v8035_v60 = vsub.f32 %v7969_v63, %v10741_v6  ;;  %v10743_v61 = vand.u32 4294901760, %v10733_v29  ;;  %v8043_v36 = vpack.c.bf16 %v2382_v59, %v2370_v4  ;;  %v4996_v47 = vpack.c.bf16 %v10745_v55, %v10744_v10  ;;  %4987 = vmatpush1.bf16.msra.mxu1 %v7635_v7  ;;  %v10746_v45 = vld [vmem:[#allocation95_spill] sm:$0xff]  ;;  %v10748_v40 = vld [vmem:[#allocation97_spill] sm:$0xff]  ;;  %v10750_v25 = vld [vmem:[#allocation28_spill] sm:$0xff] }
 0x604   :  { %v2417_v34 = vsub.f32 %v10732_v2, %v10742_v48  ;;  %v2400_v28 = vand.u32 4294901760, %v2399_v0  ;;  %v2412_v6 = vand.u32 4294901760, %v2411_v37  ;;  %v4998_v22 = vpack.c.bf16 %v10747_v51, %v10746_v45  ;;  %v10749_v48 = vld [vmem:[#allocation98_spill] sm:$0xff]  ;;  %4989 = vmatprep.subr.bf16.mxu1 %v4988_v43  ;;  %v10753_v7 = vld [vmem:[#allocation31_spill] sm:$0xff]  ;;  %v10756_v4 = vld [vmem:[#allocation101_spill] sm:$0xff] }
 0x605   :  { %v2429_v49 = vsub.f32 %v10733_v29, %v10743_v61  ;;  %v10751_v61 = vld [vmem:[#allocation29_spill] sm:$0xff]  ;;  %v8057_v37 = vpack.c.bf16 %v2388_v46, %v2376_v20  ;;  %v10752_v59 = vld [vmem:[#allocation34_spill] sm:$0xff]  ;;  %v9911_v55 = vand.u32 4294901760, %v10753_v7  ;;  %v8061_v23 = vpack.c.bf16 %v2406_v12, %v2394_v3  ;;  %v10754_v63 = vld [vmem:[#allocation99_spill] sm:$0xff]  ;;  %5307 = vmatpush1.bf16.msra.mxu0 %v7958_v26 }
 0x606   :  { %v9908_v10 = vand.u32 4294901760, %v10752_v59  ;;  %v2418_v45 = vand.u32 4294901760, %v2417_v34  ;;  %v8065_v50 = vpack.c.bf16 %v2412_v6, %v2400_v28  ;;  %v10759_v46 = vld [vmem:[#allocation38_spill] sm:$0xff]  ;;  %v10760_v12 = vand.u32 4294901760, %v10750_v25  ;;  %v10763_v20 = vld [vmem:[#allocation104_spill] sm:$0xff]  ;;  %5309 = vmatprep.subr.bf16.mxu0 %v7973_v35 }
 0x607   :  { %v2430_v51 = vand.u32 4294901760, %v2429_v49  ;;  %4991 = vmatpush1.bf16.msra.mxu1 %v7672_v32  ;;  %v10761_v34 = vand.u32 4294901760, %v10751_v61  ;;  %v2453_v32 = vsub.f32 %v10753_v7, %v9911_v55  ;;  %v10762_v49 = vld [vmem:[#allocation103_spill] sm:$0xff]  ;;  %v10765_v55 = vand.u32 4294901760, %v10759_v46  ;;  %v10837_v7 = vld [vmem:[#allocation156_spill] sm:$0xff] }
 0x608   :  { %v2423_v3 = vsub.f32 %v10750_v25, %v10760_v12  ;;  %4993 = vmatprep.subr.bf16.mxu1 %v4992_v31  ;;  %v2441_v43 = vsub.f32 %v10752_v59, %v9908_v10  ;;  %v10764_v10 = vand.u32 4294901760, %v10758_v15  ;;  %v10768_v31 = vand.u32 4294901760, %v7629_v1  ;;  %v10836_v59 = vld [vmem:[#allocation214_spill] sm:$0xff]  ;;  %v10838_v25 = vld [vmem:[#allocation160_spill] sm:$0xff] }
 0x609   :  { %v2435_v28 = vsub.f32 %v10751_v61, %v10761_v34  ;;  %v8090_v34 = vpack.c.bf16 %v2430_v51, %v2418_v45  ;;  %v2459_v12 = vsub.f32 %v10759_v46, %v10765_v55  ;;  %v10767_v51 = vld [vmem:[#allocation50_spill] sm:$0xff]  ;;  %v10769_v14 = vand.u32 4294901760, %v7647_v8  ;;  %5311 = vmatpush1.bf16.msra.mxu0 %v8021_v54  ;;  %v10835_v46 = vld [vmem:[#allocation213_spill] sm:$0xff]  ;;  %v10843_v29 = vld [vmem:[#allocation120_spill] sm:$0xff] }
 0x60a   :  { %1466 = vmatmul.mubr.f32.vlgmr.msra.gmra.mrb[18].mxu1 %v7099_v42  ;;  %v2447_v18 = vsub.f32 %v10758_v15, %v10764_v10  ;;  %v2424_v6 = vand.u32 4294901760, %v2423_v3  ;;  %v2465_v42 = vsub.f32 %v7629_v1, %v10768_v31  ;;  %v2442_v55 = vand.u32 4294901760, %v2441_v43  ;;  %v10776_v43 = vld [vmem:[#allocation49_spill] sm:$0xff]  ;;  %5313 = vmatprep.subr.bf16.mxu0 %v8043_v36  ;;  %v10831_v1 = vld [vmem:[#allocation79_spill] sm:$0xff]  ;;  %v10834_v15 = vld [vmem:[#allocation84_spill] sm:$0xff] }
 0x60b   :  { %4995 = vmatpush1.bf16.msra.mxu1 %v4994_v17  ;;  %v2436_v0 = vand.u32 4294901760, %v2435_v28  ;;  %v2477_v10 = vsub.f32 %v7647_v8, %v10769_v14  ;;  %v2454_v45 = vand.u32 4294901760, %v2453_v32  ;;  %v10770_v11 = vand.u32 4294901760, %v7652_v30  ;;  %v10772_v28 = vld [vmem:[#allocation105_spill] sm:$0xff]  ;;  %1666 = vmatprep.mubr.f32.mxu1 %v10777_v24  ;;  %v10783_v24 = vld [vmem:[#allocation108_spill] sm:$0xff]  ;;  %v10841_v61 = vld [vmem:[#allocation30_spill] sm:$0xff] }
 0x60c   :  { %4997 = vmatprep.subr.bf16.mxu1 %v4996_v47  ;;  %v10771_v17 = vand.u32 4294901760, %v7657_v53  ;;  %v5008_v31 = vpack.c.bf16 %v10773_v38, %v10772_v28  ;;  %v10774_v52 = vand.u32 4294901760, %v7662_v21  ;;  %v10775_v35 = vand.u32 4294901760, %v7666_v16 }
 0x60d   :  { %v2471_v26 = vsub.f32 %v7652_v30, %v10770_v11  ;;  %v2448_v11 = vand.u32 4294901760, %v2447_v18  ;;  %v2460_v30 = vand.u32 4294901760, %v2459_v12  ;;  %v10778_v8 = vand.u32 4294901760, %v10766_v41 }
 0x60e   :  { %v2483_v3 = vsub.f32 %v7657_v53, %v10771_v17  ;;  %v2489_v14 = vsub.f32 %v7662_v21, %v10774_v52  ;;  %v2501_v47 = vsub.f32 %v7666_v16, %v10775_v35  ;;  %v10779_v38 = vand.u32 4294901760, %v10767_v51  ;;  %v10780_v16 = vld [vmem:[#allocation21_spill] sm:$0xff] }
 0x60f   :  { %v2495_v17 = vsub.f32 %v10766_v41, %v10778_v8  ;;  %4999 = vmatpush1.bf16.msra.mxu1 %v4998_v22  ;;  %v5322_v52 = vpack.c.bf16 %v2436_v0, %v2424_v6  ;;  %v2466_v21 = vand.u32 4294901760, %v2465_v42  ;;  %v2478_v35 = vand.u32 4294901760, %v2477_v10  ;;  %v10782_v8 = vld [vmem:[#allocation107_spill] sm:$0xff]  ;;  %v10785_v6 = vld [vmem:[#allocation52_spill] sm:$0xff] }
 0x610   :  { %v2507_v28 = vsub.f32 %v10767_v51, %v10779_v38  ;;  %v9938_v32 = vand.u32 4294901760, %v10780_v16  ;;  %v10781_v18 = vpack.c.bf16 %v10749_v48, %v10748_v40  ;;  %v5324_v12 = vpack.c.bf16 %v2454_v45, %v2442_v55  ;;  %v10787_v48 = vld [vmem:[#allocation109_spill] sm:$0xff]  ;;  %v10788_v45 = vld [vmem:[#allocation110_spill] sm:$0xff] }
 0x611   :  { %v5010_v41 = vpack.c.bf16 %v10783_v24, %v10782_v8  ;;  %v2472_v53 = vand.u32 4294901760, %v2471_v26  ;;  %v2484_v38 = vand.u32 4294901760, %v2483_v3  ;;  %v2490_v51 = vand.u32 4294901760, %v2489_v14  ;;  %v10790_v14 = vld [vmem:[#allocation111_spill] sm:$0xff] }
 0x612   :  { %5001 = vmatprep.subr.bf16.mxu1 %v10781_v18  ;;  %v2502_v54 = vand.u32 4294901760, %v2501_v47  ;;  %v10784_v22 = vand.u32 4294901760, %v10776_v43  ;;  %v9937_v42 = vand.u32 4294901760, %v10785_v6  ;;  %v10786_v36 = vand.u32 4294901760, %v8035_v60  ;;  %v10791_v47 = vld [vmem:[#allocation112_spill] sm:$0xff] }
 0x613   :  { %v8151_v40 = vpack.c.bf16 %v2460_v30, %v2448_v11  ;;  %v5012_v10 = vpack.c.bf16 %v10788_v45, %v10787_v48  ;;  %v2496_v24 = vand.u32 4294901760, %v2495_v17  ;;  %v2508_v26 = vand.u32 4294901760, %v2507_v28  ;;  %v10795_v11 = vld [vmem:[#allocation115_spill] sm:$0xff]  ;;  %v10796_v17 = vld [vmem:[#allocation116_spill] sm:$0xff]  ;;  %v10812_v28 = vld [vmem:[#allocation61_spill] sm:$0xff] }
 0x614   :  { %v8146_v0 = vsub.f32 %v10776_v43, %v10784_v22  ;;  %2360 = vmatmul.mubr.f32.vlgmr.msra.gmra.mrb[0].mxu0 %v10786_v36  ;;  %v10789_v55 = vpack.c.bf16 %v10755_v39, %v10754_v63  ;;  %v8159_v3 = vpack.c.bf16 %v2478_v35, %v2466_v21  ;;  %v5014_v18 = vpack.c.bf16 %v10791_v47, %v10790_v14  ;;  %v10793_v39 = vld [vmem:[#allocation113_spill] sm:$0xff]  ;;  %v10794_v63 = vld [vmem:[#allocation114_spill] sm:$0xff]  ;;  %v10797_v35 = vld [vmem:[#allocation51_spill] sm:$0xff] }
 0x615   :  { %5315 = vmatpush1.bf16.msra.mxu0 %v8057_v37  ;;  %v8166_v30 = vsub.f32 %v10780_v16, %v9938_v32  ;;  %v10792_v60 = vpack.c.bf16 %v10757_v9, %v10756_v4  ;;  %v8172_v37 = vpack.c.bf16 %v2484_v38, %v2472_v53  ;;  %v5016_v21 = vpack.c.bf16 %v10794_v63, %v10793_v39  ;;  %v10798_v9 = vld [vmem:[#allocation117_spill] sm:$0xff]  ;;  %v10799_v53 = vld [vmem:[#allocation118_spill] sm:$0xff]  ;;  %v10811_v47 = vld [vmem:[#allocation59_spill] sm:$0xff] }
 0x616   :  { %5003 = vmatpush1.bf16.msra.mxu1 %v10789_v55  ;;  %5317 = vmatprep.subr.bf16.mxu0 %v8061_v23  ;;  %v9936_v8 = vand.u32 4294901760, %v10797_v35  ;;  %v8179_v22 = vpack.c.bf16 %v2502_v54, %v2490_v51  ;;  %v8185_v23 = vsub.f32 %v10785_v6, %v9937_v42  ;;  %v8190_v38 = vpack.c.bf16 %v2508_v26, %v2496_v24  ;;  %v10808_v63 = vld [vmem:[#allocation197_spill] sm:$0xff]  ;;  %v10809_v51 = vld [vmem:[#allocation199_spill] sm:$0xff]  ;;  %v10810_v54 = vld [vmem:[#allocation60_spill] sm:$0xff] }
 0x617   :  { %5005 = vmatprep.subr.bf16.mxu1 %v10792_v60  ;;  %2751 = vmatprep.mubr.f32.mxu0 %v7725_v5  ;;  %v9939_v48 = vand.u32 4294901760, %v7736_v27  ;;  %v10800_v45 = vpack.c.bf16 %v10763_v20, %v10762_v49  ;;  %v2526_v55 = vand.u32 4294901760, %v8166_v30  ;;  %v10815_v24 = vld [vmem:[#allocation202_spill] sm:$0xff]  ;;  %v10816_v20 = vld [vmem:[#allocation63_spill] sm:$0xff]  ;;  %v10817_v42 = vld [vmem:[#allocation68_spill] sm:$0xff]  ;;  %v10839_v39 = vand.u32 4294901760, %v7739_v44 }
 0x618   :  { %v10818_v5 = vld [vmem:[#allocation70_spill] sm:$0xff]  ;;  %v10820_v6 = vld [vmem:[#allocation203_spill] sm:$0xff]  ;;  %v10821_v4 = vld [vmem:[#allocation72_spill] sm:$0xff]  ;;  %v2520_v2 = vand.u32 4294901760, %v8185_v23 }
 0x619   :  { %5319 = vmatpush1.bf16.msra.mxu0 %v8065_v50  ;;  %v8211_v50 = vsub.f32 %v10797_v35, %v9936_v8  ;;  %v8229_v32 = vsub.f32 %v7736_v27, %v9939_v48  ;;  %v10819_v48 = vld [vmem:[#allocation69_spill] sm:$0xff]  ;;  %v10823_v43 = vld [vmem:[#allocation206_spill] sm:$0xff]  ;;  %v10824_v30 = vld [vmem:[#allocation207_spill] sm:$0xff]  ;;  %v2549_v60 = vsub.f32 %v7739_v44, %v10839_v39  ;;  %v10844_v8 = vand.u32 4294901760, %v7759_v56 }
 0x61a   :  { %5007 = vmatpush1.bf16.msra.mxu1 %v10800_v45  ;;  %5321 = vmatprep.subr.bf16.mxu0 %v8090_v34  ;;  %v10825_v49 = vld [vmem:[#allocation73_spill] sm:$0xff]  ;;  %v10826_v34 = vld [vmem:[#allocation76_spill] sm:$0xff]  ;;  %v10827_v45 = vld [vmem:[#allocation75_spill] sm:$0xff] }
 0x61b   :  { %5009 = vmatprep.subr.bf16.mxu1 %v5008_v31  ;;  %v10828_v36 = vld [vmem:[#allocation77_spill] sm:$0xff]  ;;  %v10830_v14 = vld [vmem:[#allocation80_spill] sm:$0xff]  ;;  %v10842_v26 = vld [vmem:[#allocation119_spill] sm:$0xff] }
 0x61c   :  { %v10829_v31 = vld [vmem:[#allocation209_spill] sm:$0xff]  ;;  %v10833_v35 = vld [vmem:[#allocation212_spill] sm:$0xff]  ;;  %v5022_v19 = vpack.c.bf16 %v10843_v29, %v10842_v26  ;;  %v10847_v29 = vpack.c.bf16 %v10796_v17, %v10795_v11  ;;  %v2538_v11 = vand.u32 4294901760, %v8229_v32  ;;  %v2550_v17 = vand.u32 4294901760, %v2549_v60 }
 0x61d   :  { %5323 = vmatpush1.bf16.msra.mxu0 %v5322_v52  ;;  %v10813_v52 = vld [vmem:[#allocation64_spill] sm:$0xff]  ;;  %v10832_v27 = vld [vmem:[#allocation81_spill] sm:$0xff] }
 0x61e   :  { %5011 = vmatpush1.bf16.msra.mxu1 %v5010_v41  ;;  %5325 = vmatprep.subr.bf16.mxu0 %v5324_v12  ;;  %v10814_v41 = vld [vmem:[#allocation66_spill] sm:$0xff]  ;;  %v10849_v26 = vld [vmem:[#allocation125_spill] sm:$0xff] }
 0x61f   :  { %5013 = vmatprep.subr.bf16.mxu1 %v5012_v10  ;;  %v10822_v12 = vld [vmem:[#allocation74_spill] sm:$0xff]  ;;  %v10840_v10 = vld [vmem:[#allocation169_spill] sm:$0xff] }
 0x621   :  { %5327 = vmatpush1.bf16.msra.mxu0 %v8151_v40  ;;  %v10846_v40 = vand.u32 4294901760, %v8146_v0 }
 0x622   :  { %5015 = vmatpush1.bf16.msra.mxu1 %v5014_v18  ;;  %5329 = vmatprep.subr.bf16.mxu0 %v8159_v3  ;;  %v2543_v3 = vsub.f32 %v7759_v56, %v10844_v8  ;;  %v2532_v18 = vand.u32 4294901760, %v8211_v50  ;;  %v10848_v8 = vld [vmem:[#allocation121_spill] sm:$0xff] }
 0x623   :  { %5017 = vmatprep.subr.bf16.mxu1 %v5016_v21  ;;  %v10845_v21 = vand.u32 4294901760, %v10808_v63  ;;  %v5336_v44 = vpack.c.bf16 %v2526_v55, %v10846_v40  ;;  %v5024_v56 = vpack.c.bf16 %v10849_v26, %v10848_v8  ;;  %v10851_v55 = vand.u32 4294901760, %v10810_v54 }
 0x624   :  { %v10853_v40 = vand.u32 4294901760, %v10811_v47  ;;  %v10854_v8 = vand.u32 4294901760, %v10812_v28  ;;  %v5338_v16 = vpack.c.bf16 %v2532_v18, %v2520_v2  ;;  %v9973_v2 = vand.u32 4294901760, %v10818_v5 }
 0x625   :  { %v2555_v39 = vsub.f32 %v10808_v63, %v10845_v21  ;;  %5331 = vmatpush1.bf16.msra.mxu0 %v8172_v37  ;;  %v10850_v21 = vand.u32 4294901760, %v10809_v51  ;;  %v2573_v50 = vsub.f32 %v10810_v54, %v10851_v55  ;;  %v10852_v37 = vpack.c.bf16 %v10799_v53, %v10798_v9 }
 0x626   :  { %5019 = vmatpush1.bf16.msra.mxu1 %v10847_v29  ;;  %5333 = vmatprep.subr.bf16.mxu0 %v8179_v22  ;;  %v2567_v29 = vsub.f32 %v10811_v47, %v10853_v40  ;;  %v2579_v26 = vsub.f32 %v10812_v28, %v10854_v8  ;;  %v10855_v9 = vand.u32 4294901760, %v10813_v52  ;;  %v10856_v53 = vand.u32 4294901760, %v10814_v41  ;;  %v10857_v40 = vld [vmem:[#allocation126_spill] sm:$0xff]  ;;  %v10858_v8 = vld [vmem:[#allocation129_spill] sm:$0xff]  ;;  %v10860_v47 = vld [vmem:[#allocation131_spill] sm:$0xff] }
 0x627   :  { %v2561_v0 = vsub.f32 %v10809_v51, %v10850_v21  ;;  %5021 = vmatprep.subr.bf16.mxu1 %v10852_v37  ;;  %v2544_v21 = vand.u32 4294901760, %v2543_v3  ;;  %v2556_v23 = vand.u32 4294901760, %v2555_v39  ;;  %v2574_v39 = vand.u32 4294901760, %v2573_v50  ;;  %v10861_v37 = vld [vmem:[#allocation134_spill] sm:$0xff]  ;;  %v10862_v28 = vld [vmem:[#allocation135_spill] sm:$0xff] }
 0x628   :  { %v2585_v32 = vsub.f32 %v10813_v52, %v10855_v9  ;;  %v2597_v60 = vsub.f32 %v10814_v41, %v10856_v53  ;;  %v5026_v55 = vpack.c.bf16 %v10858_v8, %v10857_v40  ;;  %v5340_v18 = vpack.c.bf16 %v2550_v17, %v2538_v11  ;;  %v10859_v52 = vld [vmem:[#allocation130_spill] sm:$0xff]  ;;  %v10869_v8 = vld [vmem:[#allocation144_spill] sm:$0xff] }
 0x629   :  { %5335 = vmatpush1.bf16.msra.mxu0 %v8190_v38  ;;  %v2562_v3 = vand.u32 4294901760, %v2561_v0  ;;  %v2568_v9 = vand.u32 4294901760, %v2567_v29  ;;  %v2580_v22 = vand.u32 4294901760, %v2579_v26  ;;  %v5028_v53 = vpack.c.bf16 %v10860_v47, %v10859_v52 }
 0x62a   :  { %5023 = vmatpush1.bf16.msra.mxu1 %v5022_v19  ;;  %5337 = vmatprep.subr.bf16.mxu0 %v5336_v44  ;;  %v5342_v41 = vpack.c.bf16 %v2556_v23, %v2544_v21  ;;  %v5030_v38 = vpack.c.bf16 %v10862_v28, %v10861_v37  ;;  %v10863_v19 = vand.u32 4294901760, %v10815_v24  ;;  %v10864_v50 = vand.u32 4294901760, %v10816_v20  ;;  %v10866_v28 = vld [vmem:[#allocation139_spill] sm:$0xff]  ;;  %v10867_v23 = vld [vmem:[#allocation140_spill] sm:$0xff] }
 0x62b   :  { %5025 = vmatprep.subr.bf16.mxu1 %v5024_v56  ;;  %v2586_v44 = vand.u32 4294901760, %v2585_v32  ;;  %v2598_v11 = vand.u32 4294901760, %v2597_v60  ;;  %v10865_v56 = vand.u32 4294901760, %v10817_v42  ;;  %v9972_v47 = vand.u32 4294901760, %v10819_v48 }
 0x62c   :  { %v2591_v0 = vsub.f32 %v10815_v24, %v10863_v19  ;;  %v2603_v40 = vsub.f32 %v10816_v20, %v10864_v50  ;;  %v5344_v52 = vpack.c.bf16 %v2574_v39, %v2562_v3  ;;  %v5032_v29 = vpack.c.bf16 %v10867_v23, %v10866_v28  ;;  %v10868_v39 = vld [vmem:[#allocation143_spill] sm:$0xff] }
 0x62d   :  { %v2609_v17 = vsub.f32 %v10817_v42, %v10865_v56  ;;  %5339 = vmatpush1.bf16.msra.mxu0 %v5338_v16  ;;  %v2621_v26 = vsub.f32 %v10818_v5, %v9973_v2  ;;  %v9969_v21 = vand.u32 4294901760, %v10820_v6  ;;  %v5346_v32 = vpack.c.bf16 %v2580_v22, %v2568_v9  ;;  %v10871_v9 = vld [vmem:[#allocation148_spill] sm:$0xff] }
 0x62e   :  { %5027 = vmatpush1.bf16.msra.mxu1 %v5026_v55  ;;  %5341 = vmatprep.subr.bf16.mxu0 %v5340_v18  ;;  %v9967_v60 = vand.u32 4294901760, %v10821_v4  ;;  %v9968_v37 = vand.u32 4294901760, %v10822_v12  ;;  %v9971_v16 = vand.u32 4294901760, %v10823_v43  ;;  %v2592_v3 = vand.u32 4294901760, %v2591_v0  ;;  %v10870_v18 = vld [vmem:[#allocation147_spill] sm:$0xff] }
 0x62f   :  { %5029 = vmatprep.subr.bf16.mxu1 %v5028_v53  ;;  %v2604_v55 = vand.u32 4294901760, %v2603_v40  ;;  %v5034_v19 = vpack.c.bf16 %v10869_v8, %v10868_v39  ;;  %v9970_v50 = vand.u32 4294901760, %v10824_v30  ;;  %v5348_v56 = vpack.c.bf16 %v2598_v11, %v2586_v44  ;;  %v10872_v8 = vld [vmem:[#allocation150_spill] sm:$0xff] }
 0x630   :  { %v2610_v28 = vand.u32 4294901760, %v2609_v17  ;;  %v2615_v22 = vsub.f32 %v10819_v48, %v9972_v47  ;;  %v5036_v53 = vpack.c.bf16 %v10871_v9, %v10870_v18  ;;  %v2622_v23 = vand.u32 4294901760, %v2621_v26  ;;  %v10873_v18 = vld [vmem:[#allocation152_spill] sm:$0xff]  ;;  %v10875_v47 = vld [vmem:[#allocation157_spill] sm:$0xff] }
 0x631   :  { %5343 = vmatpush1.bf16.msra.mxu0 %v5342_v41  ;;  %v2627_v0 = vsub.f32 %v10820_v6, %v9969_v21  ;;  %v9978_v40 = vand.u32 4294901760, %v10825_v49  ;;  %v9977_v39 = vand.u32 4294901760, %v10826_v34  ;;  %v2633_v44 = vsub.f32 %v10821_v4, %v9967_v60 }
 0x632   :  { %5031 = vmatpush1.bf16.msra.mxu1 %v5030_v38  ;;  %5345 = vmatprep.subr.bf16.mxu0 %v5344_v52  ;;  %v2645_v41 = vsub.f32 %v10822_v12, %v9968_v37  ;;  %v2639_v38 = vsub.f32 %v10823_v43, %v9971_v16  ;;  %v5350_v11 = vpack.c.bf16 %v2604_v55, %v2592_v3  ;;  %v9975_v52 = vand.u32 4294901760, %v10827_v45  ;;  %v10874_v16 = vld [vmem:[#allocation153_spill] sm:$0xff] }
 0x633   :  { %5033 = vmatprep.subr.bf16.mxu1 %v5032_v29  ;;  %v2651_v17 = vsub.f32 %v10824_v30, %v9970_v50  ;;  %v9974_v29 = vand.u32 4294901760, %v10828_v36  ;;  %v2616_v26 = vand.u32 4294901760, %v2615_v22  ;;  %v5038_v9 = vpack.c.bf16 %v10873_v18, %v10872_v8 }
 0x634   :  { %v9976_v60 = vand.u32 4294901760, %v10829_v31  ;;  %v9979_v37 = vand.u32 4294901760, %v10830_v14  ;;  %v5352_v21 = vpack.c.bf16 %v2622_v23, %v2610_v28  ;;  %v2628_v3 = vand.u32 4294901760, %v2627_v0 }
 0x635   :  { %5347 = vmatpush1.bf16.msra.mxu0 %v5346_v32  ;;  %v2657_v55 = vsub.f32 %v10825_v49, %v9978_v40  ;;  %v2669_v50 = vsub.f32 %v10826_v34, %v9977_v39  ;;  %v2634_v22 = vand.u32 4294901760, %v2633_v44  ;;  %v2646_v8 = vand.u32 4294901760, %v2645_v41  ;;  %v10879_v39 = vld [vmem:[#allocation163_spill] sm:$0xff] }
 0x636   :  { %5035 = vmatpush1.bf16.msra.mxu1 %v5034_v19  ;;  %5349 = vmatprep.subr.bf16.mxu0 %v5348_v56  ;;  %v2640_v18 = vand.u32 4294901760, %v2639_v38  ;;  %v5040_v2 = vpack.c.bf16 %v10875_v47, %v10874_v16  ;;  %v2652_v32 = vand.u32 4294901760, %v2651_v17  ;;  %v2663_v19 = vsub.f32 %v10827_v45, %v9975_v52  ;;  %v10876_v38 = vld [vmem:[#allocation158_spill] sm:$0xff]  ;;  %v10877_v17 = vld [vmem:[#allocation161_spill] sm:$0xff] }
 0x637   :  { %5037 = vmatprep.subr.bf16.mxu1 %v5036_v53  ;;  %v2675_v28 = vsub.f32 %v10828_v36, %v9974_v29  ;;  %v2681_v56 = vsub.f32 %v10829_v31, %v9976_v60  ;;  %v2693_v53 = vsub.f32 %v10830_v14, %v9979_v37  ;;  %v9988_v16 = vand.u32 4294901760, %v10833_v35  ;;  %v10878_v60 = vld [vmem:[#allocation162_spill] sm:$0xff] }
 0x638   :  { %v5354_v0 = vpack.c.bf16 %v2628_v3, %v2616_v26  ;;  %v2658_v44 = vand.u32 4294901760, %v2657_v55  ;;  %v2670_v41 = vand.u32 4294901760, %v2669_v50  ;;  %v5042_v29 = vpack.c.bf16 %v10877_v17, %v10876_v38  ;;  %v10883_v55 = vld [vmem:[#allocation167_spill] sm:$0xff] }
 0x639   :  { %5351 = vmatpush1.bf16.msra.mxu0 %v5350_v11  ;;  %v5356_v52 = vpack.c.bf16 %v2646_v8, %v2634_v22  ;;  %v5044_v40 = vpack.c.bf16 %v10879_v39, %v10878_v60  ;;  %v9987_v37 = vand.u32 4294901760, %v10834_v15  ;;  %v5358_v23 = vpack.c.bf16 %v2652_v32, %v2640_v18  ;;  %v10882_v39 = vld [vmem:[#allocation166_spill] sm:$0xff]  ;;  %v10884_v32 = vld [vmem:[#allocation171_spill] sm:$0xff] }
 0x63a   :  { %5039 = vmatpush1.bf16.msra.mxu1 %v5038_v9  ;;  %5353 = vmatprep.subr.bf16.mxu0 %v5352_v21  ;;  %v2664_v47 = vand.u32 4294901760, %v2663_v19  ;;  %v2676_v31 = vand.u32 4294901760, %v2675_v28  ;;  %v10880_v11 = vand.u32 4294901760, %v10831_v1  ;;  %v2682_v9 = vand.u32 4294901760, %v2681_v56  ;;  %v10885_v19 = vld [vmem:[#allocation172_spill] sm:$0xff] }
 0x63b   :  { %5041 = vmatprep.subr.bf16.mxu1 %v5040_v2  ;;  %v2694_v50 = vand.u32 4294901760, %v2693_v53  ;;  %v10881_v3 = vand.u32 4294901760, %v10832_v27  ;;  %v2705_v2 = vsub.f32 %v10833_v35, %v9988_v16  ;;  %v5360_v60 = vpack.c.bf16 %v2670_v41, %v2658_v44 }
 0x63c   :  { %v2687_v26 = vsub.f32 %v10831_v1, %v10880_v11  ;;  %v5046_v22 = vpack.c.bf16 %v10883_v55, %v10882_v39  ;;  %v9986_v8 = vand.u32 4294901760, %v10835_v46  ;;  %v9985_v18 = vand.u32 4294901760, %v10836_v59  ;;  %v10886_v11 = vld [vmem:[#allocation173_spill] sm:$0xff] }
 0x63d   :  { %v2699_v21 = vsub.f32 %v10832_v27, %v10881_v3  ;;  %5355 = vmatpush1.bf16.msra.mxu0 %v5354_v0  ;;  %v5048_v28 = vpack.c.bf16 %v10885_v19, %v10884_v32  ;;  %v2717_v56 = vsub.f32 %v10834_v15, %v9987_v37  ;;  %v9984_v53 = vand.u32 4294901760, %v10837_v7  ;;  %v10887_v3 = vld [vmem:[#allocation174_spill] sm:$0xff]  ;;  %v10891_v32 = vld [vmem:[#allocation179_spill] sm:$0xff] }
 0x63e   :  { %5043 = vmatpush1.bf16.msra.mxu1 %v5042_v29  ;;  %5357 = vmatprep.subr.bf16.mxu0 %v5356_v52  ;;  %v9983_v29 = vand.u32 4294901760, %v10838_v25  ;;  %v5362_v0 = vpack.c.bf16 %v2676_v31, %v2664_v47  ;;  %v2688_v44 = vand.u32 4294901760, %v2687_v26  ;;  %v5364_v41 = vpack.c.bf16 %v2694_v50, %v2682_v9  ;;  %v10888_v26 = vld [vmem:[#allocation175_spill] sm:$0xff]  ;;  %v10889_v9 = vld [vmem:[#allocation176_spill] sm:$0xff]  ;;  %v10942_v37 = vld [vmem:[#allocation194_spill] sm:$0xff] }
 0x63f   :  { %5045 = vmatprep.subr.bf16.mxu1 %v5044_v40  ;;  %v2700_v38 = vand.u32 4294901760, %v2699_v21  ;;  %v2706_v17 = vand.u32 4294901760, %v2705_v2  ;;  %v5050_v52 = vpack.c.bf16 %v10887_v3, %v10886_v11  ;;  %v2711_v40 = vsub.f32 %v10835_v46, %v9986_v8 }
 0x640   :  { %v2723_v39 = vsub.f32 %v10836_v59, %v9985_v18  ;;  %v9982_v55 = vand.u32 4294901760, %v10840_v10  ;;  %v9981_v31 = vand.u32 4294901760, %v10841_v61  ;;  %v2718_v47 = vand.u32 4294901760, %v2717_v56  ;;  %v10938_v18 = vld [vmem:[#allocation193_spill] sm:$0xff] }
 0x641   :  { %5359 = vmatpush1.bf16.msra.mxu0 %v5358_v23  ;;  %v5052_v50 = vpack.c.bf16 %v10889_v9, %v10888_v26  ;;  %v2729_v23 = vsub.f32 %v10837_v7, %v9984_v53  ;;  %v2741_v21 = vsub.f32 %v10838_v25, %v9983_v29  ;;  %v5366_v2 = vpack.c.bf16 %v2700_v38, %v2688_v44  ;;  %v10893_v9 = vld [vmem:[#allocation133_spill] sm:$0xff]  ;;  %v10934_v29 = vld [vmem:[#allocation192_spill] sm:$0xff] }
 0x642   :  { %5047 = vmatpush1.bf16.msra.mxu1 %v5046_v22  ;;  %5361 = vmatprep.subr.bf16.mxu0 %v5360_v60  ;;  %v10890_v22 = vld [vmem:[#allocation177_spill] sm:$0xff]  ;;  %v2712_v60 = vand.u32 4294901760, %v2711_v40  ;;  %v2735_v56 = vsub.f32 %v10840_v10, %v9982_v55  ;;  %v2747_v11 = vsub.f32 %v10841_v61, %v9981_v31  ;;  %v5368_v3 = vpack.c.bf16 %v2718_v47, %v2706_v17  ;;  %v10896_v17 = vld [vmem:[#allocation154_spill] sm:$0xff]  ;;  %v10930_v31 = vld [vmem:[#allocation191_spill] sm:$0xff] }
 0x643   :  { %5049 = vmatprep.subr.bf16.mxu1 %v5048_v28  ;;  %v5054_v19 = vpack.c.bf16 %v10891_v32, %v10890_v22  ;;  %v2724_v28 = vand.u32 4294901760, %v2723_v39  ;;  %v2730_v26 = vand.u32 4294901760, %v2729_v23  ;;  %v2742_v44 = vand.u32 4294901760, %v2741_v21  ;;  %v10892_v39 = vld [vmem:[#allocation178_spill] sm:$0xff]  ;;  %v10894_v32 = vld [vmem:[#allocation180_spill] sm:$0xff] }
 0x644   :  { %v10898_v23 = vld [vmem:[#allocation128_spill] sm:$0xff] }
 0x645   :  { %5363 = vmatpush1.bf16.msra.mxu0 %v5362_v0  ;;  %v5370_v38 = vpack.c.bf16 %v2724_v28, %v2712_v60  ;;  %v2736_v0 = vand.u32 4294901760, %v2735_v56  ;;  %v5372_v40 = vpack.c.bf16 %v2742_v44, %v2730_v26  ;;  %v10899_v21 = vand.u32 4294901760, %v10898_v23  ;;  %v10902_v60 = vld [vmem:[#allocation210_spill] sm:$0xff]  ;;  %v10904_v56 = vld [vmem:[#allocation184_spill] sm:$0xff] }
 0x646   :  { %5051 = vmatpush1.bf16.msra.mxu1 %v5050_v52  ;;  %5365 = vmatprep.subr.bf16.mxu0 %v5364_v41  ;;  %v2748_v52 = vand.u32 4294901760, %v2747_v11  ;;  %v10895_v41 = vld [vmem:[#allocation151_spill] sm:$0xff]  ;;  %v10903_v28 = vpack.c.bf16 %v10713_v58, %v10712_v33  ;;  %v10905_v11 = vpack.c.bf16 %v10717_v57, %v10716_v62  ;;  %v10907_v26 = vld [vmem:[#allocation196_spill] sm:$0xff] }
 0x647   :  { %5053 = vmatprep.subr.bf16.mxu1 %v5052_v50  ;;  %v5376_v47 = vpack.c.bf16 %v10896_v17, %v10895_v41  ;;  %v10897_v50 = vld [vmem:[#allocation181_spill] sm:$0xff]  ;;  %v10908_v44 = vld [vmem:[#allocation168_spill] sm:$0xff] }
 0x648   :  { %v5374_v22 = vpack.c.bf16 %v2748_v52, %v2736_v0  ;;  %v10910_v0 = vld [vmem:[#allocation186_spill] sm:$0xff]  ;;  %v10911_v52 = vld [vmem:[#allocation25_spill] sm:$0xff]  ;;  %v10918_v23 = vld [vmem:[#allocation188_spill] sm:$0xff] }
 0x649   :  { %5367 = vmatpush1.bf16.msra.mxu0 %v5366_v2  ;;  %v10900_v2 = vld [vmem:[#allocation182_spill] sm:$0xff] }
 0x64a   :  { %5055 = vmatpush1.bf16.msra.mxu1 %v5054_v19  ;;  %5369 = vmatprep.subr.bf16.mxu0 %v5368_v3  ;;  %v10901_v19 = vld [vmem:[#allocation183_spill] sm:$0xff]  ;;  %v10906_v3 = vld [vmem:[#allocation185_spill] sm:$0xff] }
 0x64b   :  { %5057 = vmatprep.subr.bf16.mxu1 %v10892_v39 }
 0x64d   :  { %1669 = vmatmul.mubr.f32.vlgmr.msra.gmra.mrb[18].mxu1 %v10893_v9  ;;  %5371 = vmatpush1.bf16.msra.mxu0 %v5370_v38  ;;  %v10909_v38 = vpack.c.bf16 %v10721_v13, %v10908_v44 }
 0x64e   :  { %5059 = vmatpush1.bf16.msra.mxu1 %v10894_v32  ;;  %5373 = vmatprep.subr.bf16.mxu0 %v5372_v40  ;;  %v10912_v40 = vld [vmem:[#allocation23_spill] sm:$0xff]  ;;  %v10915_v32 = vld [vmem:[#allocation29_spill] sm:$0xff] }
 0x64f   :  { %5061 = vmatprep.subr.bf16.mxu1 %v10897_v50  ;;  %1806 = vmatprep.mubr.f32.mxu1 %v10899_v21  ;;  %v10913_v39 = vpack.c.bf16 %v10911_v52, %v10912_v40  ;;  %v10919_v21 = vld [vmem:[#allocation31_spill] sm:$0xff] }
 0x651   :  { %5375 = vmatpush1.bf16.msra.mxu0 %v5374_v22  ;;  %v10914_v22 = vld [vmem:[#allocation187_spill] sm:$0xff] }
 0x652   :  { %5063 = vmatpush1.bf16.msra.mxu1 %v10900_v2  ;;  %5377 = vmatprep.subr.bf16.mxu0 %v5376_v47  ;;  %v10916_v47 = vld [vmem:[#allocation28_spill] sm:$0xff]  ;;  %v10920_v2 = vld [vmem:[#allocation34_spill] sm:$0xff] }
 0x653   :  { %5065 = vmatprep.subr.bf16.mxu1 %v10901_v19  ;;  %v10917_v50 = vpack.c.bf16 %v10915_v32, %v10916_v47  ;;  %v10921_v19 = vpack.c.bf16 %v10919_v21, %v10920_v2 }
 0x654   :  { %2753 = vmatmul.mubr.f32.vlgmr.msra.gmra.mrb[0].mxu0 %v10902_v60  ;;  %v10946_v60 = vld [vmem:[#allocation195_spill] sm:$0xff] }
 0x655   :  { %5379 = vmatpush1.bf16.msra.mxu0 %v10903_v28  ;;  %2953 = vmatprep.mubr.f32.mxu0 %v10907_v26  ;;  %v10922_v28 = vld [vmem:[#allocation189_spill] sm:$0xff] }
 0x656   :  { %5067 = vmatpush1.bf16.msra.mxu1 %v10904_v56  ;;  %5381 = vmatprep.subr.bf16.mxu0 %v10905_v11  ;;  %v10923_v56 = vld [vmem:[#allocation38_spill] sm:$0xff]  ;;  %v10924_v11 = vld [vmem:[#allocation36_spill] sm:$0xff] }
 0x657   :  { %5069 = vmatprep.subr.bf16.mxu1 %v10906_v3  ;;  %v10925_v3 = vpack.c.bf16 %v10923_v56, %v10924_v11 }
 0x659   :  { %5383 = vmatpush1.bf16.msra.mxu0 %v10909_v38  ;;  %v10926_v38 = vld [vmem:[#allocation190_spill] sm:$0xff] }
 0x65a   :  { %5071 = vmatpush1.bf16.msra.mxu1 %v10910_v0  ;;  %5385 = vmatprep.subr.bf16.mxu0 %v10913_v39  ;;  %v10927_v0 = vld [vmem:[#allocation40_spill] sm:$0xff]  ;;  %v10928_v39 = vld [vmem:[#allocation37_spill] sm:$0xff] }
 0x65b   :  { %5073 = vmatprep.subr.bf16.mxu1 %v10914_v22  ;;  %v10929_v22 = vpack.c.bf16 %v10927_v0, %v10928_v39 }
 0x65d   :  { %5387 = vmatpush1.bf16.msra.mxu0 %v10917_v50  ;;  %v10931_v50 = vld [vmem:[#allocation41_spill] sm:$0xff] }
 0x65e   :  { %5075 = vmatpush1.bf16.msra.mxu1 %v10918_v23  ;;  %5389 = vmatprep.subr.bf16.mxu0 %v10921_v19  ;;  %v10932_v23 = vld [vmem:[#allocation39_spill] sm:$0xff] }
 0x65f   :  { %5077 = vmatprep.subr.bf16.mxu1 %v10922_v28  ;;  %v10933_v55 = vpack.c.bf16 %v10931_v50, %v10932_v23  ;;  %v10935_v19 = vld [vmem:[#allocation43_spill] sm:$0xff]  ;;  %v10936_v28 = vld [vmem:[#allocation46_spill] sm:$0xff] }
 0x660   :  { %v10937_v53 = vpack.c.bf16 %v10935_v19, %v10936_v28  ;;  %v10950_v19 = vld [vmem:[#allocation122_spill] sm:$0xff] }
 0x661   :  { %5391 = vmatpush1.bf16.msra.mxu0 %v10925_v3  ;;  %v10939_v3 = vld [vmem:[#allocation50_spill] sm:$0xff] }
 0x662   :  { %5079 = vmatpush1.bf16.msra.mxu1 %v10926_v38  ;;  %5393 = vmatprep.subr.bf16.mxu0 %v10929_v22  ;;  %v10940_v38 = vld [vmem:[#allocation48_spill] sm:$0xff]  ;;  %v10943_v22 = vld [vmem:[#allocation21_spill] sm:$0xff] }
 0x663   :  { %5081 = vmatprep.subr.bf16.mxu1 %v10930_v31  ;;  %v10941_v8 = vpack.c.bf16 %v10939_v3, %v10940_v38  ;;  %v10944_v31 = vld [vmem:[#allocation49_spill] sm:$0xff]  ;;  %v10954_v3 = vld [vmem:[#allocation123_spill] sm:$0xff] }
 0x664   :  { %v10945_v16 = vpack.c.bf16 %v10943_v22, %v10944_v31  ;;  %v10957_v22 = vld [vmem:[#allocation124_spill] sm:$0xff] }
 0x665   :  { %5395 = vmatpush1.bf16.msra.mxu0 %v10933_v55  ;;  %v10947_v55 = vld [vmem:[#allocation51_spill] sm:$0xff] }
 0x666   :  { %5083 = vmatpush1.bf16.msra.mxu1 %v10934_v29  ;;  %5397 = vmatprep.subr.bf16.mxu0 %v10937_v53  ;;  %v10948_v29 = vld [vmem:[#allocation52_spill] sm:$0xff]  ;;  %v10951_v53 = vld [vmem:[#allocation58_spill] sm:$0xff] }
 0x667   :  { %5085 = vmatprep.subr.bf16.mxu1 %v10938_v18  ;;  %v10949_v50 = vpack.c.bf16 %v10947_v55, %v10948_v29  ;;  %v10952_v18 = vld [vmem:[#allocation56_spill] sm:$0xff] }
 0x668   :  { %v10953_v28 = vpack.c.bf16 %v10951_v53, %v10952_v18  ;;  %v10963_v53 = vld [vmem:[#allocation127_spill] sm:$0xff] }
 0x669   :  { %5399 = vmatpush1.bf16.msra.mxu0 %v10941_v8 }
 0x66a   :  { %5087 = vmatpush1.bf16.msra.mxu1 %v10942_v37  ;;  %5401 = vmatprep.subr.bf16.mxu0 %v10945_v16  ;;  %v10955_v37 = vld [vmem:[#allocation57_spill] sm:$0xff]  ;;  %v10958_v16 = vpack.c.bf16 %v10810_v54, %v10809_v51 }
 0x66b   :  { %5089 = vmatprep.subr.bf16.mxu1 %v10946_v60  ;;  %v10956_v8 = vpack.c.bf16 %v10808_v63, %v10955_v37  ;;  %v10959_v60 = vld [vmem:[#allocation136_spill] sm:$0xff]  ;;  %v10967_v63 = vld [vmem:[#allocation137_spill] sm:$0xff] }
 0x66d   :  { %5403 = vmatpush1.bf16.msra.mxu0 %v10949_v50  ;;  %v10960_v50 = vld [vmem:[#allocation61_spill] sm:$0xff] }
 0x66e   :  { %5091 = vmatpush1.bf16.msra.mxu1 %v10950_v19  ;;  %5405 = vmatprep.subr.bf16.mxu0 %v10953_v28  ;;  %v10961_v19 = vld [vmem:[#allocation59_spill] sm:$0xff]  ;;  %v10964_v28 = vld [vmem:[#allocation66_spill] sm:$0xff] }
 0x66f   :  { %5093 = vmatprep.subr.bf16.mxu1 %v10954_v3  ;;  %v10962_v55 = vpack.c.bf16 %v10960_v50, %v10961_v19  ;;  %v10965_v3 = vld [vmem:[#allocation64_spill] sm:$0xff] }
 0x670   :  { %v10966_v18 = vpack.c.bf16 %v10964_v28, %v10965_v3 }
 0x671   :  { %5407 = vmatpush1.bf16.msra.mxu0 %v10956_v8  ;;  %v10969_v8 = vld [vmem:[#allocation88_spill] sm:$0xff] }
 0x672   :  { %5095 = vmatpush1.bf16.msra.mxu1 %v10957_v22  ;;  %5409 = vmatprep.subr.bf16.mxu0 %v10958_v16  ;;  %v10968_v22 = vpack.c.bf16 %v10816_v20, %v10815_v24  ;;  %v10970_v16 = vpack.c.bf16 %v10818_v5, %v10817_v42 }
 0x673   :  { %5097 = vmatprep.subr.bf16.mxu1 %v10959_v60  ;;  %v10971_v60 = vld [vmem:[#allocation87_spill] sm:$0xff] }
 0x675   :  { %5411 = vmatpush1.bf16.msra.mxu0 %v10962_v55  ;;  %v10972_v55 = vpack.c.bf16 %v10820_v6, %v10819_v48 }
 0x676   :  { %5099 = vmatpush1.bf16.msra.mxu1 %v10963_v53  ;;  %5413 = vmatprep.subr.bf16.mxu0 %v10966_v18  ;;  %v10973_v53 = vld [vmem:[#allocation132_spill] sm:$0xff]  ;;  %v10975_v18 = vld [vmem:[#allocation138_spill] sm:$0xff] }
 0x677   :  { %5101 = vmatprep.subr.bf16.mxu1 %v10967_v63  ;;  %v10974_v63 = vpack.c.bf16 %v10822_v12, %v10821_v4 }
 0x679   :  { %5415 = vmatpush1.bf16.msra.mxu0 %v10968_v22  ;;  %v10976_v22 = vpack.c.bf16 %v10824_v30, %v10823_v43  ;;  %v10984_v30 = vld [vmem:[#allocation146_spill] sm:$0xff] }
 0x67a   :  { %5103 = vmatpush1.bf16.msra.mxu1 %v10969_v8  ;;  %5417 = vmatprep.subr.bf16.mxu0 %v10970_v16  ;;  %v10977_v8 = vld [vmem:[#allocation141_spill] sm:$0xff]  ;;  %v10978_v16 = vpack.c.bf16 %v10826_v34, %v10825_v49 }
 0x67b   :  { %5105 = vmatprep.subr.bf16.mxu1 %v10971_v60  ;;  %v10979_v60 = vld [vmem:[#allocation142_spill] sm:$0xff] }
 0x67d   :  { %5419 = vmatpush1.bf16.msra.mxu0 %v10972_v55  ;;  %v10980_v55 = vpack.c.bf16 %v10828_v36, %v10827_v45 }
 0x67e   :  { %5107 = vmatpush1.bf16.msra.mxu1 %v10973_v53  ;;  %5421 = vmatprep.subr.bf16.mxu0 %v10974_v63  ;;  %v10981_v53 = vld [vmem:[#allocation145_spill] sm:$0xff] }
 0x67f   :  { %5109 = vmatprep.subr.bf16.mxu1 %v10975_v18  ;;  %v10982_v63 = vld [vmem:[#allocation209_spill] sm:$0xff] }
 0x680   :  { %v10983_v18 = vpack.c.bf16 %v10830_v14, %v10982_v63 }
 0x681   :  { %5423 = vmatpush1.bf16.msra.mxu0 %v10976_v22  ;;  %v10985_v22 = vpack.c.bf16 %v10832_v27, %v10831_v1 }
 0x682   :  { %5111 = vmatpush1.bf16.msra.mxu1 %v10977_v8  ;;  %5425 = vmatprep.subr.bf16.mxu0 %v10978_v16  ;;  %v10986_v8 = vld [vmem:[#allocation149_spill] sm:$0xff]  ;;  %v10987_v16 = vpack.c.bf16 %v10834_v15, %v10833_v35 }
 0x683   :  { %5113 = vmatprep.subr.bf16.mxu1 %v10979_v60  ;;  %v10988_v60 = vand.u32 4294901760, %v10893_v9  ;;  %v10995_v9 = vand.u32 4294901760, %v10907_v26  ;;  %v11005_v26 = vld [vmem:[#allocation45_spill] sm:$0xff] }
 0x685   :  { %5427 = vmatpush1.bf16.msra.mxu0 %v10980_v55  ;;  %v10989_v55 = vpack.c.bf16 %v10836_v59, %v10835_v46 }
 0x686   :  { %5115 = vmatpush1.bf16.msra.mxu1 %v10981_v53  ;;  %5429 = vmatprep.subr.bf16.mxu0 %v10983_v18  ;;  %v10991_v53 = vpack.c.bf16 %v10841_v61, %v10840_v10  ;;  %v10992_v18 = vld [vmem:[#allocation24_spill] sm:$0xff]  ;;  %v11003_v61 = vld [vmem:[#allocation42_spill] sm:$0xff] }
 0x687   :  { %5117 = vmatprep.subr.bf16.mxu1 %v10984_v30  ;;  %v10990_v30 = vpack.c.bf16 %v10838_v25, %v10837_v7  ;;  %v11000_v25 = vld [vmem:[#allocation32_spill] sm:$0xff] }
 0x689   :  { %5431 = vmatpush1.bf16.msra.mxu0 %v10985_v22  ;;  %v10993_v22 = vld [vmem:[#allocation215_spill] sm:$0xff] }
 0x68a   :  { %5119 = vmatpush1.bf16.msra.mxu1 %v10986_v8  ;;  %5433 = vmatprep.subr.bf16.mxu0 %v10987_v16  ;;  %v10994_v8 = vld [vmem:[#allocation26_spill] sm:$0xff]  ;;  %v10996_v16 = vld [vmem:[#allocation159_spill] sm:$0xff] }
 0x68d   :  { %1810 = vmatmul.mubr.f32.vlgmr.msra.gmra.mrb[18].mxu1 %v10988_v60  ;;  %5435 = vmatpush1.bf16.msra.mxu0 %v10989_v55  ;;  %v10997_v60 = vld [vmem:[#allocation165_spill] sm:$0xff]  ;;  %v10998_v55 = vld [vmem:[#allocation170_spill] sm:$0xff] }
 0x68e   :  { %5437 = vmatprep.subr.bf16.mxu0 %v10990_v30  ;;  %v10999_v30 = vld [vmem:[#allocation27_spill] sm:$0xff] }
 0x691   :  { %5439 = vmatpush1.bf16.msra.mxu0 %v10991_v53  ;;  %v11001_v53 = vld [vmem:[#allocation33_spill] sm:$0xff] }
 0x692   :  { %5441 = vmatprep.subr.bf16.mxu0 %v10992_v18  ;;  %v11002_v18 = vld [vmem:[#allocation35_spill] sm:$0xff] }
 0x694   :  { %2956 = vmatmul.mubr.f32.vlgmr.msra.gmra.mrb[0].mxu0 %v10993_v22 }
 0x695   :  { %5443 = vmatpush1.bf16.msra.mxu0 %v10994_v8  ;;  %3093 = vmatprep.mubr.f32.mxu0 %v10995_v9  ;;  %v11004_v8 = vld [vmem:[#allocation44_spill] sm:$0xff]  ;;  %v11006_v9 = vld [vmem:[#allocation47_spill] sm:$0xff] }
 0x696   :  { %5445 = vmatprep.subr.bf16.mxu0 %v10996_v16  ;;  %v11007_v16 = vld [vmem:[#allocation22_spill] sm:$0xff] }
 0x699   :  { %5447 = vmatpush1.bf16.msra.mxu0 %v10997_v60  ;;  %v11008_v60 = vld [vmem:[#allocation53_spill] sm:$0xff] }
 0x69a   :  { %5449 = vmatprep.subr.bf16.mxu0 %v10998_v55  ;;  %v11009_v55 = vld [vmem:[#allocation55_spill] sm:$0xff] }
 0x69d   :  { %5451 = vmatpush1.bf16.msra.mxu0 %v10999_v30  ;;  %v11010_v30 = vld [vmem:[#allocation198_spill] sm:$0xff] }
 0x69e   :  { %5453 = vmatprep.subr.bf16.mxu0 %v11000_v25  ;;  %v11011_v25 = vld [vmem:[#allocation62_spill] sm:$0xff] }
 0x6a1   :  { %5455 = vmatpush1.bf16.msra.mxu0 %v11001_v53  ;;  %v11012_v53 = vld [vmem:[#allocation200_spill] sm:$0xff] }
 0x6a2   :  { %5457 = vmatprep.subr.bf16.mxu0 %v11002_v18  ;;  %v11013_v18 = vld [vmem:[#allocation201_spill] sm:$0xff] }
 0x6a5   :  { %5459 = vmatpush1.bf16.msra.mxu0 %v11003_v61  ;;  %v11014_v61 = vld [vmem:[#allocation65_spill] sm:$0xff] }
 0x6a6   :  { %5461 = vmatprep.subr.bf16.mxu0 %v11004_v8  ;;  %v11015_v8 = vld [vmem:[#allocation67_spill] sm:$0xff] }
 0x6a9   :  { %5463 = vmatpush1.bf16.msra.mxu0 %v11005_v26  ;;  %v11016_v26 = vld [vmem:[#allocation204_spill] sm:$0xff] }
 0x6aa   :  { %5465 = vmatprep.subr.bf16.mxu0 %v11006_v9  ;;  %v11017_v9 = vld [vmem:[#allocation205_spill] sm:$0xff] }
 0x6ad   :  { %5467 = vmatpush1.bf16.msra.mxu0 %v11007_v16  ;;  %v11018_v16 = vld [vmem:[#allocation71_spill] sm:$0xff] }
 0x6ae   :  { %5469 = vmatprep.subr.bf16.mxu0 %v11008_v60  ;;  %v11019_v60 = vld [vmem:[#allocation78_spill] sm:$0xff] }
 0x6b1   :  { %5471 = vmatpush1.bf16.msra.mxu0 %v11009_v55  ;;  %v11020_v55 = vld [vmem:[#allocation208_spill] sm:$0xff] }
 0x6b2   :  { %5473 = vmatprep.subr.bf16.mxu0 %v11010_v30  ;;  %v11021_v30 = vld [vmem:[#allocation82_spill] sm:$0xff] }
 0x6b5   :  { %5475 = vmatpush1.bf16.msra.mxu0 %v11011_v25  ;;  %v11022_v25 = vld [vmem:[#allocation211_spill] sm:$0xff] }
 0x6b6   :  { %5477 = vmatprep.subr.bf16.mxu0 %v11012_v53  ;;  %v11023_v53 = vld [vmem:[#allocation86_spill] sm:$0xff] }
 0x6b9   :  { %5479 = vmatpush1.bf16.msra.mxu0 %v11013_v18  ;;  %v11024_v18 = vld [vmem:[#allocation155_spill] sm:$0xff] }
 0x6ba   :  { %5481 = vmatprep.subr.bf16.mxu0 %v11014_v61 }
 0x6bd   :  { %5483 = vmatpush1.bf16.msra.mxu0 %v11015_v8  ;;  %v11025_v8 = vand.u32 4294901760, %v10895_v41  ;;  %v11033_v41 = vand.u32 4294901760, %v10908_v44  ;;  %v11040_v44 = vand.u32 4294901760, %v10920_v2 }
 0x6be   :  { %5485 = vmatprep.subr.bf16.mxu0 %v11016_v26  ;;  %v11026_v26 = vand.u32 4294901760, %v10896_v17  ;;  %v11034_v17 = vand.u32 4294901760, %v10721_v13  ;;  %v11041_v13 = vand.u32 4294901760, %v10919_v21  ;;  %v11049_v21 = vld [vmem:[#allocation46_spill] sm:$0xff] }
 0x6c0   :  { %v5504_v61 = vpack.c.bf16 %v11026_v26, %v11025_v8  ;;  %v5510_v8 = vpack.c.bf16 %v11034_v17, %v11033_v41  ;;  %v11035_v26 = vld [vmem:[#allocation54_spill] sm:$0xff]  ;;  %v11051_v41 = vld [vmem:[#allocation43_spill] sm:$0xff] }
 0x6c1   :  { %5487 = vmatpush1.bf16.msra.mxu0 %v11017_v9  ;;  %v11027_v9 = vld [vmem:[#allocation164_spill] sm:$0xff] }
 0x6c2   :  { %5489 = vmatprep.subr.bf16.mxu0 %v11018_v16  ;;  %v11028_v16 = vand.u32 4294901760, %v10712_v33  ;;  %v11036_v33 = vand.u32 4294901760, %v10912_v40  ;;  %v11043_v40 = vand.u32 4294901760, %v10923_v56  ;;  %v11053_v56 = vand.u32 4294901760, %v10940_v38 }
 0x6c5   :  { %5491 = vmatpush1.bf16.msra.mxu0 %v11019_v60  ;;  %v11029_v60 = vand.u32 4294901760, %v10713_v58  ;;  %v11037_v58 = vand.u32 4294901760, %v10911_v52  ;;  %v11044_v52 = vand.u32 4294901760, %v10928_v39 }
 0x6c6   :  { %5493 = vmatprep.subr.bf16.mxu0 %v11020_v55 }
 0x6c7   :  { %v5506_v55 = vpack.c.bf16 %v11029_v60, %v11028_v16 }
 0x6c9   :  { %5495 = vmatpush1.bf16.msra.mxu0 %v11021_v30  ;;  %v11030_v30 = vand.u32 4294901760, %v10716_v62  ;;  %v5512_v62 = vpack.c.bf16 %v11037_v58, %v11036_v33  ;;  %v11057_v58 = vld [vmem:[#allocation21_spill] sm:$0xff] }
 0x6ca   :  { %5497 = vmatprep.subr.bf16.mxu0 %v11022_v25  ;;  %v11031_v25 = vand.u32 4294901760, %v10717_v57  ;;  %v11038_v57 = vand.u32 4294901760, %v10916_v47  ;;  %v11045_v47 = vand.u32 4294901760, %v10927_v0  ;;  %v11056_v0 = vand.u32 4294901760, %v10944_v31 }
 0x6cc   :  { %v5520_v60 = vpack.c.bf16 %v11045_v47, %v11044_v52  ;;  %v11067_v52 = vld [vmem:[#allocation197_spill] sm:$0xff] }
 0x6cd   :  { %5499 = vmatpush1.bf16.msra.mxu0 %v11023_v53  ;;  %v5508_v53 = vpack.c.bf16 %v11031_v25, %v11030_v30  ;;  %v11039_v25 = vand.u32 4294901760, %v10915_v32  ;;  %v11046_v32 = vand.u32 4294901760, %v10932_v23  ;;  %v11058_v23 = vand.u32 4294901760, %v11057_v58 }
 0x6ce   :  { %5501 = vmatprep.subr.bf16.mxu0 %v11024_v18  ;;  %v11032_v18 = vand.u32 4294901760, %v10993_v22  ;;  %v11042_v22 = vand.u32 4294901760, %v10924_v11  ;;  %v11052_v11 = vand.u32 4294901760, %v11051_v41  ;;  %v11068_v31 = vand.u32 4294901760, %v11067_v52  ;;  %v11112_v52 = vld [vmem:[#allocation33_spill] sm:$0xff] }
 0x6cf   :  { %v11075_v41 = vand.u32 4294901760, %v10815_v24  ;;  %v11082_v24 = vand.u32 4294901760, %v10822_v12  ;;  %v11090_v12 = vand.u32 4294901760, %v10982_v63  ;;  %v11097_v63 = vand.u32 4294901760, %v10836_v59  ;;  %v11106_v59 = vld [vmem:[#allocation26_spill] sm:$0xff] }
 0x6d0   :  { %v5518_v16 = vpack.c.bf16 %v11043_v40, %v11042_v22  ;;  %v11064_v22 = vld [vmem:[#allocation58_spill] sm:$0xff] }
 0x6d1   :  { %5503 = vmatpush1.bf16.msra.mxu0 %v11027_v9  ;;  %v11065_v38 = vand.u32 4294901760, %v11064_v22 }
 0x6d2   :  { %5505 = vmatprep.subr.bf16.mxu0 %v5504_v61  ;;  %v5514_v61 = vpack.c.bf16 %v11039_v25, %v11038_v57  ;;  %v11059_v57 = vand.u32 4294901760, %v10948_v29  ;;  %v11060_v25 = vld [vmem:[#allocation51_spill] sm:$0xff]  ;;  %v11070_v29 = vand.u32 4294901760, %v10810_v54  ;;  %v11077_v54 = vand.u32 4294901760, %v10817_v42 }
 0x6d4   :  { %3097 = vmatmul.mubr.f32.vlgmr.msra.gmra.mrb[0].mxu0 %v11032_v18  ;;  %v5516_v18 = vpack.c.bf16 %v11041_v13, %v11040_v44  ;;  %v11062_v13 = vld [vmem:[#allocation56_spill] sm:$0xff] }
 0x6d5   :  { %5507 = vmatpush1.bf16.msra.mxu0 %v5506_v55  ;;  %3360 = vmatprep.mubr.f32.mxu0 %v11035_v26  ;;  %v11047_v55 = vld [vmem:[#allocation41_spill] sm:$0xff] }
 0x6d6   :  { %5509 = vmatprep.subr.bf16.mxu0 %v5508_v53  ;;  %v11048_v2 = vand.u32 4294901760, %v11047_v55  ;;  %v11050_v53 = vand.u32 4294901760, %v11049_v21  ;;  %v11071_v55 = vand.u32 4294901760, %v10961_v19  ;;  %v11073_v21 = vand.u32 4294901760, %v10965_v3 }
 0x6d7   :  { %v11078_v19 = vand.u32 4294901760, %v10818_v5  ;;  %v11080_v3 = vand.u32 4294901760, %v10820_v6  ;;  %v11086_v5 = vand.u32 4294901760, %v10825_v49  ;;  %v11088_v6 = vand.u32 4294901760, %v10827_v45 }
 0x6d8   :  { %v5522_v30 = vpack.c.bf16 %v11048_v2, %v11046_v32  ;;  %v5524_v17 = vpack.c.bf16 %v11052_v11, %v11050_v53  ;;  %v11072_v2 = vand.u32 4294901760, %v10960_v50  ;;  %v11079_v50 = vand.u32 4294901760, %v10819_v48 }
 0x6d9   :  { %5511 = vmatpush1.bf16.msra.mxu0 %v5510_v8  ;;  %v11054_v8 = vld [vmem:[#allocation50_spill] sm:$0xff]  ;;  %v11087_v48 = vand.u32 4294901760, %v10826_v34  ;;  %v11093_v49 = vand.u32 4294901760, %v10832_v27  ;;  %v11094_v34 = vand.u32 4294901760, %v10833_v35  ;;  %v11095_v45 = vand.u32 4294901760, %v10834_v15  ;;  %v11104_v15 = vld [vmem:[#allocation24_spill] sm:$0xff] }
 0x6da   :  { %5513 = vmatprep.subr.bf16.mxu0 %v5512_v62  ;;  %v11055_v39 = vand.u32 4294901760, %v11054_v8  ;;  %v5528_v62 = vpack.c.bf16 %v11058_v23, %v11056_v0  ;;  %v11101_v27 = vand.u32 4294901760, %v10840_v10  ;;  %v11110_v10 = vld [vmem:[#allocation27_spill] sm:$0xff] }
 0x6db   :  { %v5552_v0 = vpack.c.bf16 %v11087_v48, %v11086_v5  ;;  %v3537_v5 = vld [vmem:[%s9441_s10] sm:$0xff]  ;;  %v3538_v48 = vld [vmem:[%s9441_s10 + $0x8] sm:$0xff] }
 0x6dc   :  { %v5526_v33 = vpack.c.bf16 %v11055_v39, %v11053_v56  ;;  %v5546_v56 = vpack.c.bf16 %v11080_v3, %v11079_v50  ;;  %v11084_v39 = vld [vmem:[#allocation207_spill] sm:$0xff]  ;;  %v11131_v50 = vld [vmem:[#allocation208_spill] sm:$0xff]  ;;  %v11132_v3 = vld [vmem:[#allocation82_spill] sm:$0xff] }
 0x6dd   :  { %5515 = vmatpush1.bf16.msra.mxu0 %v5514_v61  ;;  %v11061_v61 = vand.u32 4294901760, %v11060_v25  ;;  %v11085_v42 = vand.u32 4294901760, %v11084_v39  ;;  %v5560_v25 = vpack.c.bf16 %v11095_v45, %v11094_v34  ;;  %v8803_v39 = vld [vmem:[%s9441_s10 + $0x80] sm:$0xff] }
 0x6de   :  { %5517 = vmatprep.subr.bf16.mxu0 %v5516_v18  ;;  %v11063_v18 = vand.u32 4294901760, %v11062_v13 }
 0x6df   :  { %v5530_v44 = vpack.c.bf16 %v11061_v61, %v11059_v57 }
 0x6e0   :  { %v5532_v40 = vpack.c.bf16 %v11065_v38, %v11063_v18  ;;  %v11102_v18 = vld [vmem:[#allocation30_spill] sm:$0xff]  ;;  %v11108_v38 = vld [vmem:[#allocation165_spill] sm:$0xff] }
 0x6e1   :  { %5519 = vmatpush1.bf16.msra.mxu0 %v5518_v16  ;;  %v11066_v16 = vand.u32 4294901760, %v10955_v37  ;;  %v11074_v37 = vand.u32 4294901760, %v10964_v28  ;;  %v11081_v28 = vand.u32 4294901760, %v10821_v4  ;;  %v11089_v4 = vand.u32 4294901760, %v10828_v36 }
 0x6e2   :  { %5521 = vmatprep.subr.bf16.mxu0 %v5520_v60  ;;  %v11069_v60 = vand.u32 4294901760, %v10809_v51  ;;  %v11076_v51 = vand.u32 4294901760, %v10816_v20  ;;  %v11083_v20 = vand.u32 4294901760, %v10823_v43  ;;  %v11091_v43 = vand.u32 4294901760, %v10830_v14 }
 0x6e3   :  { %v5534_v47 = vpack.c.bf16 %v11068_v31, %v11066_v16  ;;  %v5540_v53 = vpack.c.bf16 %v11074_v37, %v11073_v21  ;;  %v5548_v8 = vpack.c.bf16 %v11082_v24, %v11081_v28  ;;  %v5554_v58 = vpack.c.bf16 %v11089_v4, %v11088_v6  ;;  %v11111_v16 = vld [vmem:[#allocation32_spill] sm:$0xff]  ;;  %v11113_v31 = vld [vmem:[#allocation35_spill] sm:$0xff]  ;;  %v11122_v21 = vld [vmem:[#allocation62_spill] sm:$0xff] }
 0x6e4   :  { %v5536_v32 = vpack.c.bf16 %v11070_v29, %v11069_v60  ;;  %v5542_v11 = vpack.c.bf16 %v11076_v51, %v11075_v41  ;;  %v5556_v23 = vpack.c.bf16 %v11091_v43, %v11090_v12  ;;  %v11096_v36 = vand.u32 4294901760, %v10835_v46  ;;  %v11105_v46 = vld [vmem:[#allocation210_spill] sm:$0xff]  ;;  %v11115_v60 = vld [vmem:[#allocation44_spill] sm:$0xff]  ;;  %v11116_v29 = vld [vmem:[#allocation45_spill] sm:$0xff] }
 0x6e5   :  { %5523 = vmatpush1.bf16.msra.mxu0 %v5522_v30  ;;  %v5538_v30 = vpack.c.bf16 %v11072_v2, %v11071_v55  ;;  %v11098_v14 = vand.u32 4294901760, %v10837_v7  ;;  %v11103_v35 = vand.u32 4294901760, %v11102_v18  ;;  %v11107_v7 = vld [vmem:[#allocation159_spill] sm:$0xff]  ;;  %v11119_v55 = vld [vmem:[#allocation53_spill] sm:$0xff]  ;;  %v11123_v37 = vld [vmem:[#allocation200_spill] sm:$0xff]  ;;  %v3580_v6 = vand.u32 4294901760, %v3538_v48 }
 0x6e6   :  { %5525 = vmatprep.subr.bf16.mxu0 %v5524_v17  ;;  %v5544_v17 = vpack.c.bf16 %v11078_v19, %v11077_v54  ;;  %v5562_v61 = vpack.c.bf16 %v11097_v63, %v11096_v36  ;;  %v11120_v2 = vld [vmem:[#allocation55_spill] sm:$0xff]  ;;  %v11125_v41 = vld [vmem:[#allocation65_spill] sm:$0xff]  ;;  %v11134_v28 = vld [vmem:[#allocation86_spill] sm:$0xff] }
 0x6e7   :  { %v5566_v22 = vpack.c.bf16 %v11103_v35, %v11101_v27  ;;  %v11126_v51 = vld [vmem:[#allocation67_spill] sm:$0xff]  ;;  %v11128_v54 = vld [vmem:[#allocation205_spill] sm:$0xff] }
 0x6e8   :  { %v11129_v19 = vld [vmem:[#allocation71_spill] sm:$0xff]  ;;  %v3557_v63 = vld [vmem:[%s9441_s10 + $0xa0] sm:$0xff] }
 0x6e9   :  { %5527 = vmatpush1.bf16.msra.mxu0 %v5526_v33  ;;  %v5550_v33 = vpack.c.bf16 %v11085_v42, %v11083_v20  ;;  %v11135_v24 = vld [vmem:[#allocation155_spill] sm:$0xff]  ;;  %v8808_v42 = vld [vmem:[%s9441_s10 + $0x88] sm:$0xff] }
 0x6ea   :  { %5529 = vmatprep.subr.bf16.mxu0 %v5528_v62  ;;  %v11092_v62 = vand.u32 4294901760, %v10831_v1  ;;  %v3555_v12 = vld [vmem:[%s9441_s10 + $0x90] sm:$0xff]  ;;  %v3556_v43 = vld [vmem:[%s9441_s10 + $0x98] sm:$0xff] }
 0x6ec   :  { %v5558_v57 = vpack.c.bf16 %v11093_v49, %v11092_v62  ;;  %v3634_v62 = vand.u32 4294901760, %v3556_v43  ;;  %v3539_v49 = vld [vmem:[%s9441_s10 + $0x10] sm:$0xff] }
 0x6ed   :  { %5531 = vmatpush1.bf16.msra.mxu0 %v5530_v44  ;;  %v11099_v44 = vld [vmem:[#allocation160_spill] sm:$0xff]  ;;  %v3583_v34 = vand.u32 4294901760, %v3539_v49 }
 0x6ee   :  { %5533 = vmatprep.subr.bf16.mxu0 %v5532_v40  ;;  %v11100_v1 = vand.u32 4294901760, %v11099_v44  ;;  %v11109_v40 = vld [vmem:[#allocation170_spill] sm:$0xff] }
 0x6f0   :  { %v5564_v13 = vpack.c.bf16 %v11100_v1, %v11098_v14  ;;  %v3637_v14 = vand.u32 4294901760, %v3557_v63  ;;  %v3541_v1 = vld [vmem:[%s9441_s10 + $0x20] sm:$0xff] }
 0x6f1   :  { %5535 = vmatpush1.bf16.msra.mxu0 %v5534_v47  ;;  %v11114_v47 = vld [vmem:[#allocation42_spill] sm:$0xff]  ;;  %v3589_v27 = vand.u32 4294901760, %v3541_v1 }
 0x6f2   :  { %5537 = vmatprep.subr.bf16.mxu0 %v5536_v32  ;;  %v11118_v32 = vld [vmem:[#allocation22_spill] sm:$0xff] }
 0x6f5   :  { %5539 = vmatpush1.bf16.msra.mxu0 %v5538_v30  ;;  %v11121_v30 = vld [vmem:[#allocation198_spill] sm:$0xff] }
 0x6f6   :  { %5541 = vmatprep.subr.bf16.mxu0 %v5540_v53  ;;  %v11124_v53 = vld [vmem:[#allocation201_spill] sm:$0xff] }
 0x6f9   :  { %5543 = vmatpush1.bf16.msra.mxu0 %v5542_v11  ;;  %v11127_v11 = vld [vmem:[#allocation204_spill] sm:$0xff] }
 0x6fa   :  { %5545 = vmatprep.subr.bf16.mxu0 %v5544_v17  ;;  %v11130_v17 = vld [vmem:[#allocation78_spill] sm:$0xff] }
 0x6fd   :  { %5547 = vmatpush1.bf16.msra.mxu0 %v5546_v56  ;;  %v11133_v56 = vld [vmem:[#allocation211_spill] sm:$0xff] }
 0x6fe   :  { %5549 = vmatprep.subr.bf16.mxu0 %v5548_v8 }
 0x701   :  { %5551 = vmatpush1.bf16.msra.mxu0 %v5550_v33  ;;  %v3625_v33 = vand.u32 4294901760, %v8803_v39 }
 0x702   :  { %5553 = vmatprep.subr.bf16.mxu0 %v5552_v0  ;;  %v3577_v0 = vand.u32 4294901760, %v3537_v5 }
 0x704   :  { %v8858_v35 = vsub.f32 %v3537_v5, %v3577_v0 }
 0x705   :  { %5555 = vmatpush1.bf16.msra.mxu0 %v5554_v58  ;;  %v8824_v58 = vpack.c.bf16 %v3580_v6, %v3577_v0 }
 0x706   :  { %5557 = vmatprep.subr.bf16.mxu0 %v5556_v23  ;;  %v3631_v23 = vand.u32 4294901760, %v3555_v12 }
 0x707   :  { %11137 = vst [vmem:[#allocation85_spill] sm:$0xff] %v8824_v58 }
 0x709   :  { %5559 = vmatpush1.bf16.msra.mxu0 %v5558_v57  ;;  %v3540_v57 = vld [vmem:[%s9441_s10 + $0x18] sm:$0xff] }
 0x70a   :  { %5561 = vmatprep.subr.bf16.mxu0 %v5560_v25  ;;  %v3586_v45 = vand.u32 4294901760, %v3540_v57  ;;  %v8840_v25 = vpack.c.bf16 %v3634_v62, %v3631_v23 }
 0x70c   :  { %11138 = vst [vmem:[#allocation89_spill] sm:$0xff] %v8840_v25  ;;  %v8842_v36 = vpack.c.bf16 %v3586_v45, %v3583_v34 }
 0x70d   :  { %5563 = vmatpush1.bf16.msra.mxu0 %v5562_v61  ;;  %v3558_v61 = vld [vmem:[%s9441_s10 + $0xa8] sm:$0xff] }
 0x70e   :  { %5565 = vmatprep.subr.bf16.mxu0 %v5564_v13  ;;  %11139 = vst [vmem:[#allocation90_spill] sm:$0xff] %v8842_v36  ;;  %v3640_v44 = vand.u32 4294901760, %v3558_v61  ;;  %v3542_v13 = vld [vmem:[%s9441_s10 + $0x28] sm:$0xff] }
 0x70f   :  { %v3592_v18 = vand.u32 4294901760, %v3542_v13 }
 0x711   :  { %5567 = vmatpush1.bf16.msra.mxu0 %v5566_v22  ;;  %v8860_v22 = vsub.f32 %v3538_v48, %v3580_v6 }
 0x712   :  { %5569 = vmatprep.subr.bf16.mxu0 %v11104_v15  ;;  %v3559_v15 = vld [vmem:[%s9441_s10 + $0xb0] sm:$0xff] }
 0x714   :  { %3362 = vmatmul.mubr.f32.vlgmr.msra.gmra.mrb[0].mxu0 %v11105_v46 }
 0x715   :  { %5571 = vmatpush1.bf16.msra.mxu0 %v11106_v59  ;;  %3497 = vmatprep.mubr.f32.mxu0 %v11035_v26  ;;  %v11117_v26 = vld [vmem:[#allocation47_spill] sm:$0xff] }
 0x716   :  { %5573 = vmatprep.subr.bf16.mxu0 %v11107_v7  ;;  %v3543_v59 = vld [vmem:[%s9441_s10 + $0x30] sm:$0xff]  ;;  %v8871_v7 = vsub.f32 %v3555_v12, %v3631_v23  ;;  %v3565_v12 = vld [vmem:[%s9441_s10 + $0xe0] sm:$0xff] }
 0x719   :  { %5575 = vmatpush1.bf16.msra.mxu0 %v11108_v38  ;;  %v8873_v38 = vsub.f32 %v3556_v43, %v3634_v62  ;;  %v3566_v43 = vld [vmem:[%s9441_s10 + $0xe8] sm:$0xff] }
 0x71a   :  { %5577 = vmatprep.subr.bf16.mxu0 %v11109_v40  ;;  %v8875_v40 = vsub.f32 %v3539_v49, %v3583_v34 }
 0x71d   :  { %5579 = vmatpush1.bf16.msra.mxu0 %v11110_v10  ;;  %v8877_v10 = vsub.f32 %v3540_v57, %v3586_v45 }
 0x71e   :  { %5581 = vmatprep.subr.bf16.mxu0 %v11111_v16  ;;  %v3544_v16 = vld [vmem:[%s9441_s10 + $0x38] sm:$0xff] }
 0x721   :  { %5583 = vmatpush1.bf16.msra.mxu0 %v11112_v52  ;;  %v3561_v52 = vld [vmem:[%s9441_s10 + $0xc0] sm:$0xff] }
 0x722   :  { %5585 = vmatprep.subr.bf16.mxu0 %v11113_v31  ;;  %v3562_v31 = vld [vmem:[%s9441_s10 + $0xc8] sm:$0xff] }
 0x725   :  { %5587 = vmatpush1.bf16.msra.mxu0 %v11114_v47  ;;  %v8888_v47 = vpack.c.bf16 %v3640_v44, %v3637_v14 }
 0x726   :  { %5589 = vmatprep.subr.bf16.mxu0 %v11115_v60  ;;  %v8890_v60 = vsub.f32 %v3557_v63, %v3637_v14 }
 0x727   :  { %11140 = vst [vmem:[#allocation91_spill] sm:$0xff] %v8888_v47 }
 0x729   :  { %5591 = vmatpush1.bf16.msra.mxu0 %v11116_v29  ;;  %v8892_v29 = vsub.f32 %v3558_v61, %v3640_v44 }
 0x72a   :  { %5593 = vmatprep.subr.bf16.mxu0 %v11117_v26  ;;  %v8894_v26 = vpack.c.bf16 %v3592_v18, %v3589_v27 }
 0x72c   :  { %11141 = vst [vmem:[#allocation92_spill] sm:$0xff] %v8894_v26 }
 0x72d   :  { %5595 = vmatpush1.bf16.msra.mxu0 %v11118_v32  ;;  %v3545_v32 = vld [vmem:[%s9441_s10 + $0x40] sm:$0xff] }
 0x72e   :  { %5597 = vmatprep.subr.bf16.mxu0 %v11119_v55  ;;  %v8899_v55 = vsub.f32 %v3541_v1, %v3589_v27  ;;  %v3661_v1 = vand.u32 4294901760, %v3565_v12  ;;  %v3549_v27 = vld [vmem:[%s9441_s10 + $0x60] sm:$0xff] }
 0x731   :  { %5599 = vmatpush1.bf16.msra.mxu0 %v11120_v2  ;;  %v8901_v2 = vsub.f32 %v3542_v13, %v3592_v18  ;;  %v3664_v13 = vand.u32 4294901760, %v3566_v43  ;;  %v3550_v18 = vld [vmem:[%s9441_s10 + $0x68] sm:$0xff] }
 0x732   :  { %5601 = vmatprep.subr.bf16.mxu0 %v11121_v30  ;;  %v3643_v30 = vand.u32 4294901760, %v3559_v15 }
 0x735   :  { %5603 = vmatpush1.bf16.msra.mxu0 %v11122_v21 }
 0x736   :  { %5605 = vmatprep.subr.bf16.mxu0 %v11123_v37  ;;  %v3595_v37 = vand.u32 4294901760, %v3543_v59 }
 0x738   :  { %v8928_v48 = vsub.f32 %v3543_v59, %v3595_v37 }
 0x739   :  { %5607 = vmatpush1.bf16.msra.mxu0 %v11124_v53  ;;  %v3598_v53 = vand.u32 4294901760, %v3544_v16 }
 0x73a   :  { %5609 = vmatprep.subr.bf16.mxu0 %v11125_v41  ;;  %v3649_v41 = vand.u32 4294901760, %v3561_v52 }
 0x73b   :  { %v8926_v5 = vpack.c.bf16 %v3598_v53, %v3595_v37  ;;  %v8930_v0 = vsub.f32 %v3544_v16, %v3598_v53  ;;  %v3552_v37 = vld [vmem:[%s9441_s10 + $0x78] sm:$0xff]  ;;  %v8993_v53 = vsub.f32 %v3566_v43, %v3664_v13 }
 0x73c   :  { %v8941_v23 = vsub.f32 %v3561_v52, %v3649_v41 }
 0x73d   :  { %5611 = vmatpush1.bf16.msra.mxu0 %v11126_v51  ;;  %v3652_v51 = vand.u32 4294901760, %v3562_v31  ;;  %11143 = vst [vmem:[#allocation94_spill] sm:$0xff] %v8926_v5 }
 0x73e   :  { %5613 = vmatprep.subr.bf16.mxu0 %v11127_v11  ;;  %v3546_v11 = vld [vmem:[%s9441_s10 + $0x48] sm:$0xff] }
 0x73f   :  { %v8932_v6 = vpack.c.bf16 %v3652_v51, %v3649_v41  ;;  %v8943_v62 = vsub.f32 %v3562_v31, %v3652_v51  ;;  %v3604_v49 = vand.u32 4294901760, %v3546_v11  ;;  %v3568_v31 = vld [vmem:[%s9441_s10 + $0xf8] sm:$0xff]  ;;  %v3613_v41 = vand.u32 4294901760, %v3549_v27 }
 0x740   :  { %v3616_v51 = vand.u32 4294901760, %v3550_v18 }
 0x741   :  { %5615 = vmatpush1.bf16.msra.mxu0 %v11128_v54  ;;  %v3563_v54 = vld [vmem:[%s9441_s10 + $0xd0] sm:$0xff]  ;;  %11144 = vst [vmem:[#allocation95_spill] sm:$0xff] %v8932_v6  ;;  %v8950_v44 = vsub.f32 %v3546_v11, %v3604_v49 }
 0x742   :  { %5617 = vmatprep.subr.bf16.mxu0 %v11129_v19  ;;  %v3655_v34 = vand.u32 4294901760, %v3563_v54 }
 0x744   :  { %v8969_v16 = vsub.f32 %v3563_v54, %v3655_v34 }
 0x745   :  { %5619 = vmatpush1.bf16.msra.mxu0 %v11130_v17  ;;  %v8913_v17 = vsub.f32 %v3559_v15, %v3643_v30  ;;  %v3567_v15 = vld [vmem:[%s9441_s10 + $0xf0] sm:$0xff] }
 0x746   :  { %5621 = vmatprep.subr.bf16.mxu0 %v11131_v50  ;;  %v3667_v11 = vand.u32 4294901760, %v3567_v15 }
 0x749   :  { %5623 = vmatpush1.bf16.msra.mxu0 %v11132_v3  ;;  %v3601_v3 = vand.u32 4294901760, %v3545_v32 }
 0x74a   :  { %5625 = vmatprep.subr.bf16.mxu0 %v11133_v56  ;;  %v3564_v56 = vld [vmem:[%s9441_s10 + $0xd8] sm:$0xff] }
 0x74b   :  { %v8945_v57 = vsub.f32 %v3545_v32, %v3601_v3  ;;  %v3658_v45 = vand.u32 4294901760, %v3564_v56  ;;  %v8948_v14 = vpack.c.bf16 %v3604_v49, %v3601_v3  ;;  %v3551_v32 = vld [vmem:[%s9441_s10 + $0x70] sm:$0xff] }
 0x74c   :  { %v3619_v3 = vand.u32 4294901760, %v3551_v32 }
 0x74d   :  { %5627 = vmatpush1.bf16.msra.mxu0 %v11134_v28  ;;  %v3547_v28 = vld [vmem:[%s9441_s10 + $0x50] sm:$0xff]  ;;  %11145 = vst [vmem:[#allocation96_spill] sm:$0xff] %v8948_v14  ;;  %v8967_v59 = vpack.c.bf16 %v3658_v45, %v3655_v34  ;;  %v8971_v52 = vsub.f32 %v3564_v56, %v3658_v45  ;;  %v9001_v56 = vsub.f32 %v3549_v27, %v3613_v41  ;;  %v9999_v27 = vand.u32 4294901760, %v8860_v22 }
 0x74e   :  { %5629 = vmatprep.subr.bf16.mxu0 %v11135_v24  ;;  %v3548_v24 = vld [vmem:[%s9441_s10 + $0x58] sm:$0xff]  ;;  %v3607_v63 = vand.u32 4294901760, %v3547_v28  ;;  %v9009_v49 = vsub.f32 %v3551_v32, %v3619_v3  ;;  %v9014_v45 = vpack.c.bf16 %v3616_v51, %v3613_v41 }
 0x74f   :  { %v3610_v61 = vand.u32 4294901760, %v3548_v24  ;;  %11146 = vst [vmem:[#allocation97_spill] sm:$0xff] %v8967_v59  ;;  %11149 = vst [vmem:[#allocation100_spill] sm:$0xff] %v9001_v56 }
 0x750   :  { %11153 = vst [vmem:[#allocation104_spill] sm:$0xff] %v9009_v49  ;;  %11155 = vst [vmem:[#allocation106_spill] sm:$0xff] %v9014_v45 }
 0x751   :  { %5631 = vmatpush1.bf16.msra.mxu0 %v11027_v9  ;;  %v3628_v9 = vand.u32 4294901760, %v8808_v42  ;;  %v8996_v54 = vpack.c.bf16 %v3610_v61, %v3607_v63 }
 0x753   :  { %v8822_v4 = vpack.c.bf16 %v3628_v9, %v3625_v33  ;;  %11147 = vst [vmem:[#allocation98_spill] sm:$0xff] %v8996_v54 }
 0x754   :  { %3499 = vmatmul.mubr.f32.vlgmr.msra.gmra.mrb[0].mxu0 %v11105_v46  ;;  %v3560_v46 = vld [vmem:[%s9441_s10 + $0xb8] sm:$0xff] }
 0x755   :  { %11136 = vst [vmem:[#allocation83_spill] sm:$0xff] %v8822_v4  ;;  %5633 = vmatprep.subr.bf16.mxu1 %v8822_v4  ;;  %v3646_v21 = vand.u32 4294901760, %v3560_v46 }
 0x756   :  { %5635 = vmatpush3.bf16.msra.mxu1 %v8824_v58 }
 0x757   :  { %5637 = vmatprep.subr.bf16.mxu1 %v8840_v25  ;;  %v8911_v19 = vpack.c.bf16 %v3646_v21, %v3643_v30  ;;  %v8915_v50 = vsub.f32 %v3560_v46, %v3646_v21  ;;  %v8964_v46 = vsub.f32 %v8803_v39, %v3625_v33  ;;  %v8982_v39 = vsub.f32 %v8808_v42, %v3628_v9 }
 0x758   :  { %v8984_v33 = vsub.f32 %v3547_v28, %v3607_v63  ;;  %v8986_v30 = vsub.f32 %v3548_v24, %v3610_v61  ;;  %v8988_v21 = vsub.f32 %v3565_v12, %v3661_v1  ;;  %v8998_v42 = vpack.c.bf16 %v3664_v13, %v3661_v1 }
 0x759   :  { %11142 = vst [vmem:[#allocation93_spill] sm:$0xff] %v8911_v19  ;;  %v3670_v9 = vand.u32 4294901760, %v3568_v31  ;;  %v9003_v28 = vsub.f32 %v3550_v18, %v3616_v51  ;;  %v9005_v24 = vsub.f32 %v3567_v15, %v3667_v11  ;;  %v3622_v12 = vand.u32 4294901760, %v3552_v37 }
 0x75a   :  { %5639 = vmatpush3.bf16.msra.mxu1 %v8842_v36  ;;  %11148 = vst [vmem:[#allocation99_spill] sm:$0xff] %v8998_v42  ;;  %v9994_v61 = vand.u32 4294901760, %v8964_v46  ;;  %v9993_v1 = vand.u32 4294901760, %v8982_v39  ;;  %v9997_v13 = vand.u32 4294901760, %v8858_v35 }
 0x75b   :  { %5641 = vmatprep.subr.bf16.mxu1 %v8888_v47  ;;  %11150 = vst [vmem:[#allocation101_spill] sm:$0xff] %v9003_v28  ;;  %11151 = vst [vmem:[#allocation102_spill] sm:$0xff] %v9005_v24  ;;  %v9007_v43 = vsub.f32 %v3568_v31, %v3670_v9  ;;  %v9011_v34 = vsub.f32 %v3552_v37, %v3622_v12  ;;  %v9017_v63 = vpack.c.bf16 %v3670_v9, %v3667_v11 }
 0x75c   :  { %v3804_v18 = vsub.f32 %v8964_v46, %v9994_v61  ;;  %v3811_v15 = vsub.f32 %v8982_v39, %v9993_v1  ;;  %v9030_v31 = vpack.c.bf16 %v3622_v12, %v3619_v3  ;;  %v3692_v32 = vsub.f32 %v8858_v35, %v9997_v13 }
 0x75d   :  { %11152 = vst [vmem:[#allocation103_spill] sm:$0xff] %v9007_v43  ;;  %11154 = vst [vmem:[#allocation105_spill] sm:$0xff] %v9011_v34  ;;  %v3699_v37 = vsub.f32 %v8860_v22, %v9999_v27  ;;  %v9998_v1 = vand.u32 4294901760, %v8871_v7  ;;  %v10002_v61 = vand.u32 4294901760, %v8873_v38  ;;  %v10003_v12 = vand.u32 4294901760, %v8875_v40 }
 0x75e   :  { %5643 = vmatpush3.bf16.msra.mxu1 %v8894_v26  ;;  %11156 = vst [vmem:[#allocation107_spill] sm:$0xff] %v9017_v63  ;;  %11157 = vst [vmem:[#allocation108_spill] sm:$0xff] %v9030_v31  ;;  %v3805_v41 = vand.u32 4294901760, %v3804_v18  ;;  %v3812_v51 = vand.u32 4294901760, %v3811_v15  ;;  %v3693_v11 = vand.u32 4294901760, %v3692_v32 }
 0x75f   :  { %5645 = vmatprep.subr.bf16.mxu1 %v8911_v19  ;;  %v3700_v9 = vand.u32 4294901760, %v3699_v37  ;;  %v3818_v18 = vsub.f32 %v8871_v7, %v9998_v1  ;;  %v3825_v15 = vsub.f32 %v8873_v38, %v10002_v61  ;;  %v3706_v32 = vsub.f32 %v8875_v40, %v10003_v12 }
 0x760   :  { %v8796_v8 = vpop.f32.mrb[18].mxu1  ;;  %v5664_v3 = vpack.c.bf16 %v3812_v51, %v3805_v41 }
 0x761   :  { %v8798_v20 = vpop.f32.mrb[19].mxu1  ;;  %v9044_v13 = vpack.c.bf16 %v3700_v9, %v3693_v11  ;;  %v3819_v41 = vand.u32 4294901760, %v3818_v18  ;;  %v3826_v51 = vand.u32 4294901760, %v3825_v15  ;;  %v10005_v11 = vand.u32 4294901760, %v8890_v60 }
 0x762   :  { %5647 = vmatpush3.bf16.msra.mxu1 %v8926_v5  ;;  %v10010_v9 = vand.u32 4294901760, %v8892_v29  ;;  %v3707_v1 = vand.u32 4294901760, %v3706_v32 }
 0x763   :  { %5649 = vmatprep.subr.bf16.mxu1 %v8932_v6  ;;  %v9062_v61 = vpack.c.bf16 %v3826_v51, %v3819_v41  ;;  %v3832_v12 = vsub.f32 %v8890_v60, %v10005_v11  ;;  %v10018_v11 = vand.u32 4294901760, %v8915_v50 }
 0x764   :  { %v3839_v18 = vsub.f32 %v8892_v29, %v10010_v9  ;;  %v10019_v9 = vand.u32 4294901760, %v8928_v48 }
 0x765   :  { %v3833_v41 = vand.u32 4294901760, %v3832_v12  ;;  %v3853_v12 = vsub.f32 %v8915_v50, %v10018_v11  ;;  %v10027_v11 = vand.u32 4294901760, %v8945_v57 }
 0x766   :  { %5651 = vmatpush3.bf16.msra.mxu1 %v8948_v14  ;;  %v3840_v51 = vand.u32 4294901760, %v3839_v18 }
 0x767   :  { %5653 = vmatprep.subr.bf16.mxu1 %v8967_v59 }
 0x76a   :  { %5655 = vmatpush3.bf16.msra.mxu1 %v8996_v54 }
 0x76b   :  { %5657 = vmatprep.subr.bf16.mxu1 %v8998_v42 }
 0x76e   :  { %5659 = vmatpush3.bf16.msra.mxu1 %v9014_v45  ;;  %v10004_v45 = vand.u32 4294901760, %v8877_v10 }
 0x76f   :  { %5661 = vmatprep.subr.bf16.mxu1 %v9017_v63 }
 0x770   :  { %v3713_v37 = vsub.f32 %v8877_v10, %v10004_v45  ;;  %v10013_v45 = vand.u32 4294901760, %v8913_v17 }
 0x772   :  { %5663 = vmatpush3.bf16.msra.mxu1 %v9030_v31  ;;  %v3714_v27 = vand.u32 4294901760, %v3713_v37  ;;  %v10011_v31 = vand.u32 4294901760, %v8899_v55 }
 0x773   :  { %5665 = vmatprep.subr.bf16.mxu1 %v5664_v3  ;;  %v10012_v3 = vand.u32 4294901760, %v8901_v2 }
 0x774   :  { %v9070_v15 = vpack.c.bf16 %v3714_v27, %v3707_v1  ;;  %v3720_v32 = vsub.f32 %v8899_v55, %v10011_v31  ;;  %v10020_v1 = vand.u32 4294901760, %v8930_v0  ;;  %v9082_v27 = vpack.c.bf16 %v3840_v51, %v3833_v41 }
 0x775   :  { %v3727_v37 = vsub.f32 %v8901_v2, %v10012_v3  ;;  %v3846_v31 = vsub.f32 %v8913_v17, %v10013_v45  ;;  %v3854_v51 = vand.u32 4294901760, %v3853_v12  ;;  %v10021_v3 = vand.u32 4294901760, %v8941_v23 }
 0x776   :  { %v3721_v63 = vand.u32 4294901760, %v3720_v32  ;;  %v3734_v32 = vsub.f32 %v8928_v48, %v10019_v9  ;;  %v10026_v45 = vand.u32 4294901760, %v8943_v62 }
 0x777   :  { %v3728_v42 = vand.u32 4294901760, %v3727_v37  ;;  %v3741_v37 = vsub.f32 %v8930_v0, %v10020_v1  ;;  %v3847_v41 = vand.u32 4294901760, %v3846_v31  ;;  %v3860_v9 = vsub.f32 %v8941_v23, %v10021_v3 }
 0x778   :  { %v3735_v54 = vand.u32 4294901760, %v3734_v32  ;;  %v3867_v31 = vsub.f32 %v8943_v62, %v10026_v45  ;;  %v3748_v32 = vsub.f32 %v8945_v57, %v10027_v11  ;;  %v10029_v1 = vand.u32 4294901760, %v8969_v16 }
 0x779   :  { %v9090_v18 = vpack.c.bf16 %v3728_v42, %v3721_v63  ;;  %v3742_v59 = vand.u32 4294901760, %v3741_v37  ;;  %v10028_v42 = vand.u32 4294901760, %v8950_v44  ;;  %v9102_v63 = vpack.c.bf16 %v3854_v51, %v3847_v41 }
 0x77a   :  { %v3861_v41 = vand.u32 4294901760, %v3860_v9  ;;  %v3868_v51 = vand.u32 4294901760, %v3867_v31  ;;  %v10034_v3 = vand.u32 4294901760, %v8971_v52  ;;  %v3749_v14 = vand.u32 4294901760, %v3748_v32 }
 0x77b   :  { %v9110_v12 = vpack.c.bf16 %v3742_v59, %v3735_v54  ;;  %v3755_v37 = vsub.f32 %v8950_v44, %v10028_v42  ;;  %v10035_v45 = vand.u32 4294901760, %v8984_v33  ;;  %v10036_v59 = vand.u32 4294901760, %v8986_v30 }
 0x77c   :  { %v9122_v54 = vpack.c.bf16 %v3868_v51, %v3861_v41  ;;  %v3874_v11 = vsub.f32 %v8969_v16, %v10029_v1  ;;  %v3881_v9 = vsub.f32 %v8971_v52, %v10034_v3  ;;  %v10037_v42 = vand.u32 4294901760, %v8988_v21 }
 0x77d   :  { %v3756_v6 = vand.u32 4294901760, %v3755_v37  ;;  %v3762_v32 = vsub.f32 %v8984_v33, %v10035_v45  ;;  %v3769_v37 = vsub.f32 %v8986_v30, %v10036_v59  ;;  %v10042_v1 = vand.u32 4294901760, %v8993_v53 }
 0x77e   :  { %v3875_v41 = vand.u32 4294901760, %v3874_v11  ;;  %v3882_v51 = vand.u32 4294901760, %v3881_v9  ;;  %v10043_v3 = vand.u32 4294901760, %v9001_v56  ;;  %v3888_v45 = vsub.f32 %v8988_v21, %v10037_v42 }
 0x77f   :  { %v9130_v31 = vpack.c.bf16 %v3756_v6, %v3749_v14  ;;  %v3763_v5 = vand.u32 4294901760, %v3762_v32  ;;  %v3770_v19 = vand.u32 4294901760, %v3769_v37  ;;  %v10044_v6 = vand.u32 4294901760, %v9003_v28 }
 0x780   :  { %v9142_v14 = vpack.c.bf16 %v3882_v51, %v3875_v41  ;;  %v3895_v11 = vsub.f32 %v8993_v53, %v10042_v1  ;;  %v3776_v32 = vsub.f32 %v9001_v56, %v10043_v3  ;;  %v3889_v41 = vand.u32 4294901760, %v3888_v45 }
 0x781   :  { %v9150_v9 = vpack.c.bf16 %v3770_v19, %v3763_v5  ;;  %v3783_v37 = vsub.f32 %v9003_v28, %v10044_v6  ;;  %v10049_v59 = vand.u32 4294901760, %v9005_v24  ;;  %v10052_v42 = vand.u32 4294901760, %v9007_v43 }
 0x782   :  { %v3896_v51 = vand.u32 4294901760, %v3895_v11  ;;  %v3777_v26 = vand.u32 4294901760, %v3776_v32  ;;  %v10050_v1 = vand.u32 4294901760, %v9009_v49  ;;  %v10051_v19 = vand.u32 4294901760, %v9011_v34 }
 0x783   :  { %v3784_v47 = vand.u32 4294901760, %v3783_v37  ;;  %v3902_v3 = vsub.f32 %v9005_v24, %v10049_v59  ;;  %v3909_v45 = vsub.f32 %v9007_v43, %v10052_v42 }
 0x784   :  { %v9162_v5 = vpack.c.bf16 %v3896_v51, %v3889_v41  ;;  %v3790_v32 = vsub.f32 %v9009_v49, %v10050_v1  ;;  %v3797_v37 = vsub.f32 %v9011_v34, %v10051_v19 }
 0x785   :  { %v9170_v11 = vpack.c.bf16 %v3784_v47, %v3777_v26  ;;  %v3903_v41 = vand.u32 4294901760, %v3902_v3  ;;  %v3910_v51 = vand.u32 4294901760, %v3909_v45  ;;  %v11158_v45 = vld [vmem:[#allocation20_spill] sm:$0xff] }
 0x786   :  { %v3791_v6 = vand.u32 4294901760, %v3790_v32  ;;  %v3798_v36 = vand.u32 4294901760, %v3797_v37  ;;  %v3509_v37 = vsub.s32 0, %v11158_v45 }
 0x787   :  { %v9178_v25 = vpack.c.bf16 %v3910_v51, %v3903_v41  ;;  %v3505_v41 = vld [vmem:[%s9440_s9] sm:$0x3]  ;;  %v3513_v51 = vsub.s32 1, %v11158_v45 }
 0x788   :  { %v9180_v59 = vpack.c.bf16 %v3798_v36, %v3791_v6  ;;  %v3510_v3 = vrot.slane %v3505_v41, %v3509_v37 }
 0x789   :  { %v3514_v42 = vrot.slane %v3505_v41, %v3513_v51 }
 0x827   :  { %v3500_v19 = vpop.f32.mrb[0].mxu0 }
 0x828   :  { %v5824_v1 = vadd.f32 %v3500_v19, %v8796_v8  ;;  %v3502_v36 = vpop.f32.mrb[1].mxu0 }
 0x829   :  { %v5825_v26 = vadd.f32 %v3502_v36, %v8798_v20  ;;  %v11175_v36 = vld [vmem:[#allocation103_spill] sm:$0xff] }
 0x82a   :  { %v3517_v6 = vadd.f32 %v5824_v1, %v3510_v3 }
 0x82b   :  { %v3518_v47 = vadd.f32 %v5825_v26, %v3514_v42 }
 0x82c   :  { %v3521_v58 = vmul.f32 0.044715, %v3517_v6  ;;  %v3519_v8 = vmul.f32 0.5, %v3517_v6 }
 0x82d   :  { %v3522_v32 = vmul.f32 0.044715, %v3518_v47  ;;  %v3520_v51 = vmul.f32 0.5, %v3518_v47 }
 0x82e   :  { %v3523_v4 = vmul.f32 %v3521_v58, %v3517_v6 }
 0x82f   :  { %v3524_v49 = vmul.f32 %v3522_v32, %v3518_v47 }
 0x830   :  { %v3525_v34 = vmul.f32 %v3523_v4, %v3517_v6 }
 0x831   :  { %v3526_v24 = vmul.f32 %v3524_v49, %v3518_v47 }
 0x832   :  { %v3527_v43 = vadd.f32 %v3525_v34, %v3517_v6  ;;  %v11176_v6 = vld [vmem:[#allocation102_spill] sm:$0xff] }
 0x833   :  { %v3528_v56 = vadd.f32 %v3526_v24, %v3518_v47  ;;  %v11177_v32 = vpack.c.bf16 %v11175_v36, %v11176_v6 }
 0x834   :  { %v3529_v28 = vmul.f32 0.7978846, %v3527_v43 }
 0x835   :  { %v3530_v45 = vmul.f32 0.7978846, %v3528_v56 }
 0x836   :  { %5856 = vtanh.f32 %v3529_v28 }
 0x837   :  { %5858 = vtanh.f32 %v3530_v45  ;;  %v11178_v45 = vld [vmem:[#allocation105_spill] sm:$0xff] }
 0x840   :  { %v5857_v37 = vpop.eup %5856 }
 0x841   :  { %v5859_v41 = vpop.eup %5858  ;;  %v3533_v19 = vadd.f32 1.0, %v5857_v37  ;;  %v11179_v37 = vld [vmem:[#allocation104_spill] sm:$0xff] }
 0x842   :  { %v3534_v20 = vadd.f32 1.0, %v5859_v41  ;;  %v11180_v41 = vpack.c.bf16 %v11178_v45, %v11179_v37 }
 0x843   :  { %v3535_v1 = vmul.f32 %v3533_v19, %v3519_v8  ;;  %v11181_v8 = vld [vmem:[#allocation83_spill] sm:$0xff]  ;;  %v11182_v19 = vld [vmem:[#allocation85_spill] sm:$0xff] }
 0x844   :  { %v3536_v42 = vmul.f32 %v3534_v20, %v3520_v51  ;;  %v11183_v51 = vld [vmem:[#allocation89_spill] sm:$0xff]  ;;  %v11184_v20 = vld [vmem:[#allocation90_spill] sm:$0xff] }
 0x845   :  { %v9221_v26 = vand.u32 4294901760, %v3535_v1 }
 0x846   :  { %v9223_v58 = vand.u32 4294901760, %v3536_v42 }
 0x847   :  { %v9226_v4 = vsub.f32 %v3535_v1, %v9221_v26  ;;  %v11185_v1 = vld [vmem:[#allocation91_spill] sm:$0xff] }
 0x848   :  { %v3673_v24 = vsub.f32 %v3536_v42, %v9223_v58  ;;  %v11186_v42 = vld [vmem:[#allocation92_spill] sm:$0xff] }
 0x849   :  { %v3680_v56 = vand.u32 4294901760, %v9226_v4 }
 0x84a   :  { %v3674_v28 = vand.u32 4294901760, %v3673_v24 }
 0x84b   :  { %v3681_v43 = vsub.f32 %v9226_v4, %v3680_v56 }
 0x84c   :  { %v3675_v49 = vsub.f32 %v3673_v24, %v3674_v28 }
 0x84d   :  { %v3682_v47 = vand.u32 4294901760, %v3681_v43  ;;  %v11188_v43 = vld [vmem:[#allocation94_spill] sm:$0xff] }
 0x84e   :  { %v3676_v34 = vand.u32 4294901760, %v3675_v49  ;;  %v11189_v49 = vld [vmem:[#allocation95_spill] sm:$0xff] }
 0x850   :  { %3677 = vmatprep.mubr.f32.mxu1 %v3676_v34  ;;  %v11190_v34 = vld [vmem:[#allocation96_spill] sm:$0xff] }
 0x851   :  { %3683 = vmatmul.mubr.f32.vlgmr.msra.gmra.mrb[20].mxu1 %v3682_v47  ;;  %v11191_v47 = vld [vmem:[#allocation97_spill] sm:$0xff] }
 0x852   :  { %5667 = vmatpush3.bf16.msra.mxu1 %v9044_v13  ;;  %3913 = vmatprep.mubr.f32.mxu1 %v9223_v58  ;;  %v11160_v13 = vpack.c.bf16 %v8860_v22, %v8858_v35 }
 0x853   :  { %5669 = vmatprep.subr.bf16.mxu1 %v9062_v61  ;;  %v11159_v61 = vpack.c.bf16 %v8982_v39, %v8964_v46 }
 0x856   :  { %5671 = vmatpush3.bf16.msra.mxu1 %v9070_v15  ;;  %v11161_v15 = vpack.c.bf16 %v8873_v38, %v8871_v7 }
 0x857   :  { %5673 = vmatprep.subr.bf16.mxu1 %v9082_v27  ;;  %v11163_v27 = vpack.c.bf16 %v8892_v29, %v8890_v60 }
 0x85a   :  { %5675 = vmatpush3.bf16.msra.mxu1 %v9090_v18  ;;  %v11164_v18 = vpack.c.bf16 %v8901_v2, %v8899_v55 }
 0x85b   :  { %5677 = vmatprep.subr.bf16.mxu1 %v9102_v63  ;;  %v11165_v63 = vpack.c.bf16 %v8915_v50, %v8913_v17 }
 0x85e   :  { %5679 = vmatpush3.bf16.msra.mxu1 %v9110_v12  ;;  %v11166_v12 = vpack.c.bf16 %v8930_v0, %v8928_v48 }
 0x85f   :  { %5681 = vmatprep.subr.bf16.mxu1 %v9122_v54  ;;  %v11168_v54 = vpack.c.bf16 %v8950_v44, %v8945_v57 }
 0x862   :  { %5683 = vmatpush3.bf16.msra.mxu1 %v9130_v31  ;;  %v11169_v31 = vpack.c.bf16 %v8971_v52, %v8969_v16 }
 0x863   :  { %5685 = vmatprep.subr.bf16.mxu1 %v9142_v14  ;;  %v11170_v14 = vpack.c.bf16 %v8986_v30, %v8984_v33 }
 0x866   :  { %5687 = vmatpush3.bf16.msra.mxu1 %v9150_v9  ;;  %v11171_v9 = vpack.c.bf16 %v8993_v53, %v8988_v21 }
 0x867   :  { %5689 = vmatprep.subr.bf16.mxu1 %v9162_v5  ;;  %v11172_v5 = vld [vmem:[#allocation101_spill] sm:$0xff] }
 0x86a   :  { %5691 = vmatpush3.bf16.msra.mxu1 %v9170_v11  ;;  %v11173_v11 = vld [vmem:[#allocation100_spill] sm:$0xff] }
 0x86b   :  { %5693 = vmatprep.subr.bf16.mxu1 %v9178_v25  ;;  %v11162_v25 = vpack.c.bf16 %v8877_v10, %v8875_v40  ;;  %v11174_v3 = vpack.c.bf16 %v11172_v5, %v11173_v11 }
 0x86e   :  { %5695 = vmatpush3.bf16.msra.mxu1 %v9180_v59  ;;  %v11167_v59 = vpack.c.bf16 %v8943_v62, %v8941_v23 }
 0x86f   :  { %5697 = vmatprep.subr.bf16.mxu1 %v11159_v61  ;;  %v11192_v61 = vld [vmem:[#allocation98_spill] sm:$0xff] }
 0x871   :  { %3915 = vmatmul.mubr.f32.vlgmr.msra.gmra.mrb[22].mxu1 %v9221_v26 }
 0x872   :  { %5699 = vmatpush3.bf16.msra.mxu1 %v11160_v13  ;;  %4050 = vmatprep.mubr.f32.mxu1 %v3673_v24  ;;  %v11187_v24 = vld [vmem:[#allocation93_spill] sm:$0xff]  ;;  %v11194_v13 = vld [vmem:[#allocation106_spill] sm:$0xff] }
 0x873   :  { %5701 = vmatprep.subr.bf16.mxu1 %v11161_v15  ;;  %v11195_v15 = vld [vmem:[#allocation107_spill] sm:$0xff] }
 0x876   :  { %5703 = vmatpush3.bf16.msra.mxu1 %v11162_v25  ;;  %v11196_v25 = vand.u32 4294901760, %v8964_v46  ;;  %v11203_v46 = vand.u32 4294901760, %v8875_v40  ;;  %v11210_v40 = vand.u32 4294901760, %v8915_v50  ;;  %v11217_v50 = vand.u32 4294901760, %v8969_v16 }
 0x877   :  { %5705 = vmatprep.subr.bf16.mxu1 %v11163_v27  ;;  %v11197_v27 = vand.u32 4294901760, %v8982_v39  ;;  %v11204_v39 = vand.u32 4294901760, %v8877_v10  ;;  %v11211_v10 = vand.u32 4294901760, %v8928_v48  ;;  %v11218_v48 = vand.u32 4294901760, %v8971_v52 }
 0x878   :  { %v11224_v16 = vand.u32 4294901760, %v11172_v5  ;;  %v11225_v52 = vand.u32 4294901760, %v11176_v6 }
 0x87a   :  { %5707 = vmatpush3.bf16.msra.mxu1 %v11164_v18  ;;  %v5760_v18 = vpack.c.bf16 %v11197_v27, %v11196_v25 }
 0x87b   :  { %5709 = vmatprep.subr.bf16.mxu1 %v11165_v63  ;;  %v11198_v63 = vld [vmem:[#allocation108_spill] sm:$0xff] }
 0x87e   :  { %5711 = vmatpush3.bf16.msra.mxu1 %v11166_v12  ;;  %v11199_v12 = vand.u32 4294901760, %v8858_v35  ;;  %v5766_v35 = vpack.c.bf16 %v11204_v39, %v11203_v46 }
 0x87f   :  { %5713 = vmatprep.subr.bf16.mxu1 %v11167_v59  ;;  %v11200_v59 = vand.u32 4294901760, %v8860_v22  ;;  %v11205_v22 = vand.u32 4294901760, %v8890_v60  ;;  %v11212_v60 = vand.u32 4294901760, %v8930_v0  ;;  %v11219_v0 = vand.u32 4294901760, %v8984_v33 }
 0x880   :  { %v11226_v33 = vand.u32 4294901760, %v11175_v36 }
 0x881   :  { %v5774_v25 = vpack.c.bf16 %v11212_v60, %v11211_v10 }
 0x882   :  { %5715 = vmatpush3.bf16.msra.mxu1 %v11168_v54  ;;  %v5762_v54 = vpack.c.bf16 %v11200_v59, %v11199_v12  ;;  %v5780_v12 = vpack.c.bf16 %v11218_v48, %v11217_v50 }
 0x883   :  { %5717 = vmatprep.subr.bf16.mxu1 %v11169_v31  ;;  %v11201_v31 = vand.u32 4294901760, %v8871_v7 }
 0x886   :  { %5719 = vmatpush3.bf16.msra.mxu1 %v11170_v14  ;;  %v11202_v14 = vand.u32 4294901760, %v8873_v38  ;;  %v11207_v38 = vand.u32 4294901760, %v8899_v55  ;;  %v11214_v55 = vand.u32 4294901760, %v8943_v62  ;;  %v11221_v62 = vand.u32 4294901760, %v8988_v21 }
 0x887   :  { %5721 = vmatprep.subr.bf16.mxu1 %v11171_v9  ;;  %v11228_v21 = vand.u32 4294901760, %v11178_v45 }
 0x888   :  { %v5764_v9 = vpack.c.bf16 %v11202_v14, %v11201_v31  ;;  %v5788_v14 = vpack.c.bf16 %v11226_v33, %v11225_v52 }
 0x88a   :  { %5723 = vmatpush3.bf16.msra.mxu1 %v11174_v3  ;;  %v11206_v3 = vand.u32 4294901760, %v8892_v29  ;;  %v11213_v29 = vand.u32 4294901760, %v8941_v23  ;;  %v11220_v23 = vand.u32 4294901760, %v8986_v30  ;;  %v11227_v30 = vand.u32 4294901760, %v11179_v37 }
 0x88b   :  { %5725 = vmatprep.subr.bf16.mxu1 %v11177_v32  ;;  %v11209_v32 = vand.u32 4294901760, %v8913_v17  ;;  %v11216_v17 = vand.u32 4294901760, %v8950_v44  ;;  %v11223_v44 = vand.u32 4294901760, %v11173_v11  ;;  %v4516_v11 = vld [vmem:[%s9442_s11] ss:$0 sm:$0xff]  ;;  %s5969_s11 = smov [#allocation8]  }
 0x88c   :  { %v5768_v7 = vpack.c.bf16 %v11206_v3, %v11205_v22  ;;  %v5776_v27 = vpack.c.bf16 %v11214_v55, %v11213_v29  ;;  %v5782_v59 = vpack.c.bf16 %v11220_v23, %v11219_v0  ;;  %s4468_s22 = sshll.u32 %s5969_s11, 4  ;;  %s4469_s22 = int_to_ptr.vmem [resolvable:$true] %s4468_s22 }
 0x88d   :  { %v5786_v31 = vpack.c.bf16 %v11224_v16, %v11223_v44  ;;  %s5911_s23 = scalar_lea.vmem %s4469_s22, 256  ;;  %p5916_p2 = scmp.lt.s32.totalorder %s4469_s22, %s4469_s22 }
 0x88e   :  { %5727 = vmatpush3.bf16.msra.mxu1 %v11180_v41  ;;  %v5772_v41 = vpack.c.bf16 %v11210_v40, %v11209_v32  ;;  %p5912_p1 = scmp.ne.s32.totalorder %s4469_s22, %s5911_s23  ;;  %p5917_p8 = scmp.lt.s32.totalorder %s5911_s23, %s5911_s23 }
 0x88f   :  { %5729 = vmatprep.subr.bf16.mxu1 %v11181_v8 }
 0x890   :  { %p5918_p9 = por %p5917_p8, %p5916_p2 }
 0x891   :  { %4053 = vmatmul.mubr.f32.vlgmr.msra.gmra.mrb[24].mxu1 %v9226_v4  ;;  %v11208_v4 = vand.u32 4294901760, %v8901_v2  ;;  %v11215_v2 = vand.u32 4294901760, %v8945_v57  ;;  %v11222_v57 = vand.u32 4294901760, %v8993_v53 }
 0x892   :  { %5731 = vmatpush3.bf16.msra.mxu1 %v11182_v19  ;;  %4157 = vmatprep.mubr.f32.mxu1 %v3674_v28  ;;  %v11193_v28 = vld [vmem:[#allocation99_spill] sm:$0xff]  ;;  %p5919_p10 = pnand %p5918_p9, %p5912_p1 }
 0x893   :  { %5733 = vmatprep.subr.bf16.mxu1 %v11183_v51 }
 0x896   :  { %5735 = vmatpush3.bf16.msra.mxu1 %v11184_v20 }
 0x897   :  { %5737 = vmatprep.subr.bf16.mxu1 %v11185_v1 }
 0x89a   :  { %5739 = vmatpush3.bf16.msra.mxu1 %v11186_v42 }
 0x89b   :  { %5741 = vmatprep.subr.bf16.mxu1 %v11187_v24 }
 0x89e   :  { %5743 = vmatpush3.bf16.msra.mxu1 %v11188_v43 }
 0x89f   :  { %5745 = vmatprep.subr.bf16.mxu1 %v11189_v49 }
 0x8a2   :  { %5747 = vmatpush3.bf16.msra.mxu1 %v11190_v34 }
 0x8a3   :  { %5749 = vmatprep.subr.bf16.mxu1 %v11191_v47 }
 0x8a6   :  { %5751 = vmatpush3.bf16.msra.mxu1 %v11192_v61 }
 0x8a7   :  { %5753 = vmatprep.subr.bf16.mxu1 %v11193_v28 }
 0x8aa   :  { %5755 = vmatpush3.bf16.msra.mxu1 %v11194_v13 }
 0x8ab   :  { %5757 = vmatprep.subr.bf16.mxu1 %v11195_v15 }
 0x8ae   :  { %5759 = vmatpush3.bf16.msra.mxu1 %v11198_v63 }
 0x8af   :  { %5761 = vmatprep.subr.bf16.mxu1 %v5760_v18  ;;  %v5778_v18 = vpack.c.bf16 %v11216_v17, %v11215_v2 }
 0x8b1   :  { %4161 = vmatmul.mubr.f32.vlgmr.msra.gmra.mrb[26].mxu1 %v3680_v56  ;;  %v5770_v56 = vpack.c.bf16 %v11208_v4, %v11207_v38 }
 0x8b2   :  { %5763 = vmatpush3.bf16.msra.mxu1 %v5762_v54  ;;  %4327 = vmatprep.mubr.f32.mxu1 %v9223_v58  ;;  %v5784_v54 = vpack.c.bf16 %v11222_v57, %v11221_v62 }
 0x8b3   :  { %5765 = vmatprep.subr.bf16.mxu1 %v5764_v9  ;;  %v5790_v9 = vpack.c.bf16 %v11228_v21, %v11227_v30 }
 0x8b6   :  { %5767 = vmatpush3.bf16.msra.mxu1 %v5766_v35 }
 0x8b7   :  { %5769 = vmatprep.subr.bf16.mxu1 %v5768_v7 }
 0x8ba   :  { %5771 = vmatpush3.bf16.msra.mxu1 %v5770_v56 }
 0x8bb   :  { %5773 = vmatprep.subr.bf16.mxu1 %v5772_v41 }
 0x8be   :  { %5775 = vmatpush3.bf16.msra.mxu1 %v5774_v25 }
 0x8bf   :  { %5777 = vmatprep.subr.bf16.mxu1 %v5776_v27 }
 0x8c2   :  { %5779 = vmatpush3.bf16.msra.mxu1 %v5778_v18 }
 0x8c3   :  { %5781 = vmatprep.subr.bf16.mxu1 %v5780_v12 }
 0x8c6   :  { %5783 = vmatpush3.bf16.msra.mxu1 %v5782_v59 }
 0x8c7   :  { %5785 = vmatprep.subr.bf16.mxu1 %v5784_v54 }
 0x8ca   :  { %5787 = vmatpush3.bf16.msra.mxu1 %v5786_v31 }
 0x8cb   :  { %5789 = vmatprep.subr.bf16.mxu1 %v5788_v14 }
 0x8ce   :  { %5791 = vmatpush3.bf16.msra.mxu1 %v5790_v9 }
 0x8cf   :  { %5793 = vmatprep.subr.bf16.mxu1 %v11181_v8 }
 0x8d1   :  { %4329 = vmatmul.mubr.f32.vlgmr.msra.gmra.mrb[28].mxu1 %v9221_v26 }
 0x8d2   :  { %5795 = vmatpush3.bf16.msra.mxu1 %v11182_v19  ;;  %4431 = vmatprep.mubr.f32.mxu1 %v9223_v58 }
 0x8d3   :  { %5797 = vmatprep.subr.bf16.mxu1 %v11183_v51 }
 0x8d6   :  { %5799 = vmatpush3.bf16.msra.mxu1 %v11184_v20 }
 0x8d7   :  { %5801 = vmatprep.subr.bf16.mxu1 %v11185_v1 }
 0x8da   :  { %5803 = vmatpush3.bf16.msra.mxu1 %v11186_v42 }
 0x8db   :  { %5805 = vmatprep.subr.bf16.mxu1 %v11187_v24 }
 0x8de   :  { %5807 = vmatpush3.bf16.msra.mxu1 %v11188_v43 }
 0x8df   :  { %5809 = vmatprep.subr.bf16.mxu1 %v11189_v49 }
 0x8e2   :  { %5811 = vmatpush3.bf16.msra.mxu1 %v11190_v34 }
 0x8e3   :  { %5813 = vmatprep.subr.bf16.mxu1 %v11191_v47 }
 0x8e6   :  { %5815 = vmatpush3.bf16.msra.mxu1 %v11192_v61 }
 0x8e7   :  { %5817 = vmatprep.subr.bf16.mxu1 %v11193_v28 }
 0x8ea   :  { %5819 = vmatpush3.bf16.msra.mxu1 %v11194_v13 }
 0x8eb   :  { %5821 = vmatprep.subr.bf16.mxu1 %v11195_v15 }
 0x8ee   :  { %5823 = vmatpush3.bf16.msra.mxu1 %v11198_v63 }
 0x8f1   :  { %4433 = vmatmul.mubr.f32.vlgmr.msra.gmra.mrb[30].mxu1 %v9221_v26 }
 0x924   :  { %v4587_v53 = vpop.f32.mrb[20].mxu1 }
 0x925   :  { %v4588_v58 = vpop.f32.mrb[21].mxu1 }
 0x926   :  { %v4589_v5 = vadd.f32 %v4588_v58, %v4587_v53 }
 0x928   :  { %v3685_v45 = vadd.f32 %v4589_v5, %v4516_v11 }
 0x944   :  { %v4622_v36 = vpop.f32.mrb[22].mxu1 }
 0x945   :  { %v4623_v6 = vpop.f32.mrb[23].mxu1 }
 0x946   :  { %v4624_v37 = vadd.f32 %v4623_v6, %v4622_v36 }
 0x948   :  { %v3917_v8 = vadd.f32 %v4624_v37, %v3685_v45 }
 0x964   :  { %v4657_v19 = vpop.f32.mrb[24].mxu1 }
 0x965   :  { %v4658_v51 = vpop.f32.mrb[25].mxu1 }
 0x966   :  { %v4659_v20 = vadd.f32 %v4658_v51, %v4657_v19 }
 0x968   :  { %v4055_v1 = vadd.f32 %v4659_v20, %v3917_v8 }
 0x984   :  { %v4692_v42 = vpop.f32.mrb[26].mxu1 }
 0x985   :  { %v4693_v24 = vpop.f32.mrb[27].mxu1 }
 0x986   :  { %v4694_v43 = vadd.f32 %v4693_v24, %v4692_v42 }
 0x988   :  { %v4163_v26 = vadd.f32 %v4694_v43, %v4055_v1 }
 0x9a4   :  { %v4727_v49 = vpop.f32.mrb[28].mxu1 }
 0x9a5   :  { %v4728_v34 = vpop.f32.mrb[29].mxu1 }
 0x9a6   :  { %v4729_v47 = vadd.f32 %v4728_v34, %v4727_v49 }
 0x9a8   :  { %v4331_v61 = vadd.f32 %v4729_v47, %v4163_v26 }
 0x9c4   :  { %v4762_v28 = vpop.f32.mrb[30].mxu1 }
 0x9c5   :  { %v4763_v13 = vpop.f32.mrb[31].mxu1 }
 0x9c6   :  { %v4764_v15 = vadd.f32 %v4763_v13, %v4762_v28 }
 0x9c8   :  { %v4435_v63 = vadd.f32 %v4764_v15, %v4331_v61 }
 0x9ca   :  { %v4439_v46 = vsel %vm4438_vm6, %v4435_v63, -inf }
 0x9cb   :  { %4440 = vmax.xlane.f32.xlu0 %v4439_v46 }
 0xa58   :  { %v4441_v39 = vpop.xlane.xlu0 %4440 }
 0xa59   :  { %v4442_v35 = vsub.f32 %v4435_v63, %v4441_v39 }
 0xa5b   :  { %v4443_v22 = vmul.f32 1.442695, %v4442_v35 }
 0xa5d   :  { %5860 = vpow2.f32 %v4443_v22 }
 0xa67   :  { %v5861_v3 = vpop.eup %5860 }
 0xa68   :  { %v4445_v7 = vsel %vm4438_vm6, %v5861_v3, 0.0 }
 0xa69   :  { %4446 = vadd.xlane.f32.xlu0 %v4445_v7 }
 0xa6a   :  { %5922 = shalt.err (!%p5919_p10)
}
 0xa6b   :  { %s5923_s25 = scalar_lea.hbm %s9444_s13, 256 }
 0xa6c   :  { %p5924_p11 = scmp.ne.s32.totalorder %s9444_s13, %s5923_s25  ;;  %p5927_p12 = scmp.lt.u32.totalorder %s5923_s25, %s9444_s13 }
 0xa6e   :  { %p5929_p13 = pnand %p5927_p12, %p5924_p11 }
 0xa70   :  { %5932 = shalt.err (!%p5929_p13)
}
 0xa71   :  { %s5970_s28 = smov 128   ;;  %s5971_s29 = smov 8  }
 0xa72   :  { %4474 = dma.vmem_to_hbm [thread:$0]  %s4469_s22, 256, %s9444_s13, [#allocation9], %s5970_s28, %s5970_s28, %s5971_s29  }
 0xa73   :  { %s5972_s5 = smov [#allocation6]  }
 0xa74   :  { %s4459_s30 = sshll.u32 %s5972_s5, 4  ;;  %s4460_s30 = int_to_ptr.vmem [resolvable:$true] %s4459_s30 }
 0xa75   :  { %s5933_s14 = scalar_lea.vmem %s4460_s30, 32  ;;  %p5938_p3 = scmp.lt.s32.totalorder %s4460_s30, %s4460_s30 }
 0xa76   :  { %p5934_p0 = scmp.ne.s32.totalorder %s4460_s30, %s5933_s14  ;;  %p5939_p4 = scmp.lt.s32.totalorder %s5933_s14, %s5933_s14 }
 0xa78   :  { %p5940_p5 = por %p5939_p4, %p5938_p3 }
 0xa7a   :  { %p5941_p6 = pnand %p5940_p5, %p5934_p0 }
 0xaf6   :  { %v4447_v38 = vpop.xlane.xlu0 %4446 }
 0xaf7   :  { %5862 = vlog2.f32 %v4447_v38 }
 0xb01   :  { %v5863_v4 = vpop.eup %5862 }
 0xb02   :  { %v4449_v56 = vmul.f32 0.6931472, %v5863_v4 }
 0xb04   :  { %v4450_v32 = vadd.f32 %v4449_v56, %v4441_v39 }
 0xb06   :  { %v4451_v40 = vsub.f32 %v4435_v63, %v4450_v32 }
 0xb08   :  { %4452 = vst.msk [vmem:[#allocation6] sm:$0x3] %vm4438_vm6, %v4451_v40 }
 0xb09   :  { %5944 = shalt.err (!%p5941_p6)
}
 0xb0a   :  { %s5945_s16 = scalar_lea.hbm %s9443_s12, 32 }
 0xb0b   :  { %p5946_p7 = scmp.ne.s32.totalorder %s9443_s12, %s5945_s16  ;;  %p5949_p1 = scmp.lt.u32.totalorder %s5945_s16, %s9443_s12 }
 0xb0d   :  { %p5951_p2 = pnand %p5949_p1, %p5946_p7 }
 0xb0f   :  { %5954 = shalt.err (!%p5951_p2)
}
 0xb10   :  { %4462 = dma.vmem_to_hbm [thread:$0]  %s4460_s30, 32, %s9443_s12, [#allocation7]  }
 0xb11   :  { %5959 = dma.done.wait [#allocation7], 32  }
 0xb12   :  { %5960 = vsyncadd [#allocation7], 4294967264 }
 0xb13   :  { %5961 = dma.done.wait [#allocation9], 256  }
 0xb14   :  { %5962 = vsyncadd [#allocation9], 4294967040 }
 0xb15   :  { %4481 = vsyncpa [#allocation7], 1 }
 0xb16   :  { %4482 = vsyncpa [#allocation9], 1 }
 0xb17   :  { %4483 = vsyncmov [#allocation5] }
 0xb1a   :  { %s4484_s10 = vpop.sfrf %4483 }
 0xb1b   :  { %p4517_p8 = scmp.ne.s32.totalorder %s4484_s10, 0 }
 0xb1d   :  { %4488 = shalt.err (%p4517_p8)  }
 0xb1e   :  { %4490 = vsyncmov [#allocation5 + $0x1] }
 0xb21   :  { %s4491_s6 = vpop.sfrf %4490 }
 0xb22   :  { %p4518_p9 = scmp.ne.s32.totalorder %s4491_s6, 0 }
 0xb24   :  { %4495 = shalt.err (%p4518_p9)  }

</bundles_post_ra>
